<compile_context>
chip_gen: v7x
topology: tpu7x:2x2x1
jax: 0.10.0
libtpu: 0.0.40
codegen_flags: <defaults>
</compile_context>

<pallas_src>
import math
import numpy as np
import jax
import jax.numpy as jnp
from jax import lax
from jax.experimental import pallas as pl
from jax.experimental.pallas import tpu as pltpu

VMEM = pltpu.MemorySpace.VMEM
SMEM = pltpu.MemorySpace.SMEM
vspec = pl.BlockSpec(memory_space=VMEM)
sspec = pl.BlockSpec(memory_space=SMEM)

GP = 128  # padded per-gate width (lane aligned); real gate widths are 40 / 32.


# ------------------------------------------------------------- fused kernel --
def cvae_kernel(tenses_ref, enc_tok_ref, dec_in_ref, dec_tgt_ref, eps_ref,
                cond_emb_ref, enc_init_ref,
                enc_x_tab_ref, enc_wh_ref,
                dec_x_tab_ref, dec_wh_ref,
                out_w_ref, out_b_ref,
                proj_w_ref, proj_b_ref,
                h_l2h_w_ref, h_l2h_b_ref,
                c_l2h_w_ref, c_l2h_b_ref,
                topi_ref, loss_ref,
                h_all_ref):
    f32 = jnp.float32
    L_enc = enc_tok_ref.shape[0]
    L_dec = dec_in_ref.shape[0]
    V = enc_x_tab_ref.shape[0]
    LAT = eps_ref.shape[1]

    # Token one-hots + per-sequence input-side gate contributions (one batched
    # MXU matmul each; replaces per-step embedding gathers + x@Wx on the
    # serial recurrence path).
    iota_e = lax.broadcasted_iota(jnp.int32, (L_enc, V), 1)
    onehot_e = (iota_e == enc_tok_ref[...]).astype(f32)
    xc_e = jnp.dot(onehot_e, enc_x_tab_ref[...], preferred_element_type=f32)

    iota_d = lax.broadcasted_iota(jnp.int32, (L_dec, V), 1)   # hoisted, reused below
    onehot_d = (iota_d == dec_in_ref[...]).astype(f32)
    xc_d = jnp.dot(onehot_d, dec_x_tab_ref[...], preferred_element_type=f32)

    def lstm_cell(x_contrib, h, c, wh_ref):
        # Fused gates: one [1,GP]@[GP,4*GP] matmul per step (PyTorch order i,f,g,o).
        gates = x_contrib + jnp.dot(h, wh_ref[...], preferred_element_type=f32)
        i_g = jax.nn.sigmoid(gates[:, 0 * GP:1 * GP])
        f_g = jax.nn.sigmoid(gates[:, 1 * GP:2 * GP])
        g_g = jnp.tanh(gates[:, 2 * GP:3 * GP])
        o_g = jax.nn.sigmoid(gates[:, 3 * GP:4 * GP])
        c_new = f_g * c + i_g * g_g
        h_new = o_g * jnp.tanh(c_new)
        return h_new, c_new

    # ---------------- encoder recurrence (fully unrolled, 1 matmul / step) ---
    h = enc_init_ref[pl.ds(tenses_ref[0], 1), :]      # [1,GP] = [0_H | cond | 0]
    c = h
    for t in range(L_enc):
        h, c = lstm_cell(xc_e[t:t + 1, :], h, c, enc_wh_ref)

    # ---------------- mean / logvar projections (stacked weight matrix) ------
    proj_h = jnp.dot(h, proj_w_ref[...], preferred_element_type=f32) + proj_b_ref[...]
    proj_c = jnp.dot(c, proj_w_ref[...], preferred_element_type=f32) + proj_b_ref[...]
    mean_h = proj_h[:, 0 * LAT:1 * LAT]
    logvar_h = proj_h[:, 1 * LAT:2 * LAT]
    mean_c = proj_c[:, 2 * LAT:3 * LAT]
    logvar_c = proj_c[:, 3 * LAT:4 * LAT]

    loss_ref[1] = -0.5 * jnp.sum(1.0 + logvar_h - mean_h * mean_h - jnp.exp(logvar_h))
    loss_ref[2] = -0.5 * jnp.sum(1.0 + logvar_c - mean_c * mean_c - jnp.exp(logvar_c))

    # ---------------- reparameterize (eps passed in as [2,LAT]) --------------
    h_lat = mean_h + eps_ref[0:1, :] * jnp.exp(0.5 * logvar_h)
    c_lat = mean_c + eps_ref[1:2, :] * jnp.exp(0.5 * logvar_c)

    # ---------------- latent -> decoder initial state ------------------------
    cond_t = cond_emb_ref[pl.ds(tenses_ref[1], 1), :]                   # [1, CE]
    h = (jnp.dot(h_lat, h_l2h_w_ref[0:LAT, :], preferred_element_type=f32)
         + jnp.dot(cond_t, h_l2h_w_ref[LAT:, :], preferred_element_type=f32)
         + h_l2h_b_ref[...])                                            # [1, GP]
    c = (jnp.dot(c_lat, c_l2h_w_ref[0:LAT, :], preferred_element_type=f32)
         + jnp.dot(cond_t, c_l2h_w_ref[LAT:, :], preferred_element_type=f32)
         + c_l2h_b_ref[...])

    # ---------------- decoder recurrence (store h_t, defer projection) -------
    for t in range(L_dec):
        h, c = lstm_cell(xc_d[t:t + 1, :], h, c, dec_wh_ref)
        h_all_ref[pl.ds(t, 1), :] = h

    # ---------------- batched output projection + argmax + cross-entropy -----
    logits = (jnp.dot(h_all_ref[...], out_w_ref[...], preferred_element_type=f32)
              + out_b_ref[...])                                         # [L_dec, V]
    m = jnp.max(logits, axis=1, keepdims=True)
    topi_ref[...] = jnp.min(jnp.where(logits == m, iota_d, V),
                            axis=1, keepdims=True).astype(jnp.int32)
    lse = m + jnp.log(jnp.sum(jnp.exp(logits - m), axis=1, keepdims=True))
    tgt_logit = jnp.sum(jnp.where(iota_d == dec_tgt_ref[...], logits, 0.0),
                        axis=1, keepdims=True)
    loss_ref[0] = jnp.sum(lse - tgt_logit) / f32(L_dec)


# ---------------------------------------------------------------- parameters --
def _uniform(key, shape, fan_in):
    bound = 1.0 / math.sqrt(fan_in)
    return jax.random.uniform(key, shape, jnp.float32, -bound, bound)


def init_params(key, vocab_size, latent_size, hidden_size, condition_size,
                cond_emb_size):
    HC = hidden_size + cond_emb_size          # encoder LSTM width
    keys = jax.random.split(key, 24)
    p = {}
    p['enc_emb'] = jax.random.normal(keys[0], (vocab_size, HC), jnp.float32)
    p['dec_emb'] = jax.random.normal(keys[1], (vocab_size, hidden_size), jnp.float32)
    p['cond_emb'] = jax.random.normal(keys[2], (condition_size, cond_emb_size), jnp.float32)
    # encoder LSTM(HC -> HC), per-gate (i,f,g,o) weights
    p['enc_wx'] = _uniform(keys[3], (4, HC, HC), HC)
    p['enc_wh'] = _uniform(keys[4], (4, HC, HC), HC)
    p['enc_b'] = _uniform(keys[5], (4, 1, HC), HC)
    # decoder LSTM(H -> H)
    p['dec_wx'] = _uniform(keys[6], (4, hidden_size, hidden_size), hidden_size)
    p['dec_wh'] = _uniform(keys[7], (4, hidden_size, hidden_size), hidden_size)
    p['dec_b'] = _uniform(keys[8], (4, 1, hidden_size), hidden_size)
    # decoder output Linear(H -> V)
    p['out_wt'] = _uniform(keys[9], (hidden_size, vocab_size), hidden_size)
    p['out_b'] = _uniform(keys[10], (1, vocab_size), hidden_size)
    # mean / logvar / latent->hidden linears
    p['h_mean_wt'] = _uniform(keys[11], (HC, latent_size), HC)
    p['h_mean_b'] = _uniform(keys[12], (1, latent_size), HC)
    p['h_logvar_wt'] = _uniform(keys[13], (HC, latent_size), HC)
    p['h_logvar_b'] = _uniform(keys[14], (1, latent_size), HC)
    p['c_mean_wt'] = _uniform(keys[15], (HC, latent_size), HC)
    p['c_mean_b'] = _uniform(keys[16], (1, latent_size), HC)
    p['c_logvar_wt'] = _uniform(keys[17], (HC, latent_size), HC)
    p['c_logvar_b'] = _uniform(keys[18], (1, latent_size), HC)
    LC = latent_size + cond_emb_size
    p['h_l2h_wt'] = _uniform(keys[19], (LC, hidden_size), LC)
    p['h_l2h_b'] = _uniform(keys[20], (1, hidden_size), LC)
    p['c_l2h_wt'] = _uniform(keys[21], (LC, hidden_size), LC)
    p['c_l2h_b'] = _uniform(keys[22], (1, hidden_size), LC)
    return p


def pack_params(p, vocab_size, latent_size, hidden_size, cond_emb_size):
    """One-time weight packing for the fused kernel (lane-padded layout)."""
    HC = hidden_size + cond_emb_size
    H = hidden_size
    LAT = latent_size
    V = vocab_size
    COND = p['cond_emb'].shape[0]

    def fuse_gates(wx, wh, b, gate_dim):
        in_dim = wx.shape[1]
        wx_p = jnp.zeros((in_dim, 4 * GP), jnp.float32)
        wh_p = jnp.zeros((GP, 4 * GP), jnp.float32)
        b_p = jnp.zeros((1, 4 * GP), jnp.float32)
        for k in range(4):
            wx_p = wx_p.at[:, k * GP:k * GP + gate_dim].set(wx[k])
            wh_p = wh_p.at[:gate_dim, k * GP:k * GP + gate_dim].set(wh[k])
            b_p = b_p.at[:, k * GP:k * GP + gate_dim].set(b[k])
        return wx_p, wh_p, b_p

    enc_wx_p, enc_wh_p, enc_b_p = fuse_gates(p['enc_wx'], p['enc_wh'], p['enc_b'], HC)
    dec_wx_p, dec_wh_p, dec_b_p = fuse_gates(p['dec_wx'], p['dec_wh'], p['dec_b'], H)

    k = {}
    # Fold embedding lookup into the input-side gate contribution table
    # (one row per token id).  Decoder applies ReLU to the embedding -> fold it.
    k['enc_x_table'] = p['enc_emb'] @ enc_wx_p + enc_b_p                     # [V, 4*GP]
    k['dec_x_table'] = jnp.maximum(p['dec_emb'], 0.0) @ dec_wx_p + dec_b_p   # [V, 4*GP]
    k['enc_wh_p'] = enc_wh_p
    k['dec_wh_p'] = dec_wh_p
    k['cond_emb'] = p['cond_emb']
    # encoder initial h0 = c0 = [zeros(H) | cond_emb(tense) | zeros(pad)]
    k['enc_init'] = (jnp.zeros((COND, GP), jnp.float32)
                     .at[:, H:H + cond_emb_size].set(p['cond_emb']))
    # decoder output projection, rows padded H -> GP
    k['out_w_p'] = jnp.zeros((GP, V), jnp.float32).at[:H, :].set(p['out_wt'])
    k['out_b'] = p['out_b']
    # stacked mean/logvar projection [h_mean | h_logvar | c_mean | c_logvar]
    proj_w = jnp.concatenate([p['h_mean_wt'], p['h_logvar_wt'],
                              p['c_mean_wt'], p['c_logvar_wt']], axis=1)     # [HC, 4*LAT]
    k['proj_w_p'] = jnp.zeros((GP, 4 * LAT), jnp.float32).at[:HC, :].set(proj_w)
    k['proj_b'] = jnp.concatenate([p['h_mean_b'], p['h_logvar_b'],
                                   p['c_mean_b'], p['c_logvar_b']], axis=1)  # [1, 4*LAT]
    # latent->hidden linears, output columns padded H -> GP
    LC = LAT + cond_emb_size
    k['h_l2h_w_p'] = jnp.zeros((LC, GP), jnp.float32).at[:, :H].set(p['h_l2h_wt'])
    k['h_l2h_b_p'] = jnp.zeros((1, GP), jnp.float32).at[:, :H].set(p['h_l2h_b'])
    k['c_l2h_w_p'] = jnp.zeros((LC, GP), jnp.float32).at[:, :H].set(p['c_l2h_wt'])
    k['c_l2h_b_p'] = jnp.zeros((1, GP), jnp.float32).at[:, :H].set(p['c_l2h_b'])
    return k


# ------------------------------------------------------------------ forward --
def cvae_forward(packed, input_vocab, input_tense, target_vocab, target_tense,
                 latent_size, eps_key, SOS=0):
    tgt = target_vocab[:-1].astype(jnp.int32)          # teacher-forcing targets
    L_dec = tgt.shape[0]
    dec_in = jnp.concatenate([jnp.array([SOS], jnp.int32), tgt[:-1]])
    enc_tok = input_vocab.astype(jnp.int32)[:, None]
    tenses = jnp.array([input_tense, target_tense], jnp.int32)
    eps = jax.random.normal(eps_key, (2, latent_size), jnp.float32)

    topi, losses = pl.pallas_call(
        cvae_kernel,
        out_shape=(jax.ShapeDtypeStruct((L_dec, 1), jnp.int32),
                   jax.ShapeDtypeStruct((3,), jnp.float32)),
        in_specs=[sspec] + [vspec] * 18,
        out_specs=(vspec, sspec),
        scratch_shapes=[pltpu.VMEM((L_dec, GP), jnp.float32)],
    )(tenses, enc_tok, dec_in[:, None], tgt[:, None], eps,
      packed['cond_emb'], packed['enc_init'],
      packed['enc_x_table'], packed['enc_wh_p'],
      packed['dec_x_table'], packed['dec_wh_p'],
      packed['out_w_p'], packed['out_b'],
      packed['proj_w_p'], packed['proj_b'],
      packed['h_l2h_w_p'], packed['h_l2h_b_p'],
      packed['c_l2h_w_p'], packed['c_l2h_b_p'])
    return topi[:, 0], losses[0], (losses[1], losses[2])


# ------------------------------------------------- pure-JAX reference check --
def cvae_reference(params, input_vocab, input_tense, target_vocab, target_tense,
                   hidden_size, latent_size, eps_key, SOS=0):
    def lstm_step(x, h, c, wx, wh, b):
        i = jax.nn.sigmoid(x @ wx[0] + h @ wh[0] + b[0])
        f = jax.nn.sigmoid(x @ wx[1] + h @ wh[1] + b[1])
        g = jnp.tanh(x @ wx[2] + h @ wh[2] + b[2])
        o = jax.nn.sigmoid(x @ wx[3] + h @ wh[3] + b[3])
        c = f * c + i * g
        return o * jnp.tanh(c), c

    cond_in = params['cond_emb'][input_tense][None, :]
    h = jnp.concatenate([jnp.zeros((1, hidden_size), jnp.float32), cond_in], axis=1)
    c = h
    for t in range(int(input_vocab.shape[0])):
        x = params['enc_emb'][input_vocab[t]][None, :]
        h, c = lstm_step(x, h, c, params['enc_wx'], params['enc_wh'], params['enc_b'])

    mean_h = h @ params['h_mean_wt'] + params['h_mean_b']
    logvar_h = h @ params['h_logvar_wt'] + params['h_logvar_b']
    mean_c = c @ params['c_mean_wt'] + params['c_mean_b']
    logvar_c = c @ params['c_logvar_wt'] + params['c_logvar_b']

    eps = jax.random.normal(eps_key, (2, latent_size), jnp.float32)
    h_lat = mean_h + eps[0:1] * jnp.exp(0.5 * logvar_h)
    c_lat = mean_c + eps[1:2] * jnp.exp(0.5 * logvar_c)

    cond_t = params['cond_emb'][target_tense][None, :]
    h = jnp.concatenate([h_lat, cond_t], axis=1) @ params['h_l2h_wt'] + params['h_l2h_b']
    c = jnp.concatenate([c_lat, cond_t], axis=1) @ params['c_l2h_wt'] + params['c_l2h_b']

    tgt = target_vocab[:-1].astype(jnp.int32)
    L = int(tgt.shape[0])
    dec_in = jnp.concatenate([jnp.array([SOS], jnp.int32), tgt[:-1]])
    ce = jnp.float32(0.0)
    topis = []
    for t in range(L):
        x = jnp.maximum(params['dec_emb'][dec_in[t]][None, :], 0.0)
        h, c = lstm_step(x, h, c, params['dec_wx'], params['dec_wh'], params['dec_b'])
        logits = h @ params['out_wt'] + params['out_b']
        topis.append(jnp.argmax(logits[0]).astype(jnp.int32))
        ce = ce + (jax.nn.logsumexp(logits[0]) - logits[0, tgt[t]])
    ce = ce / jnp.float32(L)
    h_kl = -0.5 * jnp.sum(1.0 + logvar_h - mean_h ** 2 - jnp.exp(logvar_h))
    c_kl = -0.5 * jnp.sum(1.0 + logvar_c - mean_c ** 2 - jnp.exp(logvar_c))
    return jnp.stack(topis), ce, (h_kl, c_kl)


# --------------------------------------------------------------------- main --
if __name__ == "__main__":
    vocab_size = 32
    latent_size = 16
    hidden_size = 32
    condition_size = 4
    cond_emb_size = 8
    in_len = 8
    tgt_len = 9        # target_vocab[:-1] -> 8 teacher-forcing decode steps

    root = jax.random.PRNGKey(0)
    k_params, k_in, k_tgt, k_eps = jax.random.split(root, 4)

    params = init_params(k_params, vocab_size, latent_size, hidden_size,
                         condition_size, cond_emb_size)
    packed = pack_params(params, vocab_size, latent_size, hidden_size,
                         cond_emb_size)

    input_vocab = jax.random.randint(k_in, (in_len,), 2, vocab_size, dtype=jnp.int32)
    target_vocab = jax.random.randint(k_tgt, (tgt_len,), 2, vocab_size, dtype=jnp.int32)
    input_tense = 1
    target_tense = 2

    topi, ce_loss, (h_kl, c_kl) = cvae_forward(
        packed, input_vocab, input_tense, target_vocab, target_tense,
        latent_size, k_eps, SOS=0)
    jax.block_until_ready((topi, ce_loss, h_kl, c_kl))

    # Correctness check against a pure-JAX reference (same params, same eps).
    topi_r, ce_r, (h_kl_r, c_kl_r) = cvae_reference(
        params, input_vocab, input_tense, target_vocab, target_tense,
        hidden_size, latent_size, k_eps, SOS=0)
    np.testing.assert_array_equal(np.asarray(topi), np.asarray(topi_r))
    np.testing.assert_allclose(float(ce_loss), float(ce_r), rtol=2e-3, atol=2e-3)
    np.testing.assert_allclose(float(h_kl), float(h_kl_r), rtol=2e-3, atol=2e-3)
    np.testing.assert_allclose(float(c_kl), float(c_kl_r), rtol=2e-3, atol=2e-3)

    print("KERNEL_OK")
</pallas_src>

<mosaic_0001>
module attributes {stable_mosaic.version = 11 : i64} {
  func.func @cvae_kernel(%arg0: memref<2xi32, #tpu.memory_space<smem>>, %arg1: memref<8x1xi32, #tpu.memory_space<vmem>>, %arg2: memref<8x1xi32, #tpu.memory_space<vmem>>, %arg3: memref<8x1xi32, #tpu.memory_space<vmem>>, %arg4: memref<2x16xf32, #tpu.memory_space<vmem>>, %arg5: memref<4x8xf32, #tpu.memory_space<vmem>>, %arg6: memref<4x128xf32, #tpu.memory_space<vmem>>, %arg7: memref<32x512xf32, #tpu.memory_space<vmem>>, %arg8: memref<128x512xf32, #tpu.memory_space<vmem>>, %arg9: memref<32x512xf32, #tpu.memory_space<vmem>>, %arg10: memref<128x512xf32, #tpu.memory_space<vmem>>, %arg11: memref<128x32xf32, #tpu.memory_space<vmem>>, %arg12: memref<1x32xf32, #tpu.memory_space<vmem>>, %arg13: memref<128x64xf32, #tpu.memory_space<vmem>>, %arg14: memref<1x64xf32, #tpu.memory_space<vmem>>, %arg15: memref<24x128xf32, #tpu.memory_space<vmem>>, %arg16: memref<1x128xf32, #tpu.memory_space<vmem>>, %arg17: memref<24x128xf32, #tpu.memory_space<vmem>>, %arg18: memref<1x128xf32, #tpu.memory_space<vmem>>, %arg19: memref<8x1xi32, #tpu.memory_space<vmem>>, %arg20: memref<3xf32, #tpu.memory_space<smem>>, %arg21: memref<8x128xf32, #tpu.memory_space<vmem>>) attributes {dimension_semantics = [], scalar_prefetch = 0 : i64, scratch_operands = 1 : i64, tpu.core_type = #tpu.core_type<tc>} {
    %0 = tpu.iota {dimensions = array<i32: 1>} : vector<8x32xi32>
    %c0 = arith.constant 0 : index
    %c0_0 = arith.constant 0 : index
    %1 = vector.load %arg1[%c0, %c0_0] : memref<8x1xi32, #tpu.memory_space<vmem>>, vector<8x1xi32>
    %2 = vector.broadcast %1 : vector<8x1xi32> to vector<8x32xi32>
    %3 = arith.cmpi eq, %0, %2 : vector<8x32xi32>
    %4 = arith.extui %3 : vector<8x32xi1> to vector<8x32xi32>
    %5 = arith.sitofp %4 : vector<8x32xi32> to vector<8x32xf32>
    %c0_1 = arith.constant 0 : index
    %c0_2 = arith.constant 0 : index
    %6 = vector.load %arg7[%c0_1, %c0_2] : memref<32x512xf32, #tpu.memory_space<vmem>>, vector<32x512xf32>
    %cst = arith.constant dense<0.000000e+00> : vector<8x512xf32>
    %7 = tpu.matmul %5, %6, %cst {dimension_numbers = #tpu.dot_dimension_numbers<[1], [0], [0], [1], [0, 0, 1, 1], [], []>} : vector<8x32xf32>, vector<32x512xf32>, vector<8x512xf32> -> vector<8x512xf32>
    %8 = tpu.iota {dimensions = array<i32: 1>} : vector<8x32xi32>
    %c0_3 = arith.constant 0 : index
    %c0_4 = arith.constant 0 : index
    %9 = vector.load %arg2[%c0_3, %c0_4] : memref<8x1xi32, #tpu.memory_space<vmem>>, vector<8x1xi32>
    %10 = vector.broadcast %9 : vector<8x1xi32> to vector<8x32xi32>
    %11 = arith.cmpi eq, %8, %10 : vector<8x32xi32>
    %12 = arith.extui %11 : vector<8x32xi1> to vector<8x32xi32>
    %13 = arith.sitofp %12 : vector<8x32xi32> to vector<8x32xf32>
    %c0_5 = arith.constant 0 : index
    %c0_6 = arith.constant 0 : index
    %14 = vector.load %arg9[%c0_5, %c0_6] : memref<32x512xf32, #tpu.memory_space<vmem>>, vector<32x512xf32>
    %cst_7 = arith.constant dense<0.000000e+00> : vector<8x512xf32>
    %15 = tpu.matmul %13, %14, %cst_7 {dimension_numbers = #tpu.dot_dimension_numbers<[1], [0], [0], [1], [0, 0, 1, 1], [], []>} : vector<8x32xf32>, vector<32x512xf32>, vector<8x512xf32> -> vector<8x512xf32>
    %c0_8 = arith.constant 0 : index
    %16 = memref.load %arg0[%c0_8] : memref<2xi32, #tpu.memory_space<smem>>
    %17 = arith.index_cast %16 : i32 to index
    %c0_9 = arith.constant 0 : index
    %18 = vector.load %arg6[%17, %c0_9] : memref<4x128xf32, #tpu.memory_space<vmem>>, vector<1x128xf32>
    %19 = vector.extract_strided_slice %7 {offsets = [0, 0], sizes = [1, 512], strides = [1, 1]} : vector<8x512xf32> to vector<1x512xf32>
    %c0_10 = arith.constant 0 : index
    %c0_11 = arith.constant 0 : index
    %20 = vector.load %arg8[%c0_10, %c0_11] : memref<128x512xf32, #tpu.memory_space<vmem>>, vector<128x512xf32>
    %cst_12 = arith.constant dense<0.000000e+00> : vector<1x512xf32>
    %21 = tpu.matmul %18, %20, %cst_12 {dimension_numbers = #tpu.dot_dimension_numbers<[1], [0], [0], [1], [0, 0, 1, 1], [], []>} : vector<1x128xf32>, vector<128x512xf32>, vector<1x512xf32> -> vector<1x512xf32>
    %22 = arith.addf %19, %21 : vector<1x512xf32>
    %23 = vector.extract_strided_slice %22 {offsets = [0, 0], sizes = [1, 128], strides = [1, 1]} : vector<1x512xf32> to vector<1x128xf32>
    %24 = arith.negf %23 : vector<1x128xf32>
    %25 = math.exp %24 : vector<1x128xf32>
    %cst_13 = arith.constant 1.000000e+00 : f32
    %26 = vector.broadcast %cst_13 : f32 to vector<1x128xf32>
    %27 = arith.addf %26, %25 : vector<1x128xf32>
    %28 = arith.divf %26, %27 : vector<1x128xf32>
    %29 = vector.extract_strided_slice %22 {offsets = [0, 128], sizes = [1, 128], strides = [1, 1]} : vector<1x512xf32> to vector<1x128xf32>
    %30 = arith.negf %29 : vector<1x128xf32>
    %31 = math.exp %30 : vector<1x128xf32>
    %cst_14 = arith.constant 1.000000e+00 : f32
    %32 = vector.broadcast %cst_14 : f32 to vector<1x128xf32>
    %33 = arith.addf %32, %31 : vector<1x128xf32>
    %34 = arith.divf %32, %33 : vector<1x128xf32>
    %35 = vector.extract_strided_slice %22 {offsets = [0, 256], sizes = [1, 128], strides = [1, 1]} : vector<1x512xf32> to vector<1x128xf32>
    %36 = math.tanh %35 : vector<1x128xf32>
    %37 = vector.extract_strided_slice %22 {offsets = [0, 384], sizes = [1, 128], strides = [1, 1]} : vector<1x512xf32> to vector<1x128xf32>
    %38 = arith.negf %37 : vector<1x128xf32>
    %39 = math.exp %38 : vector<1x128xf32>
    %cst_15 = arith.constant 1.000000e+00 : f32
    %40 = vector.broadcast %cst_15 : f32 to vector<1x128xf32>
    %41 = arith.addf %40, %39 : vector<1x128xf32>
    %42 = arith.divf %40, %41 : vector<1x128xf32>
    %43 = arith.mulf %34, %18 : vector<1x128xf32>
    %44 = arith.mulf %28, %36 : vector<1x128xf32>
    %45 = arith.addf %43, %44 : vector<1x128xf32>
    %46 = math.tanh %45 : vector<1x128xf32>
    %47 = arith.mulf %42, %46 : vector<1x128xf32>
    %48 = vector.extract_strided_slice %7 {offsets = [1, 0], sizes = [1, 512], strides = [1, 1]} : vector<8x512xf32> to vector<1x512xf32>
    %c0_16 = arith.constant 0 : index
    %c0_17 = arith.constant 0 : index
    %49 = vector.load %arg8[%c0_16, %c0_17] : memref<128x512xf32, #tpu.memory_space<vmem>>, vector<128x512xf32>
    %cst_18 = arith.constant dense<0.000000e+00> : vector<1x512xf32>
    %50 = tpu.matmul %47, %49, %cst_18 {dimension_numbers = #tpu.dot_dimension_numbers<[1], [0], [0], [1], [0, 0, 1, 1], [], []>} : vector<1x128xf32>, vector<128x512xf32>, vector<1x512xf32> -> vector<1x512xf32>
    %51 = arith.addf %48, %50 : vector<1x512xf32>
    %52 = vector.extract_strided_slice %51 {offsets = [0, 0], sizes = [1, 128], strides = [1, 1]} : vector<1x512xf32> to vector<1x128xf32>
    %53 = arith.negf %52 : vector<1x128xf32>
    %54 = math.exp %53 : vector<1x128xf32>
    %cst_19 = arith.constant 1.000000e+00 : f32
    %55 = vector.broadcast %cst_19 : f32 to vector<1x128xf32>
    %56 = arith.addf %55, %54 : vector<1x128xf32>
    %57 = arith.divf %55, %56 : vector<1x128xf32>
    %58 = vector.extract_strided_slice %51 {offsets = [0, 128], sizes = [1, 128], strides = [1, 1]} : vector<1x512xf32> to vector<1x128xf32>
    %59 = arith.negf %58 : vector<1x128xf32>
    %60 = math.exp %59 : vector<1x128xf32>
    %cst_20 = arith.constant 1.000000e+00 : f32
    %61 = vector.broadcast %cst_20 : f32 to vector<1x128xf32>
    %62 = arith.addf %61, %60 : vector<1x128xf32>
    %63 = arith.divf %61, %62 : vector<1x128xf32>
    %64 = vector.extract_strided_slice %51 {offsets = [0, 256], sizes = [1, 128], strides = [1, 1]} : vector<1x512xf32> to vector<1x128xf32>
    %65 = math.tanh %64 : vector<1x128xf32>
    %66 = vector.extract_strided_slice %51 {offsets = [0, 384], sizes = [1, 128], strides = [1, 1]} : vector<1x512xf32> to vector<1x128xf32>
    %67 = arith.negf %66 : vector<1x128xf32>
    %68 = math.exp %67 : vector<1x128xf32>
    %cst_21 = arith.constant 1.000000e+00 : f32
    %69 = vector.broadcast %cst_21 : f32 to vector<1x128xf32>
    %70 = arith.addf %69, %68 : vector<1x128xf32>
    %71 = arith.divf %69, %70 : vector<1x128xf32>
    %72 = arith.mulf %63, %45 : vector<1x128xf32>
    %73 = arith.mulf %57, %65 : vector<1x128xf32>
    %74 = arith.addf %72, %73 : vector<1x128xf32>
    %75 = math.tanh %74 : vector<1x128xf32>
    %76 = arith.mulf %71, %75 : vector<1x128xf32>
    %77 = vector.extract_strided_slice %7 {offsets = [2, 0], sizes = [1, 512], strides = [1, 1]} : vector<8x512xf32> to vector<1x512xf32>
    %c0_22 = arith.constant 0 : index
    %c0_23 = arith.constant 0 : index
    %78 = vector.load %arg8[%c0_22, %c0_23] : memref<128x512xf32, #tpu.memory_space<vmem>>, vector<128x512xf32>
    %cst_24 = arith.constant dense<0.000000e+00> : vector<1x512xf32>
    %79 = tpu.matmul %76, %78, %cst_24 {dimension_numbers = #tpu.dot_dimension_numbers<[1], [0], [0], [1], [0, 0, 1, 1], [], []>} : vector<1x128xf32>, vector<128x512xf32>, vector<1x512xf32> -> vector<1x512xf32>
    %80 = arith.addf %77, %79 : vector<1x512xf32>
    %81 = vector.extract_strided_slice %80 {offsets = [0, 0], sizes = [1, 128], strides = [1, 1]} : vector<1x512xf32> to vector<1x128xf32>
    %82 = arith.negf %81 : vector<1x128xf32>
    %83 = math.exp %82 : vector<1x128xf32>
    %cst_25 = arith.constant 1.000000e+00 : f32
    %84 = vector.broadcast %cst_25 : f32 to vector<1x128xf32>
    %85 = arith.addf %84, %83 : vector<1x128xf32>
    %86 = arith.divf %84, %85 : vector<1x128xf32>
    %87 = vector.extract_strided_slice %80 {offsets = [0, 128], sizes = [1, 128], strides = [1, 1]} : vector<1x512xf32> to vector<1x128xf32>
    %88 = arith.negf %87 : vector<1x128xf32>
    %89 = math.exp %88 : vector<1x128xf32>
    %cst_26 = arith.constant 1.000000e+00 : f32
    %90 = vector.broadcast %cst_26 : f32 to vector<1x128xf32>
    %91 = arith.addf %90, %89 : vector<1x128xf32>
    %92 = arith.divf %90, %91 : vector<1x128xf32>
    %93 = vector.extract_strided_slice %80 {offsets = [0, 256], sizes = [1, 128], strides = [1, 1]} : vector<1x512xf32> to vector<1x128xf32>
    %94 = math.tanh %93 : vector<1x128xf32>
    %95 = vector.extract_strided_slice %80 {offsets = [0, 384], sizes = [1, 128], strides = [1, 1]} : vector<1x512xf32> to vector<1x128xf32>
    %96 = arith.negf %95 : vector<1x128xf32>
    %97 = math.exp %96 : vector<1x128xf32>
    %cst_27 = arith.constant 1.000000e+00 : f32
    %98 = vector.broadcast %cst_27 : f32 to vector<1x128xf32>
    %99 = arith.addf %98, %97 : vector<1x128xf32>
    %100 = arith.divf %98, %99 : vector<1x128xf32>
    %101 = arith.mulf %92, %74 : vector<1x128xf32>
    %102 = arith.mulf %86, %94 : vector<1x128xf32>
    %103 = arith.addf %101, %102 : vector<1x128xf32>
    %104 = math.tanh %103 : vector<1x128xf32>
    %105 = arith.mulf %100, %104 : vector<1x128xf32>
    %106 = vector.extract_strided_slice %7 {offsets = [3, 0], sizes = [1, 512], strides = [1, 1]} : vector<8x512xf32> to vector<1x512xf32>
    %c0_28 = arith.constant 0 : index
    %c0_29 = arith.constant 0 : index
    %107 = vector.load %arg8[%c0_28, %c0_29] : memref<128x512xf32, #tpu.memory_space<vmem>>, vector<128x512xf32>
    %cst_30 = arith.constant dense<0.000000e+00> : vector<1x512xf32>
    %108 = tpu.matmul %105, %107, %cst_30 {dimension_numbers = #tpu.dot_dimension_numbers<[1], [0], [0], [1], [0, 0, 1, 1], [], []>} : vector<1x128xf32>, vector<128x512xf32>, vector<1x512xf32> -> vector<1x512xf32>
    %109 = arith.addf %106, %108 : vector<1x512xf32>
    %110 = vector.extract_strided_slice %109 {offsets = [0, 0], sizes = [1, 128], strides = [1, 1]} : vector<1x512xf32> to vector<1x128xf32>
    %111 = arith.negf %110 : vector<1x128xf32>
    %112 = math.exp %111 : vector<1x128xf32>
    %cst_31 = arith.constant 1.000000e+00 : f32
    %113 = vector.broadcast %cst_31 : f32 to vector<1x128xf32>
    %114 = arith.addf %113, %112 : vector<1x128xf32>
    %115 = arith.divf %113, %114 : vector<1x128xf32>
    %116 = vector.extract_strided_slice %109 {offsets = [0, 128], sizes = [1, 128], strides = [1, 1]} : vector<1x512xf32> to vector<1x128xf32>
    %117 = arith.negf %116 : vector<1x128xf32>
    %118 = math.exp %117 : vector<1x128xf32>
    %cst_32 = arith.constant 1.000000e+00 : f32
    %119 = vector.broadcast %cst_32 : f32 to vector<1x128xf32>
    %120 = arith.addf %119, %118 : vector<1x128xf32>
    %121 = arith.divf %119, %120 : vector<1x128xf32>
    %122 = vector.extract_strided_slice %109 {offsets = [0, 256], sizes = [1, 128], strides = [1, 1]} : vector<1x512xf32> to vector<1x128xf32>
    %123 = math.tanh %122 : vector<1x128xf32>
    %124 = vector.extract_strided_slice %109 {offsets = [0, 384], sizes = [1, 128], strides = [1, 1]} : vector<1x512xf32> to vector<1x128xf32>
    %125 = arith.negf %124 : vector<1x128xf32>
    %126 = math.exp %125 : vector<1x128xf32>
    %cst_33 = arith.constant 1.000000e+00 : f32
    %127 = vector.broadcast %cst_33 : f32 to vector<1x128xf32>
    %128 = arith.addf %127, %126 : vector<1x128xf32>
    %129 = arith.divf %127, %128 : vector<1x128xf32>
    %130 = arith.mulf %121, %103 : vector<1x128xf32>
    %131 = arith.mulf %115, %123 : vector<1x128xf32>
    %132 = arith.addf %130, %131 : vector<1x128xf32>
    %133 = math.tanh %132 : vector<1x128xf32>
    %134 = arith.mulf %129, %133 : vector<1x128xf32>
    %135 = vector.extract_strided_slice %7 {offsets = [4, 0], sizes = [1, 512], strides = [1, 1]} : vector<8x512xf32> to vector<1x512xf32>
    %c0_34 = arith.constant 0 : index
    %c0_35 = arith.constant 0 : index
    %136 = vector.load %arg8[%c0_34, %c0_35] : memref<128x512xf32, #tpu.memory_space<vmem>>, vector<128x512xf32>
    %cst_36 = arith.constant dense<0.000000e+00> : vector<1x512xf32>
    %137 = tpu.matmul %134, %136, %cst_36 {dimension_numbers = #tpu.dot_dimension_numbers<[1], [0], [0], [1], [0, 0, 1, 1], [], []>} : vector<1x128xf32>, vector<128x512xf32>, vector<1x512xf32> -> vector<1x512xf32>
    %138 = arith.addf %135, %137 : vector<1x512xf32>
    %139 = vector.extract_strided_slice %138 {offsets = [0, 0], sizes = [1, 128], strides = [1, 1]} : vector<1x512xf32> to vector<1x128xf32>
    %140 = arith.negf %139 : vector<1x128xf32>
    %141 = math.exp %140 : vector<1x128xf32>
    %cst_37 = arith.constant 1.000000e+00 : f32
    %142 = vector.broadcast %cst_37 : f32 to vector<1x128xf32>
    %143 = arith.addf %142, %141 : vector<1x128xf32>
    %144 = arith.divf %142, %143 : vector<1x128xf32>
    %145 = vector.extract_strided_slice %138 {offsets = [0, 128], sizes = [1, 128], strides = [1, 1]} : vector<1x512xf32> to vector<1x128xf32>
    %146 = arith.negf %145 : vector<1x128xf32>
    %147 = math.exp %146 : vector<1x128xf32>
    %cst_38 = arith.constant 1.000000e+00 : f32
    %148 = vector.broadcast %cst_38 : f32 to vector<1x128xf32>
    %149 = arith.addf %148, %147 : vector<1x128xf32>
    %150 = arith.divf %148, %149 : vector<1x128xf32>
    %151 = vector.extract_strided_slice %138 {offsets = [0, 256], sizes = [1, 128], strides = [1, 1]} : vector<1x512xf32> to vector<1x128xf32>
    %152 = math.tanh %151 : vector<1x128xf32>
    %153 = vector.extract_strided_slice %138 {offsets = [0, 384], sizes = [1, 128], strides = [1, 1]} : vector<1x512xf32> to vector<1x128xf32>
    %154 = arith.negf %153 : vector<1x128xf32>
    %155 = math.exp %154 : vector<1x128xf32>
    %cst_39 = arith.constant 1.000000e+00 : f32
    %156 = vector.broadcast %cst_39 : f32 to vector<1x128xf32>
    %157 = arith.addf %156, %155 : vector<1x128xf32>
    %158 = arith.divf %156, %157 : vector<1x128xf32>
    %159 = arith.mulf %150, %132 : vector<1x128xf32>
    %160 = arith.mulf %144, %152 : vector<1x128xf32>
    %161 = arith.addf %159, %160 : vector<1x128xf32>
    %162 = math.tanh %161 : vector<1x128xf32>
    %163 = arith.mulf %158, %162 : vector<1x128xf32>
    %164 = vector.extract_strided_slice %7 {offsets = [5, 0], sizes = [1, 512], strides = [1, 1]} : vector<8x512xf32> to vector<1x512xf32>
    %c0_40 = arith.constant 0 : index
    %c0_41 = arith.constant 0 : index
    %165 = vector.load %arg8[%c0_40, %c0_41] : memref<128x512xf32, #tpu.memory_space<vmem>>, vector<128x512xf32>
    %cst_42 = arith.constant dense<0.000000e+00> : vector<1x512xf32>
    %166 = tpu.matmul %163, %165, %cst_42 {dimension_numbers = #tpu.dot_dimension_numbers<[1], [0], [0], [1], [0, 0, 1, 1], [], []>} : vector<1x128xf32>, vector<128x512xf32>, vector<1x512xf32> -> vector<1x512xf32>
    %167 = arith.addf %164, %166 : vector<1x512xf32>
    %168 = vector.extract_strided_slice %167 {offsets = [0, 0], sizes = [1, 128], strides = [1, 1]} : vector<1x512xf32> to vector<1x128xf32>
    %169 = arith.negf %168 : vector<1x128xf32>
    %170 = math.exp %169 : vector<1x128xf32>
    %cst_43 = arith.constant 1.000000e+00 : f32
    %171 = vector.broadcast %cst_43 : f32 to vector<1x128xf32>
    %172 = arith.addf %171, %170 : vector<1x128xf32>
    %173 = arith.divf %171, %172 : vector<1x128xf32>
    %174 = vector.extract_strided_slice %167 {offsets = [0, 128], sizes = [1, 128], strides = [1, 1]} : vector<1x512xf32> to vector<1x128xf32>
    %175 = arith.negf %174 : vector<1x128xf32>
    %176 = math.exp %175 : vector<1x128xf32>
    %cst_44 = arith.constant 1.000000e+00 : f32
    %177 = vector.broadcast %cst_44 : f32 to vector<1x128xf32>
    %178 = arith.addf %177, %176 : vector<1x128xf32>
    %179 = arith.divf %177, %178 : vector<1x128xf32>
    %180 = vector.extract_strided_slice %167 {offsets = [0, 256], sizes = [1, 128], strides = [1, 1]} : vector<1x512xf32> to vector<1x128xf32>
    %181 = math.tanh %180 : vector<1x128xf32>
    %182 = vector.extract_strided_slice %167 {offsets = [0, 384], sizes = [1, 128], strides = [1, 1]} : vector<1x512xf32> to vector<1x128xf32>
    %183 = arith.negf %182 : vector<1x128xf32>
    %184 = math.exp %183 : vector<1x128xf32>
    %cst_45 = arith.constant 1.000000e+00 : f32
    %185 = vector.broadcast %cst_45 : f32 to vector<1x128xf32>
    %186 = arith.addf %185, %184 : vector<1x128xf32>
    %187 = arith.divf %185, %186 : vector<1x128xf32>
    %188 = arith.mulf %179, %161 : vector<1x128xf32>
    %189 = arith.mulf %173, %181 : vector<1x128xf32>
    %190 = arith.addf %188, %189 : vector<1x128xf32>
    %191 = math.tanh %190 : vector<1x128xf32>
    %192 = arith.mulf %187, %191 : vector<1x128xf32>
    %193 = vector.extract_strided_slice %7 {offsets = [6, 0], sizes = [1, 512], strides = [1, 1]} : vector<8x512xf32> to vector<1x512xf32>
    %c0_46 = arith.constant 0 : index
    %c0_47 = arith.constant 0 : index
    %194 = vector.load %arg8[%c0_46, %c0_47] : memref<128x512xf32, #tpu.memory_space<vmem>>, vector<128x512xf32>
    %cst_48 = arith.constant dense<0.000000e+00> : vector<1x512xf32>
    %195 = tpu.matmul %192, %194, %cst_48 {dimension_numbers = #tpu.dot_dimension_numbers<[1], [0], [0], [1], [0, 0, 1, 1], [], []>} : vector<1x128xf32>, vector<128x512xf32>, vector<1x512xf32> -> vector<1x512xf32>
    %196 = arith.addf %193, %195 : vector<1x512xf32>
    %197 = vector.extract_strided_slice %196 {offsets = [0, 0], sizes = [1, 128], strides = [1, 1]} : vector<1x512xf32> to vector<1x128xf32>
    %198 = arith.negf %197 : vector<1x128xf32>
    %199 = math.exp %198 : vector<1x128xf32>
    %cst_49 = arith.constant 1.000000e+00 : f32
    %200 = vector.broadcast %cst_49 : f32 to vector<1x128xf32>
    %201 = arith.addf %200, %199 : vector<1x128xf32>
    %202 = arith.divf %200, %201 : vector<1x128xf32>
    %203 = vector.extract_strided_slice %196 {offsets = [0, 128], sizes = [1, 128], strides = [1, 1]} : vector<1x512xf32> to vector<1x128xf32>
    %204 = arith.negf %203 : vector<1x128xf32>
    %205 = math.exp %204 : vector<1x128xf32>
    %cst_50 = arith.constant 1.000000e+00 : f32
    %206 = vector.broadcast %cst_50 : f32 to vector<1x128xf32>
    %207 = arith.addf %206, %205 : vector<1x128xf32>
    %208 = arith.divf %206, %207 : vector<1x128xf32>
    %209 = vector.extract_strided_slice %196 {offsets = [0, 256], sizes = [1, 128], strides = [1, 1]} : vector<1x512xf32> to vector<1x128xf32>
    %210 = math.tanh %209 : vector<1x128xf32>
    %211 = vector.extract_strided_slice %196 {offsets = [0, 384], sizes = [1, 128], strides = [1, 1]} : vector<1x512xf32> to vector<1x128xf32>
    %212 = arith.negf %211 : vector<1x128xf32>
    %213 = math.exp %212 : vector<1x128xf32>
    %cst_51 = arith.constant 1.000000e+00 : f32
    %214 = vector.broadcast %cst_51 : f32 to vector<1x128xf32>
    %215 = arith.addf %214, %213 : vector<1x128xf32>
    %216 = arith.divf %214, %215 : vector<1x128xf32>
    %217 = arith.mulf %208, %190 : vector<1x128xf32>
    %218 = arith.mulf %202, %210 : vector<1x128xf32>
    %219 = arith.addf %217, %218 : vector<1x128xf32>
    %220 = math.tanh %219 : vector<1x128xf32>
    %221 = arith.mulf %216, %220 : vector<1x128xf32>
    %222 = vector.extract_strided_slice %7 {offsets = [7, 0], sizes = [1, 512], strides = [1, 1]} : vector<8x512xf32> to vector<1x512xf32>
    %c0_52 = arith.constant 0 : index
    %c0_53 = arith.constant 0 : index
    %223 = vector.load %arg8[%c0_52, %c0_53] : memref<128x512xf32, #tpu.memory_space<vmem>>, vector<128x512xf32>
    %cst_54 = arith.constant dense<0.000000e+00> : vector<1x512xf32>
    %224 = tpu.matmul %221, %223, %cst_54 {dimension_numbers = #tpu.dot_dimension_numbers<[1], [0], [0], [1], [0, 0, 1, 1], [], []>} : vector<1x128xf32>, vector<128x512xf32>, vector<1x512xf32> -> vector<1x512xf32>
    %225 = arith.addf %222, %224 : vector<1x512xf32>
    %226 = vector.extract_strided_slice %225 {offsets = [0, 0], sizes = [1, 128], strides = [1, 1]} : vector<1x512xf32> to vector<1x128xf32>
    %227 = arith.negf %226 : vector<1x128xf32>
    %228 = math.exp %227 : vector<1x128xf32>
    %cst_55 = arith.constant 1.000000e+00 : f32
    %229 = vector.broadcast %cst_55 : f32 to vector<1x128xf32>
    %230 = arith.addf %229, %228 : vector<1x128xf32>
    %231 = arith.divf %229, %230 : vector<1x128xf32>
    %232 = vector.extract_strided_slice %225 {offsets = [0, 128], sizes = [1, 128], strides = [1, 1]} : vector<1x512xf32> to vector<1x128xf32>
    %233 = arith.negf %232 : vector<1x128xf32>
    %234 = math.exp %233 : vector<1x128xf32>
    %cst_56 = arith.constant 1.000000e+00 : f32
    %235 = vector.broadcast %cst_56 : f32 to vector<1x128xf32>
    %236 = arith.addf %235, %234 : vector<1x128xf32>
    %237 = arith.divf %235, %236 : vector<1x128xf32>
    %238 = vector.extract_strided_slice %225 {offsets = [0, 256], sizes = [1, 128], strides = [1, 1]} : vector<1x512xf32> to vector<1x128xf32>
    %239 = math.tanh %238 : vector<1x128xf32>
    %240 = vector.extract_strided_slice %225 {offsets = [0, 384], sizes = [1, 128], strides = [1, 1]} : vector<1x512xf32> to vector<1x128xf32>
    %241 = arith.negf %240 : vector<1x128xf32>
    %242 = math.exp %241 : vector<1x128xf32>
    %cst_57 = arith.constant 1.000000e+00 : f32
    %243 = vector.broadcast %cst_57 : f32 to vector<1x128xf32>
    %244 = arith.addf %243, %242 : vector<1x128xf32>
    %245 = arith.divf %243, %244 : vector<1x128xf32>
    %246 = arith.mulf %237, %219 : vector<1x128xf32>
    %247 = arith.mulf %231, %239 : vector<1x128xf32>
    %248 = arith.addf %246, %247 : vector<1x128xf32>
    %249 = math.tanh %248 : vector<1x128xf32>
    %250 = arith.mulf %245, %249 : vector<1x128xf32>
    %c0_58 = arith.constant 0 : index
    %c0_59 = arith.constant 0 : index
    %251 = vector.load %arg13[%c0_58, %c0_59] : memref<128x64xf32, #tpu.memory_space<vmem>>, vector<128x64xf32>
    %cst_60 = arith.constant dense<0.000000e+00> : vector<1x64xf32>
    %252 = tpu.matmul %250, %251, %cst_60 {dimension_numbers = #tpu.dot_dimension_numbers<[1], [0], [0], [1], [0, 0, 1, 1], [], []>} : vector<1x128xf32>, vector<128x64xf32>, vector<1x64xf32> -> vector<1x64xf32>
    %c0_61 = arith.constant 0 : index
    %c0_62 = arith.constant 0 : index
    %253 = vector.load %arg14[%c0_61, %c0_62] : memref<1x64xf32, #tpu.memory_space<vmem>>, vector<1x64xf32>
    %254 = arith.addf %252, %253 : vector<1x64xf32>
    %c0_63 = arith.constant 0 : index
    %c0_64 = arith.constant 0 : index
    %255 = vector.load %arg13[%c0_63, %c0_64] : memref<128x64xf32, #tpu.memory_space<vmem>>, vector<128x64xf32>
    %cst_65 = arith.constant dense<0.000000e+00> : vector<1x64xf32>
    %256 = tpu.matmul %248, %255, %cst_65 {dimension_numbers = #tpu.dot_dimension_numbers<[1], [0], [0], [1], [0, 0, 1, 1], [], []>} : vector<1x128xf32>, vector<128x64xf32>, vector<1x64xf32> -> vector<1x64xf32>
    %c0_66 = arith.constant 0 : index
    %c0_67 = arith.constant 0 : index
    %257 = vector.load %arg14[%c0_66, %c0_67] : memref<1x64xf32, #tpu.memory_space<vmem>>, vector<1x64xf32>
    %258 = arith.addf %256, %257 : vector<1x64xf32>
    %259 = vector.extract_strided_slice %254 {offsets = [0, 0], sizes = [1, 16], strides = [1, 1]} : vector<1x64xf32> to vector<1x16xf32>
    %260 = vector.extract_strided_slice %254 {offsets = [0, 16], sizes = [1, 16], strides = [1, 1]} : vector<1x64xf32> to vector<1x16xf32>
    %261 = vector.extract_strided_slice %258 {offsets = [0, 32], sizes = [1, 16], strides = [1, 1]} : vector<1x64xf32> to vector<1x16xf32>
    %262 = vector.extract_strided_slice %258 {offsets = [0, 48], sizes = [1, 16], strides = [1, 1]} : vector<1x64xf32> to vector<1x16xf32>
    %cst_68 = arith.constant 1.000000e+00 : f32
    %263 = vector.broadcast %cst_68 : f32 to vector<1x16xf32>
    %264 = arith.addf %263, %260 : vector<1x16xf32>
    %265 = arith.mulf %259, %259 : vector<1x16xf32>
    %266 = arith.subf %264, %265 : vector<1x16xf32>
    %267 = math.exp %260 : vector<1x16xf32>
    %268 = arith.subf %266, %267 : vector<1x16xf32>
    %269 = vector.shape_cast %268 : vector<1x16xf32> to vector<1x1x16xf32>
    %cst_69 = arith.constant dense<0.000000e+00> : vector<1xf32>
    %270 = vector.multi_reduction <add>, %269, %cst_69 [1, 2] : vector<1x1x16xf32> to vector<1xf32>
    %271 = vector.shape_cast %270 : vector<1xf32> to vector<1x1x1xf32>
    %272 = vector.extract %271[0, 0, 0] : f32 from vector<1x1x1xf32>
    %cst_70 = arith.constant -5.000000e-01 : f32
    %273 = arith.mulf %cst_70, %272 : f32
    %c1 = arith.constant 1 : index
    %274 = memref.load %arg20[%c1] : memref<3xf32, #tpu.memory_space<smem>>
    memref.store %273, %arg20[%c1] : memref<3xf32, #tpu.memory_space<smem>>
    %cst_71 = arith.constant 1.000000e+00 : f32
    %275 = vector.broadcast %cst_71 : f32 to vector<1x16xf32>
    %276 = arith.addf %275, %262 : vector<1x16xf32>
    %277 = arith.mulf %261, %261 : vector<1x16xf32>
    %278 = arith.subf %276, %277 : vector<1x16xf32>
    %279 = math.exp %262 : vector<1x16xf32>
    %280 = arith.subf %278, %279 : vector<1x16xf32>
    %281 = vector.shape_cast %280 : vector<1x16xf32> to vector<1x1x16xf32>
    %cst_72 = arith.constant dense<0.000000e+00> : vector<1xf32>
    %282 = vector.multi_reduction <add>, %281, %cst_72 [1, 2] : vector<1x1x16xf32> to vector<1xf32>
    %283 = vector.shape_cast %282 : vector<1xf32> to vector<1x1x1xf32>
    %284 = vector.extract %283[0, 0, 0] : f32 from vector<1x1x1xf32>
    %cst_73 = arith.constant -5.000000e-01 : f32
    %285 = arith.mulf %cst_73, %284 : f32
    %c2 = arith.constant 2 : index
    %286 = memref.load %arg20[%c2] : memref<3xf32, #tpu.memory_space<smem>>
    memref.store %285, %arg20[%c2] : memref<3xf32, #tpu.memory_space<smem>>
    %c0_74 = arith.constant 0 : index
    %c0_75 = arith.constant 0 : index
    %287 = vector.load %arg4[%c0_74, %c0_75] : memref<2x16xf32, #tpu.memory_space<vmem>>, vector<1x16xf32>
    %cst_76 = arith.constant 5.000000e-01 : f32
    %288 = vector.broadcast %cst_76 : f32 to vector<1x16xf32>
    %289 = arith.mulf %288, %260 : vector<1x16xf32>
    %290 = math.exp %289 : vector<1x16xf32>
    %291 = arith.mulf %287, %290 : vector<1x16xf32>
    %292 = arith.addf %259, %291 : vector<1x16xf32>
    %c1_77 = arith.constant 1 : index
    %c0_78 = arith.constant 0 : index
    %293 = vector.load %arg4[%c1_77, %c0_78] : memref<2x16xf32, #tpu.memory_space<vmem>>, vector<1x16xf32>
    %cst_79 = arith.constant 5.000000e-01 : f32
    %294 = vector.broadcast %cst_79 : f32 to vector<1x16xf32>
    %295 = arith.mulf %294, %262 : vector<1x16xf32>
    %296 = math.exp %295 : vector<1x16xf32>
    %297 = arith.mulf %293, %296 : vector<1x16xf32>
    %298 = arith.addf %261, %297 : vector<1x16xf32>
    %c1_80 = arith.constant 1 : index
    %299 = memref.load %arg0[%c1_80] : memref<2xi32, #tpu.memory_space<smem>>
    %300 = arith.index_cast %299 : i32 to index
    %c0_81 = arith.constant 0 : index
    %301 = vector.load %arg5[%300, %c0_81] : memref<4x8xf32, #tpu.memory_space<vmem>>, vector<1x8xf32>
    %c0_82 = arith.constant 0 : index
    %c0_83 = arith.constant 0 : index
    %302 = vector.load %arg15[%c0_82, %c0_83] : memref<24x128xf32, #tpu.memory_space<vmem>>, vector<16x128xf32>
    %cst_84 = arith.constant dense<0.000000e+00> : vector<1x128xf32>
    %303 = tpu.matmul %292, %302, %cst_84 {dimension_numbers = #tpu.dot_dimension_numbers<[1], [0], [0], [1], [0, 0, 1, 1], [], []>} : vector<1x16xf32>, vector<16x128xf32>, vector<1x128xf32> -> vector<1x128xf32>
    %c16 = arith.constant 16 : index
    %c0_85 = arith.constant 0 : index
    %304 = vector.load %arg15[%c16, %c0_85] : memref<24x128xf32, #tpu.memory_space<vmem>>, vector<8x128xf32>
    %cst_86 = arith.constant dense<0.000000e+00> : vector<1x128xf32>
    %305 = tpu.matmul %301, %304, %cst_86 {dimension_numbers = #tpu.dot_dimension_numbers<[1], [0], [0], [1], [0, 0, 1, 1], [], []>} : vector<1x8xf32>, vector<8x128xf32>, vector<1x128xf32> -> vector<1x128xf32>
    %306 = arith.addf %303, %305 : vector<1x128xf32>
    %c0_87 = arith.constant 0 : index
    %c0_88 = arith.constant 0 : index
    %307 = vector.load %arg16[%c0_87, %c0_88] : memref<1x128xf32, #tpu.memory_space<vmem>>, vector<1x128xf32>
    %308 = arith.addf %306, %307 : vector<1x128xf32>
    %c0_89 = arith.constant 0 : index
    %c0_90 = arith.constant 0 : index
    %309 = vector.load %arg17[%c0_89, %c0_90] : memref<24x128xf32, #tpu.memory_space<vmem>>, vector<16x128xf32>
    %cst_91 = arith.constant dense<0.000000e+00> : vector<1x128xf32>
    %310 = tpu.matmul %298, %309, %cst_91 {dimension_numbers = #tpu.dot_dimension_numbers<[1], [0], [0], [1], [0, 0, 1, 1], [], []>} : vector<1x16xf32>, vector<16x128xf32>, vector<1x128xf32> -> vector<1x128xf32>
    %c16_92 = arith.constant 16 : index
    %c0_93 = arith.constant 0 : index
    %311 = vector.load %arg17[%c16_92, %c0_93] : memref<24x128xf32, #tpu.memory_space<vmem>>, vector<8x128xf32>
    %cst_94 = arith.constant dense<0.000000e+00> : vector<1x128xf32>
    %312 = tpu.matmul %301, %311, %cst_94 {dimension_numbers = #tpu.dot_dimension_numbers<[1], [0], [0], [1], [0, 0, 1, 1], [], []>} : vector<1x8xf32>, vector<8x128xf32>, vector<1x128xf32> -> vector<1x128xf32>
    %313 = arith.addf %310, %312 : vector<1x128xf32>
    %c0_95 = arith.constant 0 : index
    %c0_96 = arith.constant 0 : index
    %314 = vector.load %arg18[%c0_95, %c0_96] : memref<1x128xf32, #tpu.memory_space<vmem>>, vector<1x128xf32>
    %315 = arith.addf %313, %314 : vector<1x128xf32>
    %316 = vector.extract_strided_slice %15 {offsets = [0, 0], sizes = [1, 512], strides = [1, 1]} : vector<8x512xf32> to vector<1x512xf32>
    %c0_97 = arith.constant 0 : index
    %c0_98 = arith.constant 0 : index
    %317 = vector.load %arg10[%c0_97, %c0_98] : memref<128x512xf32, #tpu.memory_space<vmem>>, vector<128x512xf32>
    %cst_99 = arith.constant dense<0.000000e+00> : vector<1x512xf32>
    %318 = tpu.matmul %308, %317, %cst_99 {dimension_numbers = #tpu.dot_dimension_numbers<[1], [0], [0], [1], [0, 0, 1, 1], [], []>} : vector<1x128xf32>, vector<128x512xf32>, vector<1x512xf32> -> vector<1x512xf32>
    %319 = arith.addf %316, %318 : vector<1x512xf32>
    %320 = vector.extract_strided_slice %319 {offsets = [0, 0], sizes = [1, 128], strides = [1, 1]} : vector<1x512xf32> to vector<1x128xf32>
    %321 = arith.negf %320 : vector<1x128xf32>
    %322 = math.exp %321 : vector<1x128xf32>
    %cst_100 = arith.constant 1.000000e+00 : f32
    %323 = vector.broadcast %cst_100 : f32 to vector<1x128xf32>
    %324 = arith.addf %323, %322 : vector<1x128xf32>
    %325 = arith.divf %323, %324 : vector<1x128xf32>
    %326 = vector.extract_strided_slice %319 {offsets = [0, 128], sizes = [1, 128], strides = [1, 1]} : vector<1x512xf32> to vector<1x128xf32>
    %327 = arith.negf %326 : vector<1x128xf32>
    %328 = math.exp %327 : vector<1x128xf32>
    %cst_101 = arith.constant 1.000000e+00 : f32
    %329 = vector.broadcast %cst_101 : f32 to vector<1x128xf32>
    %330 = arith.addf %329, %328 : vector<1x128xf32>
    %331 = arith.divf %329, %330 : vector<1x128xf32>
    %332 = vector.extract_strided_slice %319 {offsets = [0, 256], sizes = [1, 128], strides = [1, 1]} : vector<1x512xf32> to vector<1x128xf32>
    %333 = math.tanh %332 : vector<1x128xf32>
    %334 = vector.extract_strided_slice %319 {offsets = [0, 384], sizes = [1, 128], strides = [1, 1]} : vector<1x512xf32> to vector<1x128xf32>
    %335 = arith.negf %334 : vector<1x128xf32>
    %336 = math.exp %335 : vector<1x128xf32>
    %cst_102 = arith.constant 1.000000e+00 : f32
    %337 = vector.broadcast %cst_102 : f32 to vector<1x128xf32>
    %338 = arith.addf %337, %336 : vector<1x128xf32>
    %339 = arith.divf %337, %338 : vector<1x128xf32>
    %340 = arith.mulf %331, %315 : vector<1x128xf32>
    %341 = arith.mulf %325, %333 : vector<1x128xf32>
    %342 = arith.addf %340, %341 : vector<1x128xf32>
    %343 = math.tanh %342 : vector<1x128xf32>
    %344 = arith.mulf %339, %343 : vector<1x128xf32>
    %c0_103 = arith.constant 0 : index
    %c0_104 = arith.constant 0 : index
    %345 = vector.load %arg21[%c0_103, %c0_104] : memref<8x128xf32, #tpu.memory_space<vmem>>, vector<1x128xf32>
    tpu.vector_store %arg21[%c0_103, %c0_104], %344 {strides = array<i32>} : memref<8x128xf32, #tpu.memory_space<vmem>>, vector<1x128xf32>,
    %346 = vector.extract_strided_slice %15 {offsets = [1, 0], sizes = [1, 512], strides = [1, 1]} : vector<8x512xf32> to vector<1x512xf32>
    %c0_105 = arith.constant 0 : index
    %c0_106 = arith.constant 0 : index
    %347 = vector.load %arg10[%c0_105, %c0_106] : memref<128x512xf32, #tpu.memory_space<vmem>>, vector<128x512xf32>
    %cst_107 = arith.constant dense<0.000000e+00> : vector<1x512xf32>
    %348 = tpu.matmul %344, %347, %cst_107 {dimension_numbers = #tpu.dot_dimension_numbers<[1], [0], [0], [1], [0, 0, 1, 1], [], []>} : vector<1x128xf32>, vector<128x512xf32>, vector<1x512xf32> -> vector<1x512xf32>
    %349 = arith.addf %346, %348 : vector<1x512xf32>
    %350 = vector.extract_strided_slice %349 {offsets = [0, 0], sizes = [1, 128], strides = [1, 1]} : vector<1x512xf32> to vector<1x128xf32>
    %351 = arith.negf %350 : vector<1x128xf32>
    %352 = math.exp %351 : vector<1x128xf32>
    %cst_108 = arith.constant 1.000000e+00 : f32
    %353 = vector.broadcast %cst_108 : f32 to vector<1x128xf32>
    %354 = arith.addf %353, %352 : vector<1x128xf32>
    %355 = arith.divf %353, %354 : vector<1x128xf32>
    %356 = vector.extract_strided_slice %349 {offsets = [0, 128], sizes = [1, 128], strides = [1, 1]} : vector<1x512xf32> to vector<1x128xf32>
    %357 = arith.negf %356 : vector<1x128xf32>
    %358 = math.exp %357 : vector<1x128xf32>
    %cst_109 = arith.constant 1.000000e+00 : f32
    %359 = vector.broadcast %cst_109 : f32 to vector<1x128xf32>
    %360 = arith.addf %359, %358 : vector<1x128xf32>
    %361 = arith.divf %359, %360 : vector<1x128xf32>
    %362 = vector.extract_strided_slice %349 {offsets = [0, 256], sizes = [1, 128], strides = [1, 1]} : vector<1x512xf32> to vector<1x128xf32>
    %363 = math.tanh %362 : vector<1x128xf32>
    %364 = vector.extract_strided_slice %349 {offsets = [0, 384], sizes = [1, 128], strides = [1, 1]} : vector<1x512xf32> to vector<1x128xf32>
    %365 = arith.negf %364 : vector<1x128xf32>
    %366 = math.exp %365 : vector<1x128xf32>
    %cst_110 = arith.constant 1.000000e+00 : f32
    %367 = vector.broadcast %cst_110 : f32 to vector<1x128xf32>
    %368 = arith.addf %367, %366 : vector<1x128xf32>
    %369 = arith.divf %367, %368 : vector<1x128xf32>
    %370 = arith.mulf %361, %342 : vector<1x128xf32>
    %371 = arith.mulf %355, %363 : vector<1x128xf32>
    %372 = arith.addf %370, %371 : vector<1x128xf32>
    %373 = math.tanh %372 : vector<1x128xf32>
    %374 = arith.mulf %369, %373 : vector<1x128xf32>
    %c1_111 = arith.constant 1 : index
    %c0_112 = arith.constant 0 : index
    %375 = vector.load %arg21[%c1_111, %c0_112] : memref<8x128xf32, #tpu.memory_space<vmem>>, vector<1x128xf32>
    tpu.vector_store %arg21[%c1_111, %c0_112], %374 {strides = array<i32>} : memref<8x128xf32, #tpu.memory_space<vmem>>, vector<1x128xf32>,
    %376 = vector.extract_strided_slice %15 {offsets = [2, 0], sizes = [1, 512], strides = [1, 1]} : vector<8x512xf32> to vector<1x512xf32>
    %c0_113 = arith.constant 0 : index
    %c0_114 = arith.constant 0 : index
    %377 = vector.load %arg10[%c0_113, %c0_114] : memref<128x512xf32, #tpu.memory_space<vmem>>, vector<128x512xf32>
    %cst_115 = arith.constant dense<0.000000e+00> : vector<1x512xf32>
    %378 = tpu.matmul %374, %377, %cst_115 {dimension_numbers = #tpu.dot_dimension_numbers<[1], [0], [0], [1], [0, 0, 1, 1], [], []>} : vector<1x128xf32>, vector<128x512xf32>, vector<1x512xf32> -> vector<1x512xf32>
    %379 = arith.addf %376, %378 : vector<1x512xf32>
    %380 = vector.extract_strided_slice %379 {offsets = [0, 0], sizes = [1, 128], strides = [1, 1]} : vector<1x512xf32> to vector<1x128xf32>
    %381 = arith.negf %380 : vector<1x128xf32>
    %382 = math.exp %381 : vector<1x128xf32>
    %cst_116 = arith.constant 1.000000e+00 : f32
    %383 = vector.broadcast %cst_116 : f32 to vector<1x128xf32>
    %384 = arith.addf %383, %382 : vector<1x128xf32>
    %385 = arith.divf %383, %384 : vector<1x128xf32>
    %386 = vector.extract_strided_slice %379 {offsets = [0, 128], sizes = [1, 128], strides = [1, 1]} : vector<1x512xf32> to vector<1x128xf32>
    %387 = arith.negf %386 : vector<1x128xf32>
    %388 = math.exp %387 : vector<1x128xf32>
    %cst_117 = arith.constant 1.000000e+00 : f32
    %389 = vector.broadcast %cst_117 : f32 to vector<1x128xf32>
    %390 = arith.addf %389, %388 : vector<1x128xf32>
    %391 = arith.divf %389, %390 : vector<1x128xf32>
    %392 = vector.extract_strided_slice %379 {offsets = [0, 256], sizes = [1, 128], strides = [1, 1]} : vector<1x512xf32> to vector<1x128xf32>
    %393 = math.tanh %392 : vector<1x128xf32>
    %394 = vector.extract_strided_slice %379 {offsets = [0, 384], sizes = [1, 128], strides = [1, 1]} : vector<1x512xf32> to vector<1x128xf32>
    %395 = arith.negf %394 : vector<1x128xf32>
    %396 = math.exp %395 : vector<1x128xf32>
    %cst_118 = arith.constant 1.000000e+00 : f32
    %397 = vector.broadcast %cst_118 : f32 to vector<1x128xf32>
    %398 = arith.addf %397, %396 : vector<1x128xf32>
    %399 = arith.divf %397, %398 : vector<1x128xf32>
    %400 = arith.mulf %391, %372 : vector<1x128xf32>
    %401 = arith.mulf %385, %393 : vector<1x128xf32>
    %402 = arith.addf %400, %401 : vector<1x128xf32>
    %403 = math.tanh %402 : vector<1x128xf32>
    %404 = arith.mulf %399, %403 : vector<1x128xf32>
    %c2_119 = arith.constant 2 : index
    %c0_120 = arith.constant 0 : index
    %405 = vector.load %arg21[%c2_119, %c0_120] : memref<8x128xf32, #tpu.memory_space<vmem>>, vector<1x128xf32>
    tpu.vector_store %arg21[%c2_119, %c0_120], %404 {strides = array<i32>} : memref<8x128xf32, #tpu.memory_space<vmem>>, vector<1x128xf32>,
    %406 = vector.extract_strided_slice %15 {offsets = [3, 0], sizes = [1, 512], strides = [1, 1]} : vector<8x512xf32> to vector<1x512xf32>
    %c0_121 = arith.constant 0 : index
    %c0_122 = arith.constant 0 : index
    %407 = vector.load %arg10[%c0_121, %c0_122] : memref<128x512xf32, #tpu.memory_space<vmem>>, vector<128x512xf32>
    %cst_123 = arith.constant dense<0.000000e+00> : vector<1x512xf32>
    %408 = tpu.matmul %404, %407, %cst_123 {dimension_numbers = #tpu.dot_dimension_numbers<[1], [0], [0], [1], [0, 0, 1, 1], [], []>} : vector<1x128xf32>, vector<128x512xf32>, vector<1x512xf32> -> vector<1x512xf32>
    %409 = arith.addf %406, %408 : vector<1x512xf32>
    %410 = vector.extract_strided_slice %409 {offsets = [0, 0], sizes = [1, 128], strides = [1, 1]} : vector<1x512xf32> to vector<1x128xf32>
    %411 = arith.negf %410 : vector<1x128xf32>
    %412 = math.exp %411 : vector<1x128xf32>
    %cst_124 = arith.constant 1.000000e+00 : f32
    %413 = vector.broadcast %cst_124 : f32 to vector<1x128xf32>
    %414 = arith.addf %413, %412 : vector<1x128xf32>
    %415 = arith.divf %413, %414 : vector<1x128xf32>
    %416 = vector.extract_strided_slice %409 {offsets = [0, 128], sizes = [1, 128], strides = [1, 1]} : vector<1x512xf32> to vector<1x128xf32>
    %417 = arith.negf %416 : vector<1x128xf32>
    %418 = math.exp %417 : vector<1x128xf32>
    %cst_125 = arith.constant 1.000000e+00 : f32
    %419 = vector.broadcast %cst_125 : f32 to vector<1x128xf32>
    %420 = arith.addf %419, %418 : vector<1x128xf32>
    %421 = arith.divf %419, %420 : vector<1x128xf32>
    %422 = vector.extract_strided_slice %409 {offsets = [0, 256], sizes = [1, 128], strides = [1, 1]} : vector<1x512xf32> to vector<1x128xf32>
    %423 = math.tanh %422 : vector<1x128xf32>
    %424 = vector.extract_strided_slice %409 {offsets = [0, 384], sizes = [1, 128], strides = [1, 1]} : vector<1x512xf32> to vector<1x128xf32>
    %425 = arith.negf %424 : vector<1x128xf32>
    %426 = math.exp %425 : vector<1x128xf32>
    %cst_126 = arith.constant 1.000000e+00 : f32
    %427 = vector.broadcast %cst_126 : f32 to vector<1x128xf32>
    %428 = arith.addf %427, %426 : vector<1x128xf32>
    %429 = arith.divf %427, %428 : vector<1x128xf32>
    %430 = arith.mulf %421, %402 : vector<1x128xf32>
    %431 = arith.mulf %415, %423 : vector<1x128xf32>
    %432 = arith.addf %430, %431 : vector<1x128xf32>
    %433 = math.tanh %432 : vector<1x128xf32>
    %434 = arith.mulf %429, %433 : vector<1x128xf32>
    %c3 = arith.constant 3 : index
    %c0_127 = arith.constant 0 : index
    %435 = vector.load %arg21[%c3, %c0_127] : memref<8x128xf32, #tpu.memory_space<vmem>>, vector<1x128xf32>
    tpu.vector_store %arg21[%c3, %c0_127], %434 {strides = array<i32>} : memref<8x128xf32, #tpu.memory_space<vmem>>, vector<1x128xf32>,
    %436 = vector.extract_strided_slice %15 {offsets = [4, 0], sizes = [1, 512], strides = [1, 1]} : vector<8x512xf32> to vector<1x512xf32>
    %c0_128 = arith.constant 0 : index
    %c0_129 = arith.constant 0 : index
    %437 = vector.load %arg10[%c0_128, %c0_129] : memref<128x512xf32, #tpu.memory_space<vmem>>, vector<128x512xf32>
    %cst_130 = arith.constant dense<0.000000e+00> : vector<1x512xf32>
    %438 = tpu.matmul %434, %437, %cst_130 {dimension_numbers = #tpu.dot_dimension_numbers<[1], [0], [0], [1], [0, 0, 1, 1], [], []>} : vector<1x128xf32>, vector<128x512xf32>, vector<1x512xf32> -> vector<1x512xf32>
    %439 = arith.addf %436, %438 : vector<1x512xf32>
    %440 = vector.extract_strided_slice %439 {offsets = [0, 0], sizes = [1, 128], strides = [1, 1]} : vector<1x512xf32> to vector<1x128xf32>
    %441 = arith.negf %440 : vector<1x128xf32>
    %442 = math.exp %441 : vector<1x128xf32>
    %cst_131 = arith.constant 1.000000e+00 : f32
    %443 = vector.broadcast %cst_131 : f32 to vector<1x128xf32>
    %444 = arith.addf %443, %442 : vector<1x128xf32>
    %445 = arith.divf %443, %444 : vector<1x128xf32>
    %446 = vector.extract_strided_slice %439 {offsets = [0, 128], sizes = [1, 128], strides = [1, 1]} : vector<1x512xf32> to vector<1x128xf32>
    %447 = arith.negf %446 : vector<1x128xf32>
    %448 = math.exp %447 : vector<1x128xf32>
    %cst_132 = arith.constant 1.000000e+00 : f32
    %449 = vector.broadcast %cst_132 : f32 to vector<1x128xf32>
    %450 = arith.addf %449, %448 : vector<1x128xf32>
    %451 = arith.divf %449, %450 : vector<1x128xf32>
    %452 = vector.extract_strided_slice %439 {offsets = [0, 256], sizes = [1, 128], strides = [1, 1]} : vector<1x512xf32> to vector<1x128xf32>
    %453 = math.tanh %452 : vector<1x128xf32>
    %454 = vector.extract_strided_slice %439 {offsets = [0, 384], sizes = [1, 128], strides = [1, 1]} : vector<1x512xf32> to vector<1x128xf32>
    %455 = arith.negf %454 : vector<1x128xf32>
    %456 = math.exp %455 : vector<1x128xf32>
    %cst_133 = arith.constant 1.000000e+00 : f32
    %457 = vector.broadcast %cst_133 : f32 to vector<1x128xf32>
    %458 = arith.addf %457, %456 : vector<1x128xf32>
    %459 = arith.divf %457, %458 : vector<1x128xf32>
    %460 = arith.mulf %451, %432 : vector<1x128xf32>
    %461 = arith.mulf %445, %453 : vector<1x128xf32>
    %462 = arith.addf %460, %461 : vector<1x128xf32>
    %463 = math.tanh %462 : vector<1x128xf32>
    %464 = arith.mulf %459, %463 : vector<1x128xf32>
    %c4 = arith.constant 4 : index
    %c0_134 = arith.constant 0 : index
    %465 = vector.load %arg21[%c4, %c0_134] : memref<8x128xf32, #tpu.memory_space<vmem>>, vector<1x128xf32>
    tpu.vector_store %arg21[%c4, %c0_134], %464 {strides = array<i32>} : memref<8x128xf32, #tpu.memory_space<vmem>>, vector<1x128xf32>,
    %466 = vector.extract_strided_slice %15 {offsets = [5, 0], sizes = [1, 512], strides = [1, 1]} : vector<8x512xf32> to vector<1x512xf32>
    %c0_135 = arith.constant 0 : index
    %c0_136 = arith.constant 0 : index
    %467 = vector.load %arg10[%c0_135, %c0_136] : memref<128x512xf32, #tpu.memory_space<vmem>>, vector<128x512xf32>
    %cst_137 = arith.constant dense<0.000000e+00> : vector<1x512xf32>
    %468 = tpu.matmul %464, %467, %cst_137 {dimension_numbers = #tpu.dot_dimension_numbers<[1], [0], [0], [1], [0, 0, 1, 1], [], []>} : vector<1x128xf32>, vector<128x512xf32>, vector<1x512xf32> -> vector<1x512xf32>
    %469 = arith.addf %466, %468 : vector<1x512xf32>
    %470 = vector.extract_strided_slice %469 {offsets = [0, 0], sizes = [1, 128], strides = [1, 1]} : vector<1x512xf32> to vector<1x128xf32>
    %471 = arith.negf %470 : vector<1x128xf32>
    %472 = math.exp %471 : vector<1x128xf32>
    %cst_138 = arith.constant 1.000000e+00 : f32
    %473 = vector.broadcast %cst_138 : f32 to vector<1x128xf32>
    %474 = arith.addf %473, %472 : vector<1x128xf32>
    %475 = arith.divf %473, %474 : vector<1x128xf32>
    %476 = vector.extract_strided_slice %469 {offsets = [0, 128], sizes = [1, 128], strides = [1, 1]} : vector<1x512xf32> to vector<1x128xf32>
    %477 = arith.negf %476 : vector<1x128xf32>
    %478 = math.exp %477 : vector<1x128xf32>
    %cst_139 = arith.constant 1.000000e+00 : f32
    %479 = vector.broadcast %cst_139 : f32 to vector<1x128xf32>
    %480 = arith.addf %479, %478 : vector<1x128xf32>
    %481 = arith.divf %479, %480 : vector<1x128xf32>
    %482 = vector.extract_strided_slice %469 {offsets = [0, 256], sizes = [1, 128], strides = [1, 1]} : vector<1x512xf32> to vector<1x128xf32>
    %483 = math.tanh %482 : vector<1x128xf32>
    %484 = vector.extract_strided_slice %469 {offsets = [0, 384], sizes = [1, 128], strides = [1, 1]} : vector<1x512xf32> to vector<1x128xf32>
    %485 = arith.negf %484 : vector<1x128xf32>
    %486 = math.exp %485 : vector<1x128xf32>
    %cst_140 = arith.constant 1.000000e+00 : f32
    %487 = vector.broadcast %cst_140 : f32 to vector<1x128xf32>
    %488 = arith.addf %487, %486 : vector<1x128xf32>
    %489 = arith.divf %487, %488 : vector<1x128xf32>
    %490 = arith.mulf %481, %462 : vector<1x128xf32>
    %491 = arith.mulf %475, %483 : vector<1x128xf32>
    %492 = arith.addf %490, %491 : vector<1x128xf32>
    %493 = math.tanh %492 : vector<1x128xf32>
    %494 = arith.mulf %489, %493 : vector<1x128xf32>
    %c5 = arith.constant 5 : index
    %c0_141 = arith.constant 0 : index
    %495 = vector.load %arg21[%c5, %c0_141] : memref<8x128xf32, #tpu.memory_space<vmem>>, vector<1x128xf32>
    tpu.vector_store %arg21[%c5, %c0_141], %494 {strides = array<i32>} : memref<8x128xf32, #tpu.memory_space<vmem>>, vector<1x128xf32>,
    %496 = vector.extract_strided_slice %15 {offsets = [6, 0], sizes = [1, 512], strides = [1, 1]} : vector<8x512xf32> to vector<1x512xf32>
    %c0_142 = arith.constant 0 : index
    %c0_143 = arith.constant 0 : index
    %497 = vector.load %arg10[%c0_142, %c0_143] : memref<128x512xf32, #tpu.memory_space<vmem>>, vector<128x512xf32>
    %cst_144 = arith.constant dense<0.000000e+00> : vector<1x512xf32>
    %498 = tpu.matmul %494, %497, %cst_144 {dimension_numbers = #tpu.dot_dimension_numbers<[1], [0], [0], [1], [0, 0, 1, 1], [], []>} : vector<1x128xf32>, vector<128x512xf32>, vector<1x512xf32> -> vector<1x512xf32>
    %499 = arith.addf %496, %498 : vector<1x512xf32>
    %500 = vector.extract_strided_slice %499 {offsets = [0, 0], sizes = [1, 128], strides = [1, 1]} : vector<1x512xf32> to vector<1x128xf32>
    %501 = arith.negf %500 : vector<1x128xf32>
    %502 = math.exp %501 : vector<1x128xf32>
    %cst_145 = arith.constant 1.000000e+00 : f32
    %503 = vector.broadcast %cst_145 : f32 to vector<1x128xf32>
    %504 = arith.addf %503, %502 : vector<1x128xf32>
    %505 = arith.divf %503, %504 : vector<1x128xf32>
    %506 = vector.extract_strided_slice %499 {offsets = [0, 128], sizes = [1, 128], strides = [1, 1]} : vector<1x512xf32> to vector<1x128xf32>
    %507 = arith.negf %506 : vector<1x128xf32>
    %508 = math.exp %507 : vector<1x128xf32>
    %cst_146 = arith.constant 1.000000e+00 : f32
    %509 = vector.broadcast %cst_146 : f32 to vector<1x128xf32>
    %510 = arith.addf %509, %508 : vector<1x128xf32>
    %511 = arith.divf %509, %510 : vector<1x128xf32>
    %512 = vector.extract_strided_slice %499 {offsets = [0, 256], sizes = [1, 128], strides = [1, 1]} : vector<1x512xf32> to vector<1x128xf32>
    %513 = math.tanh %512 : vector<1x128xf32>
    %514 = vector.extract_strided_slice %499 {offsets = [0, 384], sizes = [1, 128], strides = [1, 1]} : vector<1x512xf32> to vector<1x128xf32>
    %515 = arith.negf %514 : vector<1x128xf32>
    %516 = math.exp %515 : vector<1x128xf32>
    %cst_147 = arith.constant 1.000000e+00 : f32
    %517 = vector.broadcast %cst_147 : f32 to vector<1x128xf32>
    %518 = arith.addf %517, %516 : vector<1x128xf32>
    %519 = arith.divf %517, %518 : vector<1x128xf32>
    %520 = arith.mulf %511, %492 : vector<1x128xf32>
    %521 = arith.mulf %505, %513 : vector<1x128xf32>
    %522 = arith.addf %520, %521 : vector<1x128xf32>
    %523 = math.tanh %522 : vector<1x128xf32>
    %524 = arith.mulf %519, %523 : vector<1x128xf32>
    %c6 = arith.constant 6 : index
    %c0_148 = arith.constant 0 : index
    %525 = vector.load %arg21[%c6, %c0_148] : memref<8x128xf32, #tpu.memory_space<vmem>>, vector<1x128xf32>
    tpu.vector_store %arg21[%c6, %c0_148], %524 {strides = array<i32>} : memref<8x128xf32, #tpu.memory_space<vmem>>, vector<1x128xf32>,
    %526 = vector.extract_strided_slice %15 {offsets = [7, 0], sizes = [1, 512], strides = [1, 1]} : vector<8x512xf32> to vector<1x512xf32>
    %c0_149 = arith.constant 0 : index
    %c0_150 = arith.constant 0 : index
    %527 = vector.load %arg10[%c0_149, %c0_150] : memref<128x512xf32, #tpu.memory_space<vmem>>, vector<128x512xf32>
    %cst_151 = arith.constant dense<0.000000e+00> : vector<1x512xf32>
    %528 = tpu.matmul %524, %527, %cst_151 {dimension_numbers = #tpu.dot_dimension_numbers<[1], [0], [0], [1], [0, 0, 1, 1], [], []>} : vector<1x128xf32>, vector<128x512xf32>, vector<1x512xf32> -> vector<1x512xf32>
    %529 = arith.addf %526, %528 : vector<1x512xf32>
    %530 = vector.extract_strided_slice %529 {offsets = [0, 0], sizes = [1, 128], strides = [1, 1]} : vector<1x512xf32> to vector<1x128xf32>
    %531 = arith.negf %530 : vector<1x128xf32>
    %532 = math.exp %531 : vector<1x128xf32>
    %cst_152 = arith.constant 1.000000e+00 : f32
    %533 = vector.broadcast %cst_152 : f32 to vector<1x128xf32>
    %534 = arith.addf %533, %532 : vector<1x128xf32>
    %535 = arith.divf %533, %534 : vector<1x128xf32>
    %536 = vector.extract_strided_slice %529 {offsets = [0, 128], sizes = [1, 128], strides = [1, 1]} : vector<1x512xf32> to vector<1x128xf32>
    %537 = arith.negf %536 : vector<1x128xf32>
    %538 = math.exp %537 : vector<1x128xf32>
    %cst_153 = arith.constant 1.000000e+00 : f32
    %539 = vector.broadcast %cst_153 : f32 to vector<1x128xf32>
    %540 = arith.addf %539, %538 : vector<1x128xf32>
    %541 = arith.divf %539, %540 : vector<1x128xf32>
    %542 = vector.extract_strided_slice %529 {offsets = [0, 256], sizes = [1, 128], strides = [1, 1]} : vector<1x512xf32> to vector<1x128xf32>
    %543 = math.tanh %542 : vector<1x128xf32>
    %544 = vector.extract_strided_slice %529 {offsets = [0, 384], sizes = [1, 128], strides = [1, 1]} : vector<1x512xf32> to vector<1x128xf32>
    %545 = arith.negf %544 : vector<1x128xf32>
    %546 = math.exp %545 : vector<1x128xf32>
    %cst_154 = arith.constant 1.000000e+00 : f32
    %547 = vector.broadcast %cst_154 : f32 to vector<1x128xf32>
    %548 = arith.addf %547, %546 : vector<1x128xf32>
    %549 = arith.divf %547, %548 : vector<1x128xf32>
    %550 = arith.mulf %541, %522 : vector<1x128xf32>
    %551 = arith.mulf %535, %543 : vector<1x128xf32>
    %552 = arith.addf %550, %551 : vector<1x128xf32>
    %553 = math.tanh %552 : vector<1x128xf32>
    %554 = arith.mulf %549, %553 : vector<1x128xf32>
    %c7 = arith.constant 7 : index
    %c0_155 = arith.constant 0 : index
    %555 = vector.load %arg21[%c7, %c0_155] : memref<8x128xf32, #tpu.memory_space<vmem>>, vector<1x128xf32>
    tpu.vector_store %arg21[%c7, %c0_155], %554 {strides = array<i32>} : memref<8x128xf32, #tpu.memory_space<vmem>>, vector<1x128xf32>,
    %c0_156 = arith.constant 0 : index
    %c0_157 = arith.constant 0 : index
    %556 = vector.load %arg21[%c0_156, %c0_157] : memref<8x128xf32, #tpu.memory_space<vmem>>, vector<8x128xf32>
    %c0_158 = arith.constant 0 : index
    %c0_159 = arith.constant 0 : index
    %557 = vector.load %arg11[%c0_158, %c0_159] : memref<128x32xf32, #tpu.memory_space<vmem>>, vector<128x32xf32>
    %cst_160 = arith.constant dense<0.000000e+00> : vector<8x32xf32>
    %558 = tpu.matmul %556, %557, %cst_160 {dimension_numbers = #tpu.dot_dimension_numbers<[1], [0], [0], [1], [0, 0, 1, 1], [], []>} : vector<8x128xf32>, vector<128x32xf32>, vector<8x32xf32> -> vector<8x32xf32>
    %c0_161 = arith.constant 0 : index
    %c0_162 = arith.constant 0 : index
    %559 = vector.load %arg12[%c0_161, %c0_162] : memref<1x32xf32, #tpu.memory_space<vmem>>, vector<1x32xf32>
    %560 = vector.broadcast %559 : vector<1x32xf32> to vector<8x32xf32>
    %561 = arith.addf %558, %560 : vector<8x32xf32>
    %cst_163 = arith.constant dense<0xFF800000> : vector<8xf32>
    %562 = vector.multi_reduction <maximumf>, %561, %cst_163 [1] : vector<8x32xf32> to vector<8xf32>
    %563 = vector.shape_cast %562 : vector<8xf32> to vector<8x1xf32>
    %564 = vector.broadcast %563 : vector<8x1xf32> to vector<8x32xf32>
    %565 = arith.cmpf oeq, %561, %564 : vector<8x32xf32>
    %c32_i32 = arith.constant 32 : i32
    %566 = vector.broadcast %c32_i32 : i32 to vector<8x32xi32>
    %567 = arith.select %565, %8, %566 : vector<8x32xi1>, vector<8x32xi32>
    %cst_164 = arith.constant dense<2147483647> : vector<8xi32>
    %568 = vector.multi_reduction <minsi>, %567, %cst_164 [1] : vector<8x32xi32> to vector<8xi32>
    %569 = vector.shape_cast %568 : vector<8xi32> to vector<8x1xi32>
    %c0_165 = arith.constant 0 : index
    %c0_166 = arith.constant 0 : index
    %570 = vector.load %arg19[%c0_165, %c0_166] : memref<8x1xi32, #tpu.memory_space<vmem>>, vector<8x1xi32>
    tpu.vector_store %arg19[%c0_165, %c0_166], %569 {strides = array<i32>} : memref<8x1xi32, #tpu.memory_space<vmem>>, vector<8x1xi32>,
    %571 = vector.broadcast %563 : vector<8x1xf32> to vector<8x32xf32>
    %572 = arith.subf %561, %571 : vector<8x32xf32>
    %573 = math.exp %572 : vector<8x32xf32>
    %cst_167 = arith.constant dense<0.000000e+00> : vector<8xf32>
    %574 = vector.multi_reduction <add>, %573, %cst_167 [1] : vector<8x32xf32> to vector<8xf32>
    %575 = vector.shape_cast %574 : vector<8xf32> to vector<8x1xf32>
    %576 = math.log %575 : vector<8x1xf32>
    %577 = arith.addf %563, %576 : vector<8x1xf32>
    %c0_168 = arith.constant 0 : index
    %c0_169 = arith.constant 0 : index
    %578 = vector.load %arg3[%c0_168, %c0_169] : memref<8x1xi32, #tpu.memory_space<vmem>>, vector<8x1xi32>
    %579 = vector.broadcast %578 : vector<8x1xi32> to vector<8x32xi32>
    %580 = arith.cmpi eq, %8, %579 : vector<8x32xi32>
    %cst_170 = arith.constant 0.000000e+00 : f32
    %581 = vector.broadcast %cst_170 : f32 to vector<8x32xf32>
    %582 = arith.select %580, %561, %581 : vector<8x32xi1>, vector<8x32xf32>
    %cst_171 = arith.constant dense<0.000000e+00> : vector<8xf32>
    %583 = vector.multi_reduction <add>, %582, %cst_171 [1] : vector<8x32xf32> to vector<8xf32>
    %584 = vector.shape_cast %583 : vector<8xf32> to vector<8x1xf32>
    %585 = arith.subf %577, %584 : vector<8x1xf32>
    %586 = vector.shape_cast %585 : vector<8x1xf32> to vector<1x8x1xf32>
    %cst_172 = arith.constant dense<0.000000e+00> : vector<1xf32>
    %587 = vector.multi_reduction <add>, %586, %cst_172 [1, 2] : vector<1x8x1xf32> to vector<1xf32>
    %588 = vector.shape_cast %587 : vector<1xf32> to vector<1x1x1xf32>
    %589 = vector.extract %588[0, 0, 0] : f32 from vector<1x1x1xf32>
    %cst_173 = arith.constant 8.000000e+00 : f32
    %590 = arith.divf %589, %cst_173 : f32
    %c0_174 = arith.constant 0 : index
    %591 = memref.load %arg20[%c0_174] : memref<3xf32, #tpu.memory_space<smem>>
    memref.store %590, %arg20[%c0_174] : memref<3xf32, #tpu.memory_space<smem>>
    return
  }
}

</mosaic_0001>

<bundles_post_ra>
// kernel: tpu_custom_call.1
= control target key start
LH: loop header
LB: loop body
LE: loop exit
PB: predicated region body
PF: predicated region fallthrough
CT: control target
= control target key end

     0   :  { %s7834_s0 = inlined_call_operand.hbm [shape: s32[2], index: 0, kind: input, shape index: {}]   ;;  %s7835_s1 = inlined_call_operand.vmem [shape: s32[8,1], index: 1, kind: input, shape index: {}]   ;;  %s7836_s2 = inlined_call_operand.vmem [shape: s32[8,1], index: 2, kind: input, shape index: {}]   ;;  %s7837_s3 = inlined_call_operand.vmem [shape: s32[8,1], index: 3, kind: input, shape index: {}]   ;;  %s7838_s4 = inlined_call_operand.vmem [shape: f32[2,16], index: 4, kind: input, shape index: {}]   ;;  %s7839_s5 = inlined_call_operand.vmem [shape: f32[4,8], index: 5, kind: input, shape index: {}]   ;;  %s7840_s6 = inlined_call_operand.vmem [shape: f32[4,128], index: 6, kind: input, shape index: {}]   ;;  %s7841_s7 = inlined_call_operand.vmem [shape: f32[32,512], index: 7, kind: input, shape index: {}]   ;;  %s7842_s8 = inlined_call_operand.hbm [shape: f32[128,512], index: 8, kind: input, shape index: {}]   ;;  %s7843_s9 = inlined_call_operand.vmem [shape: f32[32,512], index: 9, kind: input, shape index: {}]   ;;  %s7844_s10 = inlined_call_operand.hbm [shape: f32[128,512], index: 10, kind: input, shape index: {}]   ;;  %s7845_s11 = inlined_call_operand.vmem [shape: f32[128,32], index: 11, kind: input, shape index: {}]   ;;  %s7846_s12 = inlined_call_operand.vmem [shape: f32[1,32], index: 12, kind: input, shape index: {}]   ;;  %s7847_s13 = inlined_call_operand.vmem [shape: f32[128,64], index: 13, kind: input, shape index: {}]   ;;  %s7848_s14 = inlined_call_operand.vmem [shape: f32[1,64], index: 14, kind: input, shape index: {}]   ;;  %s7849_s15 = inlined_call_operand.vmem [shape: f32[24,128], index: 15, kind: input, shape index: {}]   ;;  %s7850_s16 = inlined_call_operand.vmem [shape: f32[1,128], index: 16, kind: input, shape index: {}]   ;;  %s7851_s17 = inlined_call_operand.vmem [shape: f32[24,128], index: 17, kind: input, shape index: {}]   ;;  %s7852_s18 = inlined_call_operand.vmem [shape: f32[1,128], index: 18, kind: input, shape index: {}]   ;;  %s7853_s19 = inlined_call_operand.vmem [shape: s32[8,1], index: 19, kind: output, shape index: {0}]   ;;  %s7854_s20 = inlined_call_operand.hbm [shape: f32[3], index: 20, kind: output, shape index: {1}]  }
   0x1   :  { %7857 = sst [smem:[#allocation15_spill]] %s7834_s0 }
   0x2   :  { %7858 = sst [smem:[#allocation16_spill]] %s7835_s1 }
   0x3   :  { %7859 = sst [smem:[#allocation17_spill]] %s7836_s2 }
   0x4   :  { %7860 = sst [smem:[#allocation18_spill]] %s7837_s3 }
   0x5   :  { %7861 = sst [smem:[#allocation19_spill]] %s7838_s4 }
   0x6   :  { %26 = vsyncpa [#allocation5], 0 }
   0x7   :  { %27 = vsyncpa [#allocation4], 0 }
   0x8   :  { %28 = vsyncpa [#allocation9], 0 }
   0x9   :  { %29 = vsyncpa [#allocation6], 0  ;;  %s7862_s23 = sld [smem:[#allocation15_spill]] }
   0xf   :  { %s6390_s24 = scalar_lea.hbm %s7862_s23, 16 }
  0x10   :  { %p6391_p0 = scmp.ne.s32.totalorder %s7862_s23, %s6390_s24  ;;  %p6394_p1 = scmp.lt.u32.totalorder %s6390_s24, %s7862_s23 }
  0x12   :  { %p6396_p2 = pnand %p6394_p1, %p6391_p0 }
  0x14   :  { %6399 = shalt.err (!%p6396_p2)
}
  0x15   :  { %s6462_s27 = smov [#allocation3]   ;;  %s6463_s29 = smov [#allocation7]  }
  0x16   :  { %37 = dma.hbm_to_smem %s7862_s23, 16, %s6462_s27, [#allocation5]  }
  0x17   :  { %s57_s30 = sshll.u32 %s6463_s29, 4  ;;  %s6400_s1 = scalar_lea.hbm %s7842_s8, 8192  ;;  %s58_s30 = int_to_ptr.vmem [resolvable:$true] %s57_s30 }
  0x18   :  { %p6401_p3 = scmp.ne.s32.totalorder %s7842_s8, %s6400_s1  ;;  %p6404_p4 = scmp.lt.u32.totalorder %s6400_s1, %s7842_s8 }
  0x1a   :  { %p6406_p5 = pnand %p6404_p4, %p6401_p3 }
  0x1c   :  { %6409 = shalt.err (!%p6406_p5)
}
  0x1d   :  { %s6410_s3 = scalar_lea.vmem %s58_s30, 8192  ;;  %p6415_p7 = scmp.lt.s32.totalorder %s58_s30, %s58_s30 }
  0x1e   :  { %p6411_p6 = scmp.ne.s32.totalorder %s58_s30, %s6410_s3  ;;  %p6416_p8 = scmp.lt.s32.totalorder %s6410_s3, %s6410_s3 }
  0x20   :  { %p6417_p9 = por %p6416_p8, %p6415_p7 }
  0x22   :  { %p6418_p10 = pnand %p6417_p9, %p6411_p6 }
  0x24   :  { %6421 = shalt.err (!%p6418_p10)
}
  0x25   :  { %s6464_s23 = smov 512   ;;  %s6465_s26 = smov 32  }
  0x26   :  { %63 = dma.hbm_to_vmem [thread:$0]  %s7842_s8, 8192, %s58_s30, [#allocation4], %s6464_s23, %s6464_s23, %s6465_s26  }
  0x27   :  { %s6466_s4 = smov [#allocation8]   ;;  %s6422_s1 = scalar_lea.hbm %s7844_s10, 8192 }
  0x28   :  { %s71_s29 = sshll.u32 %s6466_s4, 4  ;;  %p6423_p11 = scmp.ne.s32.totalorder %s7844_s10, %s6422_s1  ;;  %s72_s29 = int_to_ptr.vmem [resolvable:$true] %s71_s29 }
  0x29   :  { %p6426_p12 = scmp.lt.u32.totalorder %s6422_s1, %s7844_s10 }
  0x2b   :  { %p6428_p13 = pnand %p6426_p12, %p6423_p11 }
  0x2d   :  { %6431 = shalt.err (!%p6428_p13)
}
  0x2e   :  { %s6432_s3 = scalar_lea.vmem %s72_s29, 8192  ;;  %p6437_p1 = scmp.lt.s32.totalorder %s72_s29, %s72_s29 }
  0x2f   :  { %p6433_p0 = scmp.ne.s32.totalorder %s72_s29, %s6432_s3  ;;  %p6438_p2 = scmp.lt.s32.totalorder %s6432_s3, %s6432_s3 }
  0x31   :  { %p6439_p3 = por %p6438_p2, %p6437_p1 }
  0x33   :  { %p6440_p4 = pnand %p6439_p3, %p6433_p0 }
  0x35   :  { %6443 = shalt.err (!%p6440_p4)
}
  0x36   :  { %77 = dma.hbm_to_vmem [thread:$0]  %s7844_s10, 8192, %s72_s29, [#allocation9], %s6464_s23, %s6464_s23, %s6465_s26  }
  0x37   :  { %6454 = dma.done.wait [#allocation5], 16  }
  0x38   :  { %6455 = vsyncadd [#allocation5], 4294967280 }
  0x39   :  { %6456 = dma.done.wait [#allocation4], 8192  }
  0x3a   :  { %6457 = vsyncadd [#allocation4], 4294959104 }
  0x3b   :  { %6458 = dma.done.wait [#allocation9], 8192  }
  0x3c   :  { %6459 = vsyncadd [#allocation9], 4294959104 }
  0x3d   :  { %103 = sfence }
  0x3e   :  { %s7863_s4 = sld [smem:[#allocation16_spill]]  ;;  %v447_v1 = vld [vmem:[#allocation7 + $0x8] sm:$0xff]  ;;  %v6467_v2 = vmov 0   ;;  %s7864_s1 = sld [smem:[#allocation17_spill]]  ;;  %v446_v5 = vld [vmem:[#allocation7] sm:$0xff]  ;;  %v6468_v7 = vmov 0.0  }
  0x3f   :  { %6120 = vset.pattern.permute.xlu0 %v6467_v2  ;;  %v451_v4 = vld [vmem:[#allocation7 + $0x28] sm:$0xff]  ;;  %v450_v6 = vld [vmem:[#allocation7 + $0x20] sm:$0xff]  ;;  %197 = vmatprep.mubr.f32.mxu1 %v6468_v7  ;;  %v113_v26 = vld [vmem:[%s7841_s7] sm:$0xff]  ;;  %s443_s2 = sld [smem:[#allocation3]]  ;;  %vm129_vm0 = vcmask 261120   ;;  %vm6470_vm3 = vmmov 0  }
  0x40   :  { %v6626_v8 = vpack.c.bf16 %v451_v4, %v447_v1  ;;  %v6628_v9 = vpack.c.bf16 %v450_v6, %v446_v5  ;;  %v455_v10 = vld [vmem:[#allocation7 + $0x48] sm:$0xff]  ;;  %v454_v12 = vld [vmem:[#allocation7 + $0x40] sm:$0xff]  ;;  %574 = vmatprep.mubr.f32.mxu0 %v6468_v7  ;;  %6121 = vset.pattern.permute.xlu1 %v6467_v2  ;;  %v117_v27 = vld [vmem:[%s7841_s7 + $0x20] sm:$0xff]  ;;  %v104_v4 = vlaneseq  ;;  %s4746_s27 = sld [smem:[#allocation3 + $0x1]]  ;;  %vm2241_vm4 = vcmask 64512   ;;  %s6471_s29 = smov 112  }
  0x41   :  { %v459_v11 = vld [vmem:[#allocation7 + $0x68] sm:$0xff]  ;;  %v458_v14 = vld [vmem:[#allocation7 + $0x60] sm:$0xff]  ;;  %v4968_v33 = vpack.c.bf16 %v117_v27, %v113_v26  ;;  %v121_v38 = vld [vmem:[%s7841_s7 + $0x40] sm:$0xff]  ;;  %vm2315_vm5 = vcmask 130048   ;;  %s6473_s30 = smov 96   ;;  %vm2170_vm8 = vcmask 122880  }
  0x42   :  { %v6631_v13 = vpack.c.bf16 %v459_v11, %v455_v10  ;;  %v463_v15 = vld [vmem:[#allocation7 + $0x88] sm:$0xff]  ;;  %4999 = vmatprep.subr.bf16.mxu0 %v6626_v8  ;;  %v6635_v17 = vpack.c.bf16 %v458_v14, %v454_v12  ;;  %v462_v19 = vld [vmem:[#allocation7 + $0x80] sm:$0xff]  ;;  %v125_v39 = vld [vmem:[%s7841_s7 + $0x60] sm:$0xff]  ;;  %v6729_v5 = vand.u32 127, %v104_v4  ;;  %vm4658_vm9 = vcmask 7168  }
  0x43   :  { %v467_v16 = vld [vmem:[#allocation7 + $0xa8] sm:$0xff]  ;;  %5001 = vmatpush1.bf16.msra.mxu0 %v6628_v9  ;;  %v466_v20 = vld [vmem:[#allocation7 + $0xa0] sm:$0xff]  ;;  %v4972_v42 = vpack.c.bf16 %v125_v39, %v121_v38  ;;  %v116_v45 = vld [vmem:[%s7841_s7 + $0x18] sm:$0xff] }
  0x44   :  { %v106_v0 = vld [vmem:[%s7863_s4] sm:$0xff]  ;;  %5003 = vmatprep.subr.bf16.mxu0 %v6631_v13  ;;  %v6638_v18 = vpack.c.bf16 %v467_v16, %v463_v15  ;;  %v471_v21 = vld [vmem:[#allocation7 + $0xc8] sm:$0xff]  ;;  %v114_v23 = vld [vmem:[%s7841_s7 + $0x8] sm:$0xff]  ;;  %v6644_v24 = vpack.c.bf16 %v466_v20, %v462_v19  ;;  %s7866_s4 = sld [smem:[#allocation18_spill]] }
  0x45   :  { %v275_v3 = vld [vmem:[%s7864_s1] sm:$0xff]  ;;  %108 = vperm.xlu0 %6120, %v106_v0   ;;  %v475_v22 = vld [vmem:[#allocation7 + $0xe8] sm:$0xff]  ;;  %v118_v25 = vld [vmem:[%s7841_s7 + $0x28] sm:$0xff]  ;;  %s444_s3 = scalar_lea.vmem %s7840_s6, %s443_s2  ;;  %s7865_s2 = sld [smem:[#allocation19_spill]] }
  0x46   :  { %v6656_v28 = vpack.c.bf16 %v475_v22, %v471_v21  ;;  %v470_v29 = vld [vmem:[#allocation7 + $0xc0] sm:$0xff]  ;;  %v479_v31 = vld [vmem:[#allocation7 + $0x108] sm:$0xff]  ;;  %v4966_v32 = vpack.c.bf16 %v118_v25, %v114_v23  ;;  %v120_v46 = vld [vmem:[%s7841_s7 + $0x38] sm:$0xff]  ;;  %s2236_s23 = scalar_lea.vmem %s7839_s5, %s4746_s27 }
  0x47   :  { %5005 = vmatpush1.bf16.msra.mxu0 %v6635_v17  ;;  %v474_v30 = vld [vmem:[#allocation7 + $0xe0] sm:$0xff]  ;;  %v483_v34 = vld [vmem:[#allocation7 + $0x128] sm:$0xff]  ;;  %v4974_v49 = vpack.c.bf16 %v120_v46, %v116_v45  ;;  %v124_v11 = vld [vmem:[%s7841_s7 + $0x58] sm:$0xff] }
  0x48   :  { %5007 = vmatprep.subr.bf16.mxu0 %v6638_v18  ;;  %v122_v35 = vld [vmem:[%s7841_s7 + $0x48] sm:$0xff]  ;;  %4967 = vmatprep.subr.bf16.mxu1 %v4966_v32  ;;  %v6671_v40 = vpack.c.bf16 %v474_v30, %v470_v29  ;;  %v6674_v43 = vpack.c.bf16 %v483_v34, %v479_v31  ;;  %v487_v47 = vld [vmem:[#allocation7 + $0x148] sm:$0xff]  ;;  %v128_v12 = vld [vmem:[%s7841_s7 + $0x78] sm:$0xff] }
  0x49   :  { %277 = vperm.xlu0 %6120, %v275_v3   ;;  %v126_v36 = vld [vmem:[%s7841_s7 + $0x68] sm:$0xff]  ;;  %4969 = vmatpush1.bf16.msra.mxu1 %v4968_v33  ;;  %v491_v48 = vld [vmem:[#allocation7 + $0x168] sm:$0xff]  ;;  %v6708_v3 = vld [vmem:[%s444_s3] sm:$0x1]  ;;  %v4978_v16 = vpack.c.bf16 %v128_v12, %v124_v11 }
  0x4a   :  { %v4970_v37 = vpack.c.bf16 %v126_v36, %v122_v35  ;;  %v478_v41 = vld [vmem:[#allocation7 + $0x100] sm:$0xff]  ;;  %v6686_v51 = vpack.c.bf16 %v491_v48, %v487_v47  ;;  %v495_v54 = vld [vmem:[#allocation7 + $0x188] sm:$0xff]  ;;  %v282_v27 = vld [vmem:[%s7843_s9] sm:$0xff] }
  0x4b   :  { %5009 = vmatpush1.bf16.msra.mxu0 %v6644_v24  ;;  %v482_v44 = vld [vmem:[#allocation7 + $0x120] sm:$0xff]  ;;  %v499_v55 = vld [vmem:[#allocation7 + $0x1a8] sm:$0xff]  ;;  %v286_v29 = vld [vmem:[%s7843_s9 + $0x20] sm:$0xff] }
  0x4c   :  { %5011 = vmatprep.subr.bf16.mxu0 %v6656_v28  ;;  %4971 = vmatprep.subr.bf16.mxu1 %v4970_v37  ;;  %v6683_v50 = vpack.c.bf16 %v482_v44, %v478_v41  ;;  %v486_v52 = vld [vmem:[#allocation7 + $0x140] sm:$0xff]  ;;  %v6692_v57 = vpack.c.bf16 %v499_v55, %v495_v54  ;;  %v503_v60 = vld [vmem:[#allocation7 + $0x1c8] sm:$0xff]  ;;  %v4984_v32 = vpack.c.bf16 %v286_v29, %v282_v27  ;;  %v290_v34 = vld [vmem:[%s7843_s9 + $0x40] sm:$0xff] }
  0x4d   :  { %4973 = vmatpush1.bf16.msra.mxu1 %v4972_v42  ;;  %v490_v53 = vld [vmem:[#allocation7 + $0x160] sm:$0xff]  ;;  %v507_v61 = vld [vmem:[#allocation7 + $0x1e8] sm:$0xff]  ;;  %v294_v35 = vld [vmem:[%s7843_s9 + $0x60] sm:$0xff] }
  0x4e   :  { %4975 = vmatprep.subr.bf16.mxu1 %v4974_v49  ;;  %v6689_v56 = vpack.c.bf16 %v490_v53, %v486_v52  ;;  %v494_v58 = vld [vmem:[#allocation7 + $0x180] sm:$0xff]  ;;  %v6698_v63 = vpack.c.bf16 %v507_v61, %v503_v60  ;;  %v115_v6 = vld [vmem:[%s7841_s7 + $0x10] sm:$0xff]  ;;  %v285_v36 = vld [vmem:[%s7843_s9 + $0x18] sm:$0xff]  ;;  %v4988_v39 = vpack.c.bf16 %v294_v35, %v290_v34 }
  0x4f   :  { %5013 = vmatpush1.bf16.msra.mxu0 %v6671_v40  ;;  %v498_v59 = vld [vmem:[#allocation7 + $0x1a0] sm:$0xff]  ;;  %v119_v10 = vld [vmem:[%s7841_s7 + $0x30] sm:$0xff]  ;;  %v289_v37 = vld [vmem:[%s7843_s9 + $0x38] sm:$0xff] }
  0x50   :  { %5015 = vmatprep.subr.bf16.mxu0 %v6674_v43  ;;  %v6695_v62 = vpack.c.bf16 %v498_v59, %v494_v58  ;;  %v502_v0 = vld [vmem:[#allocation7 + $0x1c0] sm:$0xff]  ;;  %v4976_v15 = vpack.c.bf16 %v119_v10, %v115_v6  ;;  %v123_v19 = vld [vmem:[%s7841_s7 + $0x50] sm:$0xff]  ;;  %v4990_v41 = vpack.c.bf16 %v289_v37, %v285_v36  ;;  %v293_v45 = vld [vmem:[%s7843_s9 + $0x58] sm:$0xff] }
  0x51   :  { %v506_v1 = vld [vmem:[#allocation7 + $0x1e0] sm:$0xff]  ;;  %v127_v20 = vld [vmem:[%s7841_s7 + $0x70] sm:$0xff]  ;;  %v297_v46 = vld [vmem:[%s7843_s9 + $0x78] sm:$0xff] }
  0x52   :  { %v6701_v2 = vpack.c.bf16 %v506_v1, %v502_v0  ;;  %v283_v22 = vld [vmem:[%s7843_s9 + $0x8] sm:$0xff]  ;;  %v4980_v25 = vpack.c.bf16 %v127_v20, %v123_v19  ;;  %v284_v42 = vld [vmem:[%s7843_s9 + $0x10] sm:$0xff]  ;;  %v4994_v48 = vpack.c.bf16 %v297_v46, %v293_v45  ;;  %v449_v54 = vld [vmem:[#allocation7 + $0x18] sm:$0xff] }
  0x53   :  { %5017 = vmatpush1.bf16.msra.mxu0 %v6683_v50  ;;  %v287_v23 = vld [vmem:[%s7843_s9 + $0x28] sm:$0xff]  ;;  %v288_v44 = vld [vmem:[%s7843_s9 + $0x30] sm:$0xff]  ;;  %v453_v55 = vld [vmem:[#allocation7 + $0x38] sm:$0xff] }
  0x54   :  { %5019 = vmatprep.subr.bf16.mxu0 %v6686_v51  ;;  %v4982_v26 = vpack.c.bf16 %v287_v23, %v283_v22  ;;  %v291_v30 = vld [vmem:[%s7843_s9 + $0x48] sm:$0xff]  ;;  %v4992_v47 = vpack.c.bf16 %v288_v44, %v284_v42  ;;  %v292_v49 = vld [vmem:[%s7843_s9 + $0x50] sm:$0xff]  ;;  %v6807_v59 = vpack.c.bf16 %v453_v55, %v449_v54  ;;  %v448_v60 = vld [vmem:[#allocation7 + $0x10] sm:$0xff] }
  0x55   :  { %v295_v31 = vld [vmem:[%s7843_s9 + $0x68] sm:$0xff]  ;;  %v296_v52 = vld [vmem:[%s7843_s9 + $0x70] sm:$0xff]  ;;  %v452_v61 = vld [vmem:[#allocation7 + $0x30] sm:$0xff] }
  0x56   :  { %v4986_v33 = vpack.c.bf16 %v295_v31, %v291_v30  ;;  %v4996_v58 = vpack.c.bf16 %v296_v52, %v292_v49  ;;  %v457_v0 = vld [vmem:[#allocation7 + $0x58] sm:$0xff]  ;;  %v6809_v4 = vpack.c.bf16 %v452_v61, %v448_v60  ;;  %v456_v10 = vld [vmem:[#allocation7 + $0x50] sm:$0xff] }
  0x57   :  { %5021 = vmatpush1.bf16.msra.mxu0 %v6689_v56  ;;  %v461_v1 = vld [vmem:[#allocation7 + $0x78] sm:$0xff]  ;;  %v460_v11 = vld [vmem:[#allocation7 + $0x70] sm:$0xff] }
  0x58   :  { %5023 = vmatprep.subr.bf16.mxu0 %v6692_v57  ;;  %v6812_v6 = vpack.c.bf16 %v461_v1, %v457_v0  ;;  %v465_v12 = vld [vmem:[#allocation7 + $0x98] sm:$0xff]  ;;  %v464_v19 = vld [vmem:[#allocation7 + $0x90] sm:$0xff] }
  0x59   :  { %v468_v20 = vld [vmem:[#allocation7 + $0xb0] sm:$0xff]  ;;  %v477_v22 = vld [vmem:[#allocation7 + $0xf8] sm:$0xff] }
  0x5a   :  { %v6823_v23 = vpack.c.bf16 %v468_v20, %v464_v19  ;;  %v476_v27 = vld [vmem:[#allocation7 + $0xf0] sm:$0xff]  ;;  %v481_v29 = vld [vmem:[#allocation7 + $0x118] sm:$0xff] }
  0x5b   :  { %5025 = vmatpush1.bf16.msra.mxu0 %v6695_v62  ;;  %v485_v30 = vld [vmem:[#allocation7 + $0x138] sm:$0xff]  ;;  %v484_v34 = vld [vmem:[#allocation7 + $0x130] sm:$0xff] }
  0x5c   :  { %5027 = vmatprep.subr.bf16.mxu0 %v6698_v63  ;;  %v489_v35 = vld [vmem:[#allocation7 + $0x158] sm:$0xff]  ;;  %v504_v55 = vld [vmem:[#allocation7 + $0x1d0] sm:$0xff] }
  0x5d   :  { %v493_v36 = vld [vmem:[#allocation7 + $0x178] sm:$0xff] }
  0x5e   :  { %v497_v42 = vld [vmem:[#allocation7 + $0x198] sm:$0xff] }
  0x5f   :  { %5029 = vmatpush1.bf16.msra.mxu0 %v6701_v2  ;;  %v501_v44 = vld [vmem:[#allocation7 + $0x1b8] sm:$0xff] }
  0x60   :  { %5063 = vmatprep.subr.bf16.mxu0 %v6626_v8  ;;  %v6844_v46 = vpack.c.bf16 %v501_v44, %v497_v42  ;;  %v505_v49 = vld [vmem:[#allocation7 + $0x1d8] sm:$0xff] }
  0x61   :  { %v509_v52 = vld [vmem:[#allocation7 + $0x1f8] sm:$0xff] }
  0x62   :  { %575 = vmatmul.mubr.f32.vlgmr.msra.gmra.mrb[0].mxu0 %v6708_v3  ;;  %v6850_v54 = vpack.c.bf16 %v509_v52, %v505_v49 }
  0x63   :  { %5065 = vmatpush1.bf16.msra.mxu0 %v6628_v9  ;;  %744 = vmatprep.mubr.f32.mxu0 %v6468_v7 }
  0x64   :  { %5067 = vmatprep.subr.bf16.mxu0 %v6631_v13 }
  0x67   :  { %5069 = vmatpush1.bf16.msra.mxu0 %v6635_v17 }
  0x68   :  { %5071 = vmatprep.subr.bf16.mxu0 %v6638_v18 }
  0x6b   :  { %5073 = vmatpush1.bf16.msra.mxu0 %v6644_v24 }
  0x6c   :  { %5075 = vmatprep.subr.bf16.mxu0 %v6656_v28 }
  0x6f   :  { %5077 = vmatpush1.bf16.msra.mxu0 %v6671_v40 }
  0x70   :  { %5079 = vmatprep.subr.bf16.mxu0 %v6674_v43 }
  0x73   :  { %5081 = vmatpush1.bf16.msra.mxu0 %v6683_v50 }
  0x74   :  { %5083 = vmatprep.subr.bf16.mxu0 %v6686_v51 }
  0x77   :  { %5085 = vmatpush1.bf16.msra.mxu0 %v6689_v56 }
  0x78   :  { %5087 = vmatprep.subr.bf16.mxu0 %v6692_v57 }
  0x7b   :  { %5089 = vmatpush1.bf16.msra.mxu0 %v6695_v62 }
  0x7c   :  { %5091 = vmatprep.subr.bf16.mxu0 %v6698_v63 }
  0x7f   :  { %5093 = vmatpush1.bf16.msra.mxu0 %v6701_v2 }
  0x80   :  { %5127 = vmatprep.subr.bf16.mxu0 %v6626_v8 }
  0xc4   :  { %v109_v14 = vpop.permute.xlu0 %108 }
  0xc5   :  { %vm110_vm1 = vcmp.eq.s32.totalorder %v6729_v5, %v109_v14  ;;  %v469_v14 = vld [vmem:[#allocation7 + $0xb8] sm:$0xff] }
  0xc6   :  { %v4716_v21 = vsel %vm110_vm1, 1.0, %v6468_v7 }
  0xc7   :  { %4717 = vmatmul.mubr.msk.f32.vlgmr.msra.gmra.mrb[0].mxu1 %vm129_vm0, %v4716_v21 }
  0xc8   :  { %4977 = vmatpush1.bf16.msra.mxu1 %v4976_v15  ;;  %268 = vmatprep.mubr.f32.mxu1 %v6468_v7  ;;  %v278_v38 = vpop.permute.xlu0 %277  ;;  %v6816_v15 = vpack.c.bf16 %v460_v11, %v456_v10 }
  0xc9   :  { %4979 = vmatprep.subr.bf16.mxu1 %v4978_v16  ;;  %vm279_vm2 = vcmp.eq.s32.totalorder %v6729_v5, %v278_v38  ;;  %v6820_v16 = vpack.c.bf16 %v469_v14, %v465_v12  ;;  %v6838_v38 = vpack.c.bf16 %v493_v36, %v489_v35 }
  0xca   :  { %v4719_v53 = vsel %vm279_vm2, 1.0, %v6468_v7 }
  0xcc   :  { %4981 = vmatpush1.bf16.msra.mxu1 %v4980_v25 }
  0xcd   :  { %4983 = vmatprep.subr.bf16.mxu1 %v4982_v26  ;;  %v472_v26 = vld [vmem:[#allocation7 + $0xd0] sm:$0xff] }
  0xce   :  { %v6829_v31 = vpack.c.bf16 %v476_v27, %v472_v26 }
  0xcf   :  { %4718 = vmatmul.mubr.msk.f32.vlgmr.msra.gmra.mrb[2].mxu1 %vm129_vm0, %v4716_v21  ;;  %v473_v21 = vld [vmem:[#allocation7 + $0xd8] sm:$0xff] }
  0xd0   :  { %4985 = vmatpush1.bf16.msra.mxu1 %v4984_v32  ;;  %365 = vmatprep.mubr.f32.mxu1 %v6468_v7  ;;  %v6826_v25 = vpack.c.bf16 %v477_v22, %v473_v21  ;;  %v6832_v32 = vpack.c.bf16 %v485_v30, %v481_v29 }
  0xd1   :  { %4987 = vmatprep.subr.bf16.mxu1 %v4986_v33  ;;  %v480_v33 = vld [vmem:[#allocation7 + $0x110] sm:$0xff] }
  0xd2   :  { %v6835_v37 = vpack.c.bf16 %v484_v34, %v480_v33 }
  0xd4   :  { %4989 = vmatpush1.bf16.msra.mxu1 %v4988_v39  ;;  %v488_v39 = vld [vmem:[#allocation7 + $0x150] sm:$0xff] }
  0xd5   :  { %4991 = vmatprep.subr.bf16.mxu1 %v4990_v41  ;;  %v492_v41 = vld [vmem:[#allocation7 + $0x170] sm:$0xff] }
  0xd6   :  { %v6841_v45 = vpack.c.bf16 %v492_v41, %v488_v39 }
  0xd7   :  { %4720 = vmatmul.mubr.msk.f32.vlgmr.msra.gmra.mrb[4].mxu1 %vm129_vm0, %v4719_v53 }
  0xd8   :  { %4993 = vmatpush1.bf16.msra.mxu1 %v4992_v47  ;;  %436 = vmatprep.mubr.f32.mxu1 %v6468_v7  ;;  %v496_v47 = vld [vmem:[#allocation7 + $0x190] sm:$0xff] }
  0xd9   :  { %4995 = vmatprep.subr.bf16.mxu1 %v4994_v48  ;;  %v500_v48 = vld [vmem:[#allocation7 + $0x1b0] sm:$0xff] }
  0xdc   :  { %4997 = vmatpush1.bf16.msra.mxu1 %v4996_v58  ;;  %v508_v58 = vld [vmem:[#allocation7 + $0x1f0] sm:$0xff] }
  0xdd   :  { %5031 = vmatprep.subr.bf16.mxu1 %v6807_v59  ;;  %v6853_v60 = vpack.c.bf16 %v508_v58, %v504_v55 }
  0xdf   :  { %4721 = vmatmul.mubr.msk.f32.vlgmr.msra.gmra.mrb[6].mxu1 %vm129_vm0, %v4719_v53  ;;  %v6847_v53 = vpack.c.bf16 %v500_v48, %v496_v47 }
  0xe0   :  { %5033 = vmatpush1.bf16.msra.mxu1 %v6809_v4  ;;  %645 = vmatprep.mubr.f32.mxu1 %v6468_v7 }
  0xe1   :  { %5035 = vmatprep.subr.bf16.mxu1 %v6812_v6 }
  0xe4   :  { %5037 = vmatpush1.bf16.msra.mxu1 %v6816_v15 }
  0xe5   :  { %5039 = vmatprep.subr.bf16.mxu1 %v6820_v16 }
  0xe8   :  { %5041 = vmatpush1.bf16.msra.mxu1 %v6823_v23 }
  0xe9   :  { %5043 = vmatprep.subr.bf16.mxu1 %v6826_v25 }
  0xec   :  { %5045 = vmatpush1.bf16.msra.mxu1 %v6829_v31 }
  0xed   :  { %5047 = vmatprep.subr.bf16.mxu1 %v6832_v32 }
  0xf0   :  { %5049 = vmatpush1.bf16.msra.mxu1 %v6835_v37 }
  0xf1   :  { %5051 = vmatprep.subr.bf16.mxu1 %v6838_v38 }
  0xf4   :  { %5053 = vmatpush1.bf16.msra.mxu1 %v6841_v45 }
  0xf5   :  { %5055 = vmatprep.subr.bf16.mxu1 %v6844_v46 }
  0xf8   :  { %5057 = vmatpush1.bf16.msra.mxu1 %v6847_v53 }
  0xf9   :  { %5059 = vmatprep.subr.bf16.mxu1 %v6850_v54 }
  0xfc   :  { %5061 = vmatpush1.bf16.msra.mxu1 %v6853_v60 }
  0xfd   :  { %5095 = vmatprep.subr.bf16.mxu1 %v6807_v59 }
  0xff   :  { %646 = vmatmul.mubr.f32.vlgmr.msra.gmra.mrb[8].mxu1 %v6708_v3 }
 0x100   :  { %5097 = vmatpush1.bf16.msra.mxu1 %v6809_v4  ;;  %815 = vmatprep.mubr.f32.mxu1 %v6468_v7 }
 0x101   :  { %5099 = vmatprep.subr.bf16.mxu1 %v6812_v6 }
 0x104   :  { %5101 = vmatpush1.bf16.msra.mxu1 %v6816_v15 }
 0x105   :  { %5103 = vmatprep.subr.bf16.mxu1 %v6820_v16 }
 0x108   :  { %5105 = vmatpush1.bf16.msra.mxu1 %v6823_v23 }
 0x109   :  { %5107 = vmatprep.subr.bf16.mxu1 %v6826_v25 }
 0x10c   :  { %5109 = vmatpush1.bf16.msra.mxu1 %v6829_v31 }
 0x10d   :  { %5111 = vmatprep.subr.bf16.mxu1 %v6832_v32 }
 0x110   :  { %5113 = vmatpush1.bf16.msra.mxu1 %v6835_v37 }
 0x111   :  { %5115 = vmatprep.subr.bf16.mxu1 %v6838_v38 }
 0x114   :  { %5117 = vmatpush1.bf16.msra.mxu1 %v6841_v45 }
 0x115   :  { %5119 = vmatprep.subr.bf16.mxu1 %v6844_v46 }
 0x118   :  { %5121 = vmatpush1.bf16.msra.mxu1 %v6847_v53 }
 0x119   :  { %5123 = vmatprep.subr.bf16.mxu1 %v6850_v54 }
 0x11c   :  { %5125 = vmatpush1.bf16.msra.mxu1 %v6853_v60 }
 0x11d   :  { %5159 = vmatprep.subr.bf16.mxu1 %v6807_v59 }
 0x135   :  { %v576_v61 = vpop.f32.mrb[0].mxu0 }
 0x136   :  { %v578_v0 = vpop.f32.mrb[1].mxu0 }
 0x19a   :  { %v6876_v1 = vpop.f32.mrb[0].mxu1 }
 0x19b   :  { %v652_v10 = vadd.f32 %v576_v61, %v6876_v1  ;;  %v6879_v11 = vpop.f32.mrb[1].mxu1 }
 0x19c   :  { %v653_v12 = vadd.f32 %v578_v0, %v6879_v11 }
 0x19d   :  { %v4722_v29 = vmul.f32 -1.442695, %v652_v10 }
 0x19e   :  { %v4723_v27 = vmul.f32 -1.442695, %v653_v12 }
 0x1a0   :  { %6122 = vpow2.f32 %v4723_v27 }
 0x1a1   :  { %6124 = vpow2.f32 %v4722_v29 }
 0x1a2   :  { %v6882_v14 = vpop.f32.mrb[2].mxu1 }
 0x1a3   :  { %v6884_v19 = vpop.f32.mrb[3].mxu1 }
 0x1aa   :  { %v6886_v20 = vpop.f32.mrb[4].mxu1  ;;  %v6123_v30 = vpop.eup %6122 }
 0x1ab   :  { %v6888_v21 = vpop.f32.mrb[5].mxu1  ;;  %v6125_v33 = vpop.eup %6124  ;;  %v665_v34 = vadd.f32 1.0, %v6123_v30 }
 0x1ac   :  { %v659_v35 = vadd.f32 1.0, %v6125_v33 }
 0x1ad   :  { %6126 = vrcp.f32 %v665_v34 }
 0x1ae   :  { %6128 = vrcp.f32 %v659_v35 }
 0x1b2   :  { %v6890_v22 = vpop.f32.mrb[6].mxu1 }
 0x1b3   :  { %v6892_v26 = vpop.f32.mrb[7].mxu1 }
 0x1b7   :  { %v6127_v47 = vpop.eup %6126 }
 0x1b8   :  { %v6129_v48 = vpop.eup %6128  ;;  %v675_v52 = vmul.f32 %v6127_v47, %v6708_v3 }
 0x1d2   :  { %v647_v36 = vpop.f32.mrb[8].mxu1 }
 0x1d3   :  { %v654_v39 = vadd.f32 %v647_v36, %v6882_v14  ;;  %v649_v41 = vpop.f32.mrb[9].mxu1 }
 0x1d4   :  { %v655_v42 = vadd.f32 %v649_v41, %v6884_v19 }
 0x1d5   :  { %6130 = vtanh.f32 %v654_v39 }
 0x1d6   :  { %v4724_v44 = vmul.f32 -1.442695, %v655_v42 }
 0x1d8   :  { %6132 = vpow2.f32 %v4724_v44 }
 0x1df   :  { %v6131_v49 = vpop.eup %6130 }
 0x1e0   :  { %v676_v55 = vmul.f32 %v6131_v49, %v6129_v48 }
 0x1e2   :  { %v6133_v58 = vpop.eup %6132  ;;  %v6897_v61 = vadd.f32 %v676_v55, %v675_v52 }
 0x1e3   :  { %v672_v0 = vadd.f32 1.0, %v6133_v58 }
 0x1e4   :  { %6134 = vtanh.f32 %v6897_v61 }
 0x1e5   :  { %6136 = vrcp.f32 %v672_v0 }
 0x1ee   :  { %v6135_v10 = vpop.eup %6134 }
 0x1ef   :  { %v6137_v12 = vpop.eup %6136 }
 0x1f0   :  { %v679_v27 = vmul.f32 %v6137_v12, %v6135_v10 }
 0x1f2   :  { %745 = vmatmul.mubr.f32.vlgmr.msra.gmra.mrb[2].mxu0 %v679_v27  ;;  %816 = vmatmul.mubr.f32.vlgmr.msra.gmra.mrb[10].mxu1 %v679_v27 }
 0x1f3   :  { %5129 = vmatpush1.bf16.msra.mxu0 %v6628_v9  ;;  %5161 = vmatpush1.bf16.msra.mxu1 %v6809_v4 }
 0x1f4   :  { %5131 = vmatprep.subr.bf16.mxu0 %v6631_v13  ;;  %5163 = vmatprep.subr.bf16.mxu1 %v6812_v6 }
 0x1f5   :  { %932 = vmatprep.mubr.f32.mxu0 %v6468_v7  ;;  %1003 = vmatprep.mubr.f32.mxu1 %v6468_v7 }
 0x1f7   :  { %5133 = vmatpush1.bf16.msra.mxu0 %v6635_v17  ;;  %5165 = vmatpush1.bf16.msra.mxu1 %v6816_v15 }
 0x1f8   :  { %5135 = vmatprep.subr.bf16.mxu0 %v6638_v18  ;;  %5167 = vmatprep.subr.bf16.mxu1 %v6820_v16 }
 0x1fb   :  { %5137 = vmatpush1.bf16.msra.mxu0 %v6644_v24  ;;  %5169 = vmatpush1.bf16.msra.mxu1 %v6823_v23 }
 0x1fc   :  { %5139 = vmatprep.subr.bf16.mxu0 %v6656_v28  ;;  %5171 = vmatprep.subr.bf16.mxu1 %v6826_v25 }
 0x1ff   :  { %5141 = vmatpush1.bf16.msra.mxu0 %v6671_v40  ;;  %5173 = vmatpush1.bf16.msra.mxu1 %v6829_v31 }
 0x200   :  { %5143 = vmatprep.subr.bf16.mxu0 %v6674_v43  ;;  %5175 = vmatprep.subr.bf16.mxu1 %v6832_v32 }
 0x203   :  { %5145 = vmatpush1.bf16.msra.mxu0 %v6683_v50  ;;  %5177 = vmatpush1.bf16.msra.mxu1 %v6835_v37 }
 0x204   :  { %5147 = vmatprep.subr.bf16.mxu0 %v6686_v51  ;;  %5179 = vmatprep.subr.bf16.mxu1 %v6838_v38 }
 0x207   :  { %5149 = vmatpush1.bf16.msra.mxu0 %v6689_v56  ;;  %5181 = vmatpush1.bf16.msra.mxu1 %v6841_v45 }
 0x208   :  { %5151 = vmatprep.subr.bf16.mxu0 %v6692_v57  ;;  %5183 = vmatprep.subr.bf16.mxu1 %v6844_v46 }
 0x20b   :  { %5153 = vmatpush1.bf16.msra.mxu0 %v6695_v62  ;;  %5185 = vmatpush1.bf16.msra.mxu1 %v6847_v53 }
 0x20c   :  { %5155 = vmatprep.subr.bf16.mxu0 %v6698_v63  ;;  %5187 = vmatprep.subr.bf16.mxu1 %v6850_v54 }
 0x20f   :  { %5157 = vmatpush1.bf16.msra.mxu0 %v6701_v2  ;;  %5189 = vmatpush1.bf16.msra.mxu1 %v6853_v60 }
 0x210   :  { %5191 = vmatprep.subr.bf16.mxu0 %v6626_v8  ;;  %5223 = vmatprep.subr.bf16.mxu1 %v6807_v59 }
 0x2c5   :  { %v746_v3 = vpop.f32.mrb[2].mxu0  ;;  %v817_v29 = vpop.f32.mrb[10].mxu1 }
 0x2c6   :  { %v826_v30 = vrot.slane %v746_v3, 7  ;;  %v828_v33 = vrot.slane %v817_v29, 7  ;;  %v748_v34 = vpop.f32.mrb[3].mxu0  ;;  %v819_v35 = vpop.f32.mrb[11].mxu1  ;;  %v858_v29 = vrot.slane %v6897_v61, 7 }
 0x2c7   :  { %v827_v36 = vrot.slane %v748_v34, 7  ;;  %v829_v39 = vrot.slane %v819_v35, 7 }
 0x2c8   :  { %v834_v41 = vadd.f32 %v826_v30, %v6876_v1  ;;  %v836_v42 = vadd.f32 %v828_v33, %v6882_v14 }
 0x2c9   :  { %v835_v44 = vadd.f32 %v827_v36, %v6879_v11  ;;  %v837_v47 = vadd.f32 %v829_v39, %v6884_v19 }
 0x2ca   :  { %v4725_v48 = vmul.f32 -1.442695, %v834_v41 }
 0x2cb   :  { %v4726_v49 = vmul.f32 -1.442695, %v835_v44  ;;  %v4727_v52 = vmul.f32 -1.442695, %v837_v47 }
 0x2cc   :  { %6138 = vpow2.f32 %v4725_v48 }
 0x2cd   :  { %6140 = vpow2.f32 %v4726_v49 }
 0x2ce   :  { %6142 = vpow2.f32 %v4727_v52 }
 0x2cf   :  { %6144 = vtanh.f32 %v836_v42 }
 0x2d6   :  { %v6139_v55 = vpop.eup %6138 }
 0x2d7   :  { %v6141_v58 = vpop.eup %6140  ;;  %v841_v0 = vadd.f32 1.0, %v6139_v55 }
 0x2d8   :  { %v847_v10 = vadd.f32 1.0, %v6141_v58  ;;  %v6143_v12 = vpop.eup %6142 }
 0x2d9   :  { %6146 = vrcp.f32 %v841_v0  ;;  %v6145_v27 = vpop.eup %6144  ;;  %v854_v34 = vadd.f32 1.0, %v6143_v12 }
 0x2da   :  { %6148 = vrcp.f32 %v847_v10 }
 0x2db   :  { %6150 = vrcp.f32 %v854_v34 }
 0x2e3   :  { %v6147_v3 = vpop.eup %6146 }
 0x2e4   :  { %v6149_v30 = vpop.eup %6148  ;;  %v861_v33 = vmul.f32 %v6147_v3, %v6145_v27 }
 0x2e5   :  { %v860_v35 = vmul.f32 %v6149_v30, %v858_v29  ;;  %v6151_v39 = vpop.eup %6150 }
 0x2e7   :  { %v6939_v36 = vadd.f32 %v861_v33, %v860_v35 }
 0x2e9   :  { %6152 = vtanh.f32 %v6939_v36 }
 0x2f3   :  { %v6153_v41 = vpop.eup %6152 }
 0x2f4   :  { %v864_v42 = vmul.f32 %v6153_v41, %v6151_v39 }
 0x2f6   :  { %v866_v44 = vrot.slane %v864_v42, 1 }
 0x2f8   :  { %933 = vmatmul.mubr.f32.vlgmr.msra.gmra.mrb[4].mxu0 %v866_v44  ;;  %1004 = vmatmul.mubr.f32.vlgmr.msra.gmra.mrb[12].mxu1 %v866_v44 }
 0x2f9   :  { %5193 = vmatpush1.bf16.msra.mxu0 %v6628_v9  ;;  %5225 = vmatpush1.bf16.msra.mxu1 %v6809_v4 }
 0x2fa   :  { %5195 = vmatprep.subr.bf16.mxu0 %v6631_v13  ;;  %5227 = vmatprep.subr.bf16.mxu1 %v6812_v6 }
 0x2fb   :  { %1120 = vmatprep.mubr.f32.mxu0 %v6468_v7  ;;  %1191 = vmatprep.mubr.f32.mxu1 %v6468_v7 }
 0x2fd   :  { %5197 = vmatpush1.bf16.msra.mxu0 %v6635_v17  ;;  %5229 = vmatpush1.bf16.msra.mxu1 %v6816_v15 }
 0x2fe   :  { %5199 = vmatprep.subr.bf16.mxu0 %v6638_v18  ;;  %5231 = vmatprep.subr.bf16.mxu1 %v6820_v16 }
 0x301   :  { %5201 = vmatpush1.bf16.msra.mxu0 %v6644_v24  ;;  %5233 = vmatpush1.bf16.msra.mxu1 %v6823_v23 }
 0x302   :  { %5203 = vmatprep.subr.bf16.mxu0 %v6656_v28  ;;  %5235 = vmatprep.subr.bf16.mxu1 %v6826_v25 }
 0x305   :  { %5205 = vmatpush1.bf16.msra.mxu0 %v6671_v40  ;;  %5237 = vmatpush1.bf16.msra.mxu1 %v6829_v31 }
 0x306   :  { %5207 = vmatprep.subr.bf16.mxu0 %v6674_v43  ;;  %5239 = vmatprep.subr.bf16.mxu1 %v6832_v32 }
 0x309   :  { %5209 = vmatpush1.bf16.msra.mxu0 %v6683_v50  ;;  %5241 = vmatpush1.bf16.msra.mxu1 %v6835_v37 }
 0x30a   :  { %5211 = vmatprep.subr.bf16.mxu0 %v6686_v51  ;;  %5243 = vmatprep.subr.bf16.mxu1 %v6838_v38 }
 0x30d   :  { %5213 = vmatpush1.bf16.msra.mxu0 %v6689_v56  ;;  %5245 = vmatpush1.bf16.msra.mxu1 %v6841_v45 }
 0x30e   :  { %5215 = vmatprep.subr.bf16.mxu0 %v6692_v57  ;;  %5247 = vmatprep.subr.bf16.mxu1 %v6844_v46 }
 0x311   :  { %5217 = vmatpush1.bf16.msra.mxu0 %v6695_v62  ;;  %5249 = vmatpush1.bf16.msra.mxu1 %v6847_v53 }
 0x312   :  { %5219 = vmatprep.subr.bf16.mxu0 %v6698_v63  ;;  %5251 = vmatprep.subr.bf16.mxu1 %v6850_v54 }
 0x315   :  { %5221 = vmatpush1.bf16.msra.mxu0 %v6701_v2  ;;  %5253 = vmatpush1.bf16.msra.mxu1 %v6853_v60 }
 0x316   :  { %5255 = vmatprep.subr.bf16.mxu0 %v6626_v8  ;;  %5287 = vmatprep.subr.bf16.mxu1 %v6807_v59 }
 0x3cb   :  { %v934_v61 = vpop.f32.mrb[4].mxu0  ;;  %v1005_v47 = vpop.f32.mrb[12].mxu1 }
 0x3cc   :  { %v1014_v48 = vrot.slane %v934_v61, 6  ;;  %v1016_v49 = vrot.slane %v1005_v47, 6  ;;  %v936_v52 = vpop.f32.mrb[5].mxu0  ;;  %v1007_v55 = vpop.f32.mrb[13].mxu1  ;;  %v1046_v47 = vrot.slane %v6939_v36, 7 }
 0x3cd   :  { %v1015_v58 = vrot.slane %v936_v52, 6  ;;  %v1017_v0 = vrot.slane %v1007_v55, 6 }
 0x3ce   :  { %v1022_v10 = vadd.f32 %v1014_v48, %v6876_v1  ;;  %v1024_v12 = vadd.f32 %v1016_v49, %v6882_v14 }
 0x3cf   :  { %v1023_v27 = vadd.f32 %v1015_v58, %v6879_v11  ;;  %v1025_v3 = vadd.f32 %v1017_v0, %v6884_v19 }
 0x3d0   :  { %v4728_v29 = vmul.f32 -1.442695, %v1022_v10 }
 0x3d1   :  { %v4729_v30 = vmul.f32 -1.442695, %v1023_v27  ;;  %v4730_v33 = vmul.f32 -1.442695, %v1025_v3 }
 0x3d2   :  { %6154 = vpow2.f32 %v4728_v29 }
 0x3d3   :  { %6156 = vpow2.f32 %v4729_v30 }
 0x3d4   :  { %6158 = vpow2.f32 %v4730_v33 }
 0x3d5   :  { %6160 = vtanh.f32 %v1024_v12 }
 0x3dc   :  { %v6155_v34 = vpop.eup %6154 }
 0x3dd   :  { %v6157_v35 = vpop.eup %6156  ;;  %v1029_v39 = vadd.f32 1.0, %v6155_v34 }
 0x3de   :  { %v1035_v41 = vadd.f32 1.0, %v6157_v35  ;;  %v6159_v42 = vpop.eup %6158 }
 0x3df   :  { %6162 = vrcp.f32 %v1029_v39  ;;  %v6161_v44 = vpop.eup %6160  ;;  %v1042_v52 = vadd.f32 1.0, %v6159_v42 }
 0x3e0   :  { %6164 = vrcp.f32 %v1035_v41 }
 0x3e1   :  { %6166 = vrcp.f32 %v1042_v52 }
 0x3e9   :  { %v6163_v61 = vpop.eup %6162 }
 0x3ea   :  { %v6165_v48 = vpop.eup %6164  ;;  %v1049_v49 = vmul.f32 %v6163_v61, %v6161_v44 }
 0x3eb   :  { %v1048_v55 = vmul.f32 %v6165_v48, %v1046_v47  ;;  %v6167_v0 = vpop.eup %6166 }
 0x3ed   :  { %v6981_v58 = vadd.f32 %v1049_v49, %v1048_v55 }
 0x3ef   :  { %6168 = vtanh.f32 %v6981_v58 }
 0x3f9   :  { %v6169_v10 = vpop.eup %6168 }
 0x3fa   :  { %v1052_v12 = vmul.f32 %v6169_v10, %v6167_v0 }
 0x3fc   :  { %v1054_v27 = vrot.slane %v1052_v12, 2 }
 0x3fe   :  { %1121 = vmatmul.mubr.f32.vlgmr.msra.gmra.mrb[6].mxu0 %v1054_v27  ;;  %1192 = vmatmul.mubr.f32.vlgmr.msra.gmra.mrb[14].mxu1 %v1054_v27 }
 0x3ff   :  { %5257 = vmatpush1.bf16.msra.mxu0 %v6628_v9  ;;  %5289 = vmatpush1.bf16.msra.mxu1 %v6809_v4 }
 0x400   :  { %5259 = vmatprep.subr.bf16.mxu0 %v6631_v13  ;;  %5291 = vmatprep.subr.bf16.mxu1 %v6812_v6 }
 0x401   :  { %1308 = vmatprep.mubr.f32.mxu0 %v6468_v7  ;;  %1379 = vmatprep.mubr.f32.mxu1 %v6468_v7 }
 0x403   :  { %5261 = vmatpush1.bf16.msra.mxu0 %v6635_v17  ;;  %5293 = vmatpush1.bf16.msra.mxu1 %v6816_v15 }
 0x404   :  { %5263 = vmatprep.subr.bf16.mxu0 %v6638_v18  ;;  %5295 = vmatprep.subr.bf16.mxu1 %v6820_v16 }
 0x407   :  { %5265 = vmatpush1.bf16.msra.mxu0 %v6644_v24  ;;  %5297 = vmatpush1.bf16.msra.mxu1 %v6823_v23 }
 0x408   :  { %5267 = vmatprep.subr.bf16.mxu0 %v6656_v28  ;;  %5299 = vmatprep.subr.bf16.mxu1 %v6826_v25 }
 0x40b   :  { %5269 = vmatpush1.bf16.msra.mxu0 %v6671_v40  ;;  %5301 = vmatpush1.bf16.msra.mxu1 %v6829_v31 }
 0x40c   :  { %5271 = vmatprep.subr.bf16.mxu0 %v6674_v43  ;;  %5303 = vmatprep.subr.bf16.mxu1 %v6832_v32 }
 0x40f   :  { %5273 = vmatpush1.bf16.msra.mxu0 %v6683_v50  ;;  %5305 = vmatpush1.bf16.msra.mxu1 %v6835_v37 }
 0x410   :  { %5275 = vmatprep.subr.bf16.mxu0 %v6686_v51  ;;  %5307 = vmatprep.subr.bf16.mxu1 %v6838_v38 }
 0x413   :  { %5277 = vmatpush1.bf16.msra.mxu0 %v6689_v56  ;;  %5309 = vmatpush1.bf16.msra.mxu1 %v6841_v45 }
 0x414   :  { %5279 = vmatprep.subr.bf16.mxu0 %v6692_v57  ;;  %5311 = vmatprep.subr.bf16.mxu1 %v6844_v46 }
 0x417   :  { %5281 = vmatpush1.bf16.msra.mxu0 %v6695_v62  ;;  %5313 = vmatpush1.bf16.msra.mxu1 %v6847_v53 }
 0x418   :  { %5283 = vmatprep.subr.bf16.mxu0 %v6698_v63  ;;  %5315 = vmatprep.subr.bf16.mxu1 %v6850_v54 }
 0x41b   :  { %5285 = vmatpush1.bf16.msra.mxu0 %v6701_v2  ;;  %5317 = vmatpush1.bf16.msra.mxu1 %v6853_v60 }
 0x41c   :  { %5319 = vmatprep.subr.bf16.mxu0 %v6626_v8  ;;  %5351 = vmatprep.subr.bf16.mxu1 %v6807_v59 }
 0x4d1   :  { %v1122_v36 = vpop.f32.mrb[6].mxu0  ;;  %v1193_v3 = vpop.f32.mrb[14].mxu1 }
 0x4d2   :  { %v1202_v29 = vrot.slane %v1122_v36, 5  ;;  %v1204_v30 = vrot.slane %v1193_v3, 5  ;;  %v1124_v33 = vpop.f32.mrb[7].mxu0  ;;  %v1195_v34 = vpop.f32.mrb[15].mxu1  ;;  %v1234_v3 = vrot.slane %v6981_v58, 7 }
 0x4d3   :  { %v1203_v35 = vrot.slane %v1124_v33, 5  ;;  %v1205_v39 = vrot.slane %v1195_v34, 5 }
 0x4d4   :  { %v1210_v41 = vadd.f32 %v1202_v29, %v6876_v1  ;;  %v1212_v42 = vadd.f32 %v1204_v30, %v6882_v14 }
 0x4d5   :  { %v1211_v44 = vadd.f32 %v1203_v35, %v6879_v11  ;;  %v1213_v61 = vadd.f32 %v1205_v39, %v6884_v19 }
 0x4d6   :  { %v4731_v47 = vmul.f32 -1.442695, %v1210_v41 }
 0x4d7   :  { %v4732_v48 = vmul.f32 -1.442695, %v1211_v44  ;;  %v4733_v49 = vmul.f32 -1.442695, %v1213_v61 }
 0x4d8   :  { %6170 = vpow2.f32 %v4731_v47 }
 0x4d9   :  { %6172 = vpow2.f32 %v4732_v48 }
 0x4da   :  { %6174 = vpow2.f32 %v4733_v49 }
 0x4db   :  { %6176 = vtanh.f32 %v1212_v42 }
 0x4e2   :  { %v6171_v52 = vpop.eup %6170 }
 0x4e3   :  { %v6173_v55 = vpop.eup %6172  ;;  %v1217_v0 = vadd.f32 1.0, %v6171_v52 }
 0x4e4   :  { %v1223_v10 = vadd.f32 1.0, %v6173_v55  ;;  %v6175_v12 = vpop.eup %6174 }
 0x4e5   :  { %6178 = vrcp.f32 %v1217_v0  ;;  %v6177_v27 = vpop.eup %6176  ;;  %v1230_v33 = vadd.f32 1.0, %v6175_v12 }
 0x4e6   :  { %6180 = vrcp.f32 %v1223_v10 }
 0x4e7   :  { %6182 = vrcp.f32 %v1230_v33 }
 0x4ef   :  { %v6179_v36 = vpop.eup %6178 }
 0x4f0   :  { %v6181_v29 = vpop.eup %6180  ;;  %v1237_v30 = vmul.f32 %v6179_v36, %v6177_v27 }
 0x4f1   :  { %v1236_v34 = vmul.f32 %v6181_v29, %v1234_v3  ;;  %v6183_v39 = vpop.eup %6182 }
 0x4f3   :  { %v7023_v35 = vadd.f32 %v1237_v30, %v1236_v34 }
 0x4f5   :  { %6184 = vtanh.f32 %v7023_v35 }
 0x4ff   :  { %v6185_v41 = vpop.eup %6184 }
 0x500   :  { %v1240_v42 = vmul.f32 %v6185_v41, %v6183_v39 }
 0x502   :  { %v1242_v44 = vrot.slane %v1240_v42, 3 }
 0x504   :  { %1309 = vmatmul.mubr.f32.vlgmr.msra.gmra.mrb[8].mxu0 %v1242_v44  ;;  %1380 = vmatmul.mubr.f32.vlgmr.msra.gmra.mrb[16].mxu1 %v1242_v44 }
 0x505   :  { %5321 = vmatpush1.bf16.msra.mxu0 %v6628_v9  ;;  %5353 = vmatpush1.bf16.msra.mxu1 %v6809_v4 }
 0x506   :  { %5323 = vmatprep.subr.bf16.mxu0 %v6631_v13  ;;  %5355 = vmatprep.subr.bf16.mxu1 %v6812_v6 }
 0x507   :  { %1496 = vmatprep.mubr.f32.mxu0 %v6468_v7  ;;  %1567 = vmatprep.mubr.f32.mxu1 %v6468_v7 }
 0x509   :  { %5325 = vmatpush1.bf16.msra.mxu0 %v6635_v17  ;;  %5357 = vmatpush1.bf16.msra.mxu1 %v6816_v15 }
 0x50a   :  { %5327 = vmatprep.subr.bf16.mxu0 %v6638_v18  ;;  %5359 = vmatprep.subr.bf16.mxu1 %v6820_v16 }
 0x50d   :  { %5329 = vmatpush1.bf16.msra.mxu0 %v6644_v24  ;;  %5361 = vmatpush1.bf16.msra.mxu1 %v6823_v23 }
 0x50e   :  { %5331 = vmatprep.subr.bf16.mxu0 %v6656_v28  ;;  %5363 = vmatprep.subr.bf16.mxu1 %v6826_v25 }
 0x511   :  { %5333 = vmatpush1.bf16.msra.mxu0 %v6671_v40  ;;  %5365 = vmatpush1.bf16.msra.mxu1 %v6829_v31 }
 0x512   :  { %5335 = vmatprep.subr.bf16.mxu0 %v6674_v43  ;;  %5367 = vmatprep.subr.bf16.mxu1 %v6832_v32 }
 0x515   :  { %5337 = vmatpush1.bf16.msra.mxu0 %v6683_v50  ;;  %5369 = vmatpush1.bf16.msra.mxu1 %v6835_v37 }
 0x516   :  { %5339 = vmatprep.subr.bf16.mxu0 %v6686_v51  ;;  %5371 = vmatprep.subr.bf16.mxu1 %v6838_v38 }
 0x519   :  { %5341 = vmatpush1.bf16.msra.mxu0 %v6689_v56  ;;  %5373 = vmatpush1.bf16.msra.mxu1 %v6841_v45 }
 0x51a   :  { %5343 = vmatprep.subr.bf16.mxu0 %v6692_v57  ;;  %5375 = vmatprep.subr.bf16.mxu1 %v6844_v46 }
 0x51d   :  { %5345 = vmatpush1.bf16.msra.mxu0 %v6695_v62  ;;  %5377 = vmatpush1.bf16.msra.mxu1 %v6847_v53 }
 0x51e   :  { %5347 = vmatprep.subr.bf16.mxu0 %v6698_v63  ;;  %5379 = vmatprep.subr.bf16.mxu1 %v6850_v54 }
 0x521   :  { %5349 = vmatpush1.bf16.msra.mxu0 %v6701_v2  ;;  %5381 = vmatpush1.bf16.msra.mxu1 %v6853_v60 }
 0x522   :  { %5383 = vmatprep.subr.bf16.mxu0 %v6626_v8  ;;  %5415 = vmatprep.subr.bf16.mxu1 %v6807_v59 }
 0x5d7   :  { %v1310_v58 = vpop.f32.mrb[8].mxu0  ;;  %v1381_v61 = vpop.f32.mrb[16].mxu1 }
 0x5d8   :  { %v1390_v47 = vrot.slane %v1310_v58, 4  ;;  %v1392_v48 = vrot.slane %v1381_v61, 4  ;;  %v1312_v49 = vpop.f32.mrb[9].mxu0  ;;  %v1383_v52 = vpop.f32.mrb[17].mxu1  ;;  %v1422_v61 = vrot.slane %v7023_v35, 7 }
 0x5d9   :  { %v1391_v55 = vrot.slane %v1312_v49, 4  ;;  %v1393_v0 = vrot.slane %v1383_v52, 4 }
 0x5da   :  { %v1398_v10 = vadd.f32 %v1390_v47, %v6876_v1  ;;  %v1400_v12 = vadd.f32 %v1392_v48, %v6882_v14 }
 0x5db   :  { %v1399_v27 = vadd.f32 %v1391_v55, %v6879_v11  ;;  %v1401_v36 = vadd.f32 %v1393_v0, %v6884_v19 }
 0x5dc   :  { %v4734_v3 = vmul.f32 -1.442695, %v1398_v10 }
 0x5dd   :  { %v4735_v29 = vmul.f32 -1.442695, %v1399_v27  ;;  %v4736_v30 = vmul.f32 -1.442695, %v1401_v36 }
 0x5de   :  { %6186 = vpow2.f32 %v4734_v3 }
 0x5df   :  { %6188 = vpow2.f32 %v4735_v29 }
 0x5e0   :  { %6190 = vpow2.f32 %v4736_v30 }
 0x5e1   :  { %6192 = vtanh.f32 %v1400_v12 }
 0x5e8   :  { %v6187_v33 = vpop.eup %6186 }
 0x5e9   :  { %v6189_v34 = vpop.eup %6188  ;;  %v1405_v39 = vadd.f32 1.0, %v6187_v33 }
 0x5ea   :  { %v1411_v41 = vadd.f32 1.0, %v6189_v34  ;;  %v6191_v42 = vpop.eup %6190 }
 0x5eb   :  { %6194 = vrcp.f32 %v1405_v39  ;;  %v6193_v44 = vpop.eup %6192  ;;  %v1418_v49 = vadd.f32 1.0, %v6191_v42 }
 0x5ec   :  { %6196 = vrcp.f32 %v1411_v41 }
 0x5ed   :  { %6198 = vrcp.f32 %v1418_v49 }
 0x5f5   :  { %v6195_v58 = vpop.eup %6194 }
 0x5f6   :  { %v6197_v47 = vpop.eup %6196  ;;  %v1425_v48 = vmul.f32 %v6195_v58, %v6193_v44 }
 0x5f7   :  { %v1424_v52 = vmul.f32 %v6197_v47, %v1422_v61  ;;  %v6199_v0 = vpop.eup %6198 }
 0x5f9   :  { %v7065_v55 = vadd.f32 %v1425_v48, %v1424_v52 }
 0x5fb   :  { %6200 = vtanh.f32 %v7065_v55 }
 0x605   :  { %v6201_v10 = vpop.eup %6200 }
 0x606   :  { %v1428_v12 = vmul.f32 %v6201_v10, %v6199_v0 }
 0x608   :  { %v1430_v27 = vrot.slane %v1428_v12, 4 }
 0x60a   :  { %1497 = vmatmul.mubr.f32.vlgmr.msra.gmra.mrb[10].mxu0 %v1430_v27  ;;  %1568 = vmatmul.mubr.f32.vlgmr.msra.gmra.mrb[18].mxu1 %v1430_v27  ;;  %v1610_v27 = vrot.slane %v7065_v55, 7 }
 0x60b   :  { %5385 = vmatpush1.bf16.msra.mxu0 %v6628_v9  ;;  %5417 = vmatpush1.bf16.msra.mxu1 %v6809_v4 }
 0x60c   :  { %5387 = vmatprep.subr.bf16.mxu0 %v6631_v13  ;;  %5419 = vmatprep.subr.bf16.mxu1 %v6812_v6 }
 0x60d   :  { %1684 = vmatprep.mubr.f32.mxu0 %v6468_v7  ;;  %1755 = vmatprep.mubr.f32.mxu1 %v6468_v7 }
 0x60f   :  { %5389 = vmatpush1.bf16.msra.mxu0 %v6635_v17  ;;  %5421 = vmatpush1.bf16.msra.mxu1 %v6816_v15 }
 0x610   :  { %5391 = vmatprep.subr.bf16.mxu0 %v6638_v18  ;;  %5423 = vmatprep.subr.bf16.mxu1 %v6820_v16 }
 0x613   :  { %5393 = vmatpush1.bf16.msra.mxu0 %v6644_v24  ;;  %5425 = vmatpush1.bf16.msra.mxu1 %v6823_v23 }
 0x614   :  { %5395 = vmatprep.subr.bf16.mxu0 %v6656_v28  ;;  %5427 = vmatprep.subr.bf16.mxu1 %v6826_v25 }
 0x617   :  { %5397 = vmatpush1.bf16.msra.mxu0 %v6671_v40  ;;  %5429 = vmatpush1.bf16.msra.mxu1 %v6829_v31 }
 0x618   :  { %5399 = vmatprep.subr.bf16.mxu0 %v6674_v43  ;;  %5431 = vmatprep.subr.bf16.mxu1 %v6832_v32 }
 0x61b   :  { %5401 = vmatpush1.bf16.msra.mxu0 %v6683_v50  ;;  %5433 = vmatpush1.bf16.msra.mxu1 %v6835_v37 }
 0x61c   :  { %5403 = vmatprep.subr.bf16.mxu0 %v6686_v51  ;;  %5435 = vmatprep.subr.bf16.mxu1 %v6838_v38 }
 0x61f   :  { %5405 = vmatpush1.bf16.msra.mxu0 %v6689_v56  ;;  %5437 = vmatpush1.bf16.msra.mxu1 %v6841_v45 }
 0x620   :  { %5407 = vmatprep.subr.bf16.mxu0 %v6692_v57  ;;  %5439 = vmatprep.subr.bf16.mxu1 %v6844_v46 }
 0x623   :  { %5409 = vmatpush1.bf16.msra.mxu0 %v6695_v62  ;;  %5441 = vmatpush1.bf16.msra.mxu1 %v6847_v53 }
 0x624   :  { %5411 = vmatprep.subr.bf16.mxu0 %v6698_v63  ;;  %5443 = vmatprep.subr.bf16.mxu1 %v6850_v54 }
 0x627   :  { %5413 = vmatpush1.bf16.msra.mxu0 %v6701_v2  ;;  %5445 = vmatpush1.bf16.msra.mxu1 %v6853_v60 }
 0x628   :  { %5447 = vmatprep.subr.bf16.mxu0 %v6626_v8  ;;  %5479 = vmatprep.subr.bf16.mxu1 %v6807_v59 }
 0x6dd   :  { %v1498_v35 = vpop.f32.mrb[10].mxu0  ;;  %v1569_v36 = vpop.f32.mrb[18].mxu1 }
 0x6de   :  { %v1578_v3 = vrot.slane %v1498_v35, 3  ;;  %v1580_v29 = vrot.slane %v1569_v36, 3  ;;  %v1500_v30 = vpop.f32.mrb[11].mxu0  ;;  %v1571_v33 = vpop.f32.mrb[19].mxu1 }
 0x6df   :  { %v1579_v34 = vrot.slane %v1500_v30, 3  ;;  %v1581_v39 = vrot.slane %v1571_v33, 3 }
 0x6e0   :  { %v1586_v41 = vadd.f32 %v1578_v3, %v6876_v1  ;;  %v1588_v42 = vadd.f32 %v1580_v29, %v6882_v14 }
 0x6e1   :  { %v1587_v44 = vadd.f32 %v1579_v34, %v6879_v11  ;;  %v1589_v58 = vadd.f32 %v1581_v39, %v6884_v19 }
 0x6e2   :  { %v4737_v61 = vmul.f32 -1.442695, %v1586_v41 }
 0x6e3   :  { %v4738_v8 = vmul.f32 -1.442695, %v1587_v44  ;;  %v4739_v59 = vmul.f32 -1.442695, %v1589_v58  ;;  %v1993_v44 = vld [vmem:[%s7847_s13] sm:$0xff]  ;;  %v1994_v58 = vld [vmem:[%s7847_s13 + $0x8] sm:$0xff] }
 0x6e4   :  { %6202 = vpow2.f32 %v4737_v61  ;;  %v5511_v61 = vpack.c.bf16 %v1994_v58, %v1993_v44 }
 0x6e5   :  { %6204 = vpow2.f32 %v4738_v8  ;;  %v6469_v8 = vmov 0.0|0.0  }
 0x6e6   :  { %6206 = vpow2.f32 %v4739_v59  ;;  %v1995_v59 = vld [vmem:[%s7847_s13 + $0x10] sm:$0xff] }
 0x6e7   :  { %6208 = vtanh.f32 %v1588_v42 }
 0x6ee   :  { %v6203_v47 = vpop.eup %6202 }
 0x6ef   :  { %v6205_v48 = vpop.eup %6204  ;;  %v1593_v49 = vadd.f32 1.0, %v6203_v47  ;;  %v1996_v47 = vld [vmem:[%s7847_s13 + $0x18] sm:$0xff] }
 0x6f0   :  { %v1599_v52 = vadd.f32 1.0, %v6205_v48  ;;  %v6207_v0 = vpop.eup %6206  ;;  %v5514_v48 = vpack.c.bf16 %v1996_v47, %v1995_v59 }
 0x6f1   :  { %6210 = vrcp.f32 %v1593_v49  ;;  %v6209_v10 = vpop.eup %6208  ;;  %v1606_v3 = vadd.f32 1.0, %v6207_v0  ;;  %v1997_v49 = vld [vmem:[%s7847_s13 + $0x20] sm:$0xff] }
 0x6f2   :  { %6212 = vrcp.f32 %v1599_v52  ;;  %v1998_v52 = vld [vmem:[%s7847_s13 + $0x28] sm:$0xff] }
 0x6f3   :  { %6214 = vrcp.f32 %v1606_v3  ;;  %v5517_v0 = vpack.c.bf16 %v1998_v52, %v1997_v49 }
 0x6fb   :  { %v6211_v12 = vpop.eup %6210 }
 0x6fc   :  { %v6213_v35 = vpop.eup %6212  ;;  %v1613_v36 = vmul.f32 %v6211_v12, %v6209_v10  ;;  %v1999_v10 = vld [vmem:[%s7847_s13 + $0x30] sm:$0xff]  ;;  %v2000_v12 = vld [vmem:[%s7847_s13 + $0x38] sm:$0xff] }
 0x6fd   :  { %v1612_v29 = vmul.f32 %v6213_v35, %v1610_v27  ;;  %v6215_v33 = vpop.eup %6214  ;;  %v5520_v27 = vpack.c.bf16 %v2000_v12, %v1999_v10  ;;  %v2001_v35 = vld [vmem:[%s7847_s13 + $0x40] sm:$0xff]  ;;  %v2239_v12 = vld [vmem:[%s7849_s15 + $0x8] sm:$0xff] }
 0x6fe   :  { %v2238_v10 = vld [vmem:[%s7849_s15] sm:$0xff] }
 0x6ff   :  { %v7107_v30 = vadd.f32 %v1613_v36, %v1612_v29  ;;  %v2002_v36 = vld [vmem:[%s7847_s13 + $0x48] sm:$0xff]  ;;  %v2003_v29 = vld [vmem:[%s7847_s13 + $0x50] sm:$0xff] }
 0x700   :  { %v5523_v3 = vpack.c.bf16 %v2002_v36, %v2001_v35  ;;  %v5559_v35 = vpack.c.bf16 %v2239_v12, %v2238_v10  ;;  %v2589_v12 = vld [vmem:[#allocation8 + $0x180] sm:$0xff] }
 0x701   :  { %6216 = vtanh.f32 %v7107_v30 }
 0x70b   :  { %v6217_v34 = vpop.eup %6216 }
 0x70c   :  { %v1616_v39 = vmul.f32 %v6217_v34, %v6215_v33  ;;  %v2005_v34 = vld [vmem:[%s7847_s13 + $0x60] sm:$0xff] }
 0x70e   :  { %v1618_v41 = vrot.slane %v1616_v39, 5  ;;  %v2006_v39 = vld [vmem:[%s7847_s13 + $0x68] sm:$0xff] }
 0x710   :  { %1685 = vmatmul.mubr.f32.vlgmr.msra.gmra.mrb[12].mxu0 %v1618_v41  ;;  %1756 = vmatmul.mubr.f32.vlgmr.msra.gmra.mrb[20].mxu1 %v1618_v41  ;;  %v5529_v41 = vpack.c.bf16 %v2006_v39, %v2005_v34  ;;  %v2211_v34 = vld [vmem:[%s7865_s2] sm:$0x1] }
 0x711   :  { %5449 = vmatpush1.bf16.msra.mxu0 %v6628_v9  ;;  %5481 = vmatpush1.bf16.msra.mxu1 %v6809_v4 }
 0x712   :  { %5451 = vmatprep.subr.bf16.mxu0 %v6631_v13  ;;  %5483 = vmatprep.subr.bf16.mxu1 %v6812_v6 }
 0x713   :  { %1872 = vmatprep.mubr.f32.mxu0 %v6468_v7  ;;  %1943 = vmatprep.mubr.f32.mxu1 %v6468_v7 }
 0x715   :  { %5453 = vmatpush1.bf16.msra.mxu0 %v6635_v17  ;;  %5485 = vmatpush1.bf16.msra.mxu1 %v6816_v15 }
 0x716   :  { %5455 = vmatprep.subr.bf16.mxu0 %v6638_v18  ;;  %5487 = vmatprep.subr.bf16.mxu1 %v6820_v16 }
 0x719   :  { %5457 = vmatpush1.bf16.msra.mxu0 %v6644_v24  ;;  %5489 = vmatpush1.bf16.msra.mxu1 %v6823_v23 }
 0x71a   :  { %5459 = vmatprep.subr.bf16.mxu0 %v6656_v28  ;;  %5491 = vmatprep.subr.bf16.mxu1 %v6826_v25 }
 0x71d   :  { %5461 = vmatpush1.bf16.msra.mxu0 %v6671_v40  ;;  %5493 = vmatpush1.bf16.msra.mxu1 %v6829_v31 }
 0x71e   :  { %5463 = vmatprep.subr.bf16.mxu0 %v6674_v43  ;;  %5495 = vmatprep.subr.bf16.mxu1 %v6832_v32  ;;  %v1798_v32 = vrot.slane %v7107_v30, 7  ;;  %v2004_v30 = vld [vmem:[%s7847_s13 + $0x58] sm:$0xff] }
 0x71f   :  { %v5526_v33 = vpack.c.bf16 %v2004_v30, %v2003_v29  ;;  %v2237_v29 = vld [vmem:[%s2236_s23] sm:$0x1] }
 0x721   :  { %5465 = vmatpush1.bf16.msra.mxu0 %v6683_v50  ;;  %5497 = vmatpush1.bf16.msra.mxu1 %v6835_v37 }
 0x722   :  { %5467 = vmatprep.subr.bf16.mxu0 %v6686_v51  ;;  %5499 = vmatprep.subr.bf16.mxu1 %v6838_v38 }
 0x725   :  { %5469 = vmatpush1.bf16.msra.mxu0 %v6689_v56  ;;  %5501 = vmatpush1.bf16.msra.mxu1 %v6841_v45 }
 0x726   :  { %5471 = vmatprep.subr.bf16.mxu0 %v6692_v57  ;;  %5503 = vmatprep.subr.bf16.mxu1 %v6844_v46 }
 0x729   :  { %5473 = vmatpush1.bf16.msra.mxu0 %v6695_v62  ;;  %5505 = vmatpush1.bf16.msra.mxu1 %v6847_v53 }
 0x72a   :  { %5475 = vmatprep.subr.bf16.mxu0 %v6698_v63  ;;  %5507 = vmatprep.subr.bf16.mxu1 %v6850_v54 }
 0x72d   :  { %5477 = vmatpush1.bf16.msra.mxu0 %v6701_v2  ;;  %5509 = vmatpush1.bf16.msra.mxu1 %v6853_v60 }
 0x72e   :  { %5534 = vmatprep.subr.bf16.mxu1 %v6469_v8  ;;  %5510 = vmatprep.subr.bf16.mxu0 %v6469_v8 }
 0x7e3   :  { %v1686_v9 = vpop.f32.mrb[12].mxu0  ;;  %v1757_v13 = vpop.f32.mrb[20].mxu1 }
 0x7e4   :  { %v1766_v17 = vrot.slane %v1686_v9, 2  ;;  %v1768_v18 = vrot.slane %v1757_v13, 2  ;;  %v1688_v24 = vpop.f32.mrb[13].mxu0  ;;  %v1759_v28 = vpop.f32.mrb[21].mxu1  ;;  %v2007_v9 = vld [vmem:[%s7847_s13 + $0x70] sm:$0xff]  ;;  %v2008_v13 = vld [vmem:[%s7847_s13 + $0x78] sm:$0xff] }
 0x7e5   :  { %v1767_v40 = vrot.slane %v1688_v24, 2  ;;  %v1769_v43 = vrot.slane %v1759_v28, 2  ;;  %s6444_s13 = scalar_lea.hbm %s7854_s20, 16 }
 0x7e6   :  { %v1774_v50 = vadd.f32 %v1766_v17, %v6876_v1  ;;  %v1776_v51 = vadd.f32 %v1768_v18, %v6882_v14  ;;  %v5532_v17 = vpack.c.bf16 %v2008_v13, %v2007_v9  ;;  %v2221_v9 = vld [vmem:[%s7865_s2 + $0x1] sm:$0x1]  ;;  %p6445_p5 = scmp.ne.s32.totalorder %s7854_s20, %s6444_s13  ;;  %p6448_p6 = scmp.lt.u32.totalorder %s6444_s13, %s7854_s20 }
 0x7e7   :  { %v1775_v56 = vadd.f32 %v1767_v40, %v6879_v11  ;;  %v1777_v57 = vadd.f32 %v1769_v43, %v6884_v19 }
 0x7e8   :  { %v4740_v62 = vmul.f32 -1.442695, %v1774_v50  ;;  %p6450_p7 = pnand %p6448_p6, %p6445_p5 }
 0x7e9   :  { %v4741_v63 = vmul.f32 -1.442695, %v1775_v56  ;;  %v4742_v2 = vmul.f32 -1.442695, %v1777_v57 }
 0x7ea   :  { %6218 = vpow2.f32 %v4740_v62 }
 0x7eb   :  { %6220 = vpow2.f32 %v4741_v63 }
 0x7ec   :  { %6222 = vpow2.f32 %v4742_v2 }
 0x7ed   :  { %6224 = vtanh.f32 %v1776_v51 }
 0x7f4   :  { %v6219_v4 = vpop.eup %6218 }
 0x7f5   :  { %v6221_v6 = vpop.eup %6220  ;;  %v1781_v15 = vadd.f32 1.0, %v6219_v4 }
 0x7f6   :  { %v1787_v16 = vadd.f32 1.0, %v6221_v6  ;;  %v6223_v23 = vpop.eup %6222 }
 0x7f7   :  { %6226 = vrcp.f32 %v1781_v15  ;;  %v6225_v25 = vpop.eup %6224  ;;  %v1794_v45 = vadd.f32 1.0, %v6223_v23 }
 0x7f8   :  { %6228 = vrcp.f32 %v1787_v16 }
 0x7f9   :  { %6230 = vrcp.f32 %v1794_v45 }
 0x801   :  { %v6227_v31 = vpop.eup %6226 }
 0x802   :  { %v6229_v37 = vpop.eup %6228  ;;  %v1801_v38 = vmul.f32 %v6227_v31, %v6225_v25 }
 0x803   :  { %v1800_v46 = vmul.f32 %v6229_v37, %v1798_v32  ;;  %v6231_v54 = vpop.eup %6230 }
 0x805   :  { %v7147_v53 = vadd.f32 %v1801_v38, %v1800_v46 }
 0x807   :  { %6232 = vtanh.f32 %v7147_v53 }
 0x811   :  { %v6233_v60 = vpop.eup %6232 }
 0x812   :  { %v1804_v55 = vmul.f32 %v6233_v60, %v6231_v54 }
 0x814   :  { %v1806_v42 = vrot.slane %v1804_v55, 6 }
 0x816   :  { %1873 = vmatmul.mubr.f32.vlgmr.msra.gmra.mrb[14].mxu0 %v1806_v42  ;;  %1944 = vmatmul.mubr.f32.vlgmr.msra.gmra.mrb[22].mxu1 %v1806_v42 }
 0x817   :  { %5536 = vmatpush3.bf16.msra.mxu1 %v5511_v61  ;;  %5512 = vmatpush3.bf16.msra.mxu0 %v5511_v61  ;;  %v2009_v61 = vld [vmem:[%s7848_s14] sm:$0x1] }
 0x818   :  { %5537 = vmatprep.subr.bf16.mxu1 %v6469_v8  ;;  %5513 = vmatprep.subr.bf16.mxu0 %v6469_v8 }
 0x819   :  { %4904 = vmatprep.mubr.msk.f32.mxu1 %vm6470_vm3, %v6468_v7  ;;  %4869 = vmatprep.mubr.msk.f32.mxu0 %vm6470_vm3, %v6468_v7 }
 0x81b   :  { %5539 = vmatpush3.bf16.msra.mxu1 %v5514_v48  ;;  %5515 = vmatpush3.bf16.msra.mxu0 %v5514_v48 }
 0x81c   :  { %5540 = vmatprep.subr.bf16.mxu1 %v6469_v8  ;;  %5516 = vmatprep.subr.bf16.mxu0 %v6469_v8 }
 0x81f   :  { %5542 = vmatpush3.bf16.msra.mxu1 %v5517_v0  ;;  %5518 = vmatpush3.bf16.msra.mxu0 %v5517_v0 }
 0x820   :  { %5543 = vmatprep.subr.bf16.mxu1 %v6469_v8  ;;  %5519 = vmatprep.subr.bf16.mxu0 %v6469_v8 }
 0x823   :  { %5545 = vmatpush3.bf16.msra.mxu1 %v5520_v27  ;;  %5521 = vmatpush3.bf16.msra.mxu0 %v5520_v27 }
 0x824   :  { %5546 = vmatprep.subr.bf16.mxu1 %v6469_v8  ;;  %5522 = vmatprep.subr.bf16.mxu0 %v6469_v8 }
 0x827   :  { %5548 = vmatpush3.bf16.msra.mxu1 %v5523_v3  ;;  %5524 = vmatpush3.bf16.msra.mxu0 %v5523_v3  ;;  %v2240_v3 = vld [vmem:[%s7849_s15 + $0x10] sm:$0xff]  ;;  %s6472_s15 = smov 80  }
 0x828   :  { %5549 = vmatprep.subr.bf16.mxu1 %v6469_v8  ;;  %5525 = vmatprep.subr.bf16.mxu0 %v6469_v8 }
 0x82b   :  { %5551 = vmatpush3.bf16.msra.mxu1 %v5526_v33  ;;  %5527 = vmatpush3.bf16.msra.mxu0 %v5526_v33 }
 0x82c   :  { %5552 = vmatprep.subr.bf16.mxu1 %v6469_v8  ;;  %5528 = vmatprep.subr.bf16.mxu0 %v6469_v8 }
 0x82f   :  { %5554 = vmatpush3.bf16.msra.mxu1 %v5529_v41  ;;  %5530 = vmatpush3.bf16.msra.mxu0 %v5529_v41 }
 0x830   :  { %5555 = vmatprep.subr.bf16.mxu1 %v6469_v8  ;;  %5531 = vmatprep.subr.bf16.mxu0 %v6469_v8 }
 0x833   :  { %5557 = vmatpush3.bf16.msra.mxu1 %v5532_v17  ;;  %5533 = vmatpush3.bf16.msra.mxu0 %v5532_v17 }
 0x834   :  { %5558 = vmatprep.subr.bf16.mxu1 %v6469_v8  ;;  %4907 = vmatprep.subr.mxu0 %v6468_v7 }
 0x8e9   :  { %v1874_v18 = vpop.f32.mrb[14].mxu0  ;;  %v1945_v24 = vpop.f32.mrb[22].mxu1 }
 0x8ea   :  { %v1954_v28 = vrot.slane %v1874_v18, 1  ;;  %v1956_v40 = vrot.slane %v1945_v24, 1  ;;  %v1876_v43 = vpop.f32.mrb[15].mxu0  ;;  %v1947_v50 = vpop.f32.mrb[23].mxu1  ;;  %v2393_v24 = vld [vmem:[%s7851_s17 + $0x10] sm:$0xff] }
 0x8eb   :  { %v1955_v51 = vrot.slane %v1876_v43, 1  ;;  %v1957_v56 = vrot.slane %v1947_v50, 1  ;;  %v2541_v50 = vld [vmem:[#allocation8] sm:$0xff] }
 0x8ec   :  { %v1962_v57 = vadd.f32 %v1954_v28, %v6876_v1  ;;  %v1964_v62 = vadd.f32 %v1956_v40, %v6882_v14  ;;  %v2542_v28 = vld [vmem:[#allocation8 + $0x8] sm:$0xff] }
 0x8ed   :  { %v1963_v63 = vadd.f32 %v1955_v51, %v6879_v11  ;;  %v1965_v2 = vadd.f32 %v1957_v56, %v6884_v19  ;;  %v1986_v11 = vrot.slane %v7147_v53, 7  ;;  %v2546_v40 = vld [vmem:[#allocation8 + $0x28] sm:$0xff]  ;;  %v2545_v51 = vld [vmem:[#allocation8 + $0x20] sm:$0xff] }
 0x8ee   :  { %v4743_v4 = vmul.f32 -1.442695, %v1962_v57  ;;  %v7271_v43 = vpack.c.bf16 %v2546_v40, %v2542_v28  ;;  %v2550_v56 = vld [vmem:[#allocation8 + $0x48] sm:$0xff]  ;;  %v7274_v57 = vpack.c.bf16 %v2545_v51, %v2541_v50  ;;  %v4669_v51 = vld [vmem:[%s7866_s4] sm:$0xff] }
 0x8ef   :  { %v4744_v6 = vmul.f32 -1.442695, %v1963_v63  ;;  %v4745_v15 = vmul.f32 -1.442695, %v1965_v2  ;;  %v2549_v63 = vld [vmem:[#allocation8 + $0x40] sm:$0xff] }
 0x8f0   :  { %6234 = vpow2.f32 %v4743_v4  ;;  %v2553_v2 = vld [vmem:[#allocation8 + $0x60] sm:$0xff] }
 0x8f1   :  { %6236 = vpow2.f32 %v4744_v6  ;;  %v2558_v6 = vld [vmem:[#allocation8 + $0x88] sm:$0xff] }
 0x8f2   :  { %6238 = vpow2.f32 %v4745_v15  ;;  %v2562_v15 = vld [vmem:[#allocation8 + $0xa8] sm:$0xff] }
 0x8f3   :  { %6240 = vtanh.f32 %v1964_v62  ;;  %v2554_v62 = vld [vmem:[#allocation8 + $0x68] sm:$0xff] }
 0x8f4   :  { %v7277_v4 = vpack.c.bf16 %v2554_v62, %v2550_v56 }
 0x8fa   :  { %v6235_v16 = vpop.eup %6234 }
 0x8fb   :  { %v6237_v23 = vpop.eup %6236  ;;  %v1969_v25 = vadd.f32 1.0, %v6235_v16  ;;  %v7281_v16 = vpack.c.bf16 %v2553_v2, %v2549_v63  ;;  %v2389_v2 = vld [vmem:[%s7850_s16] sm:$0x1] }
 0x8fc   :  { %v1975_v31 = vadd.f32 1.0, %v6237_v23  ;;  %v6239_v1 = vpop.eup %6238  ;;  %v7284_v23 = vpack.c.bf16 %v2562_v15, %v2558_v6 }
 0x8fd   :  { %6242 = vrcp.f32 %v1969_v25  ;;  %v6241_v32 = vpop.eup %6240  ;;  %v1982_v19 = vadd.f32 1.0, %v6239_v1  ;;  %v2557_v25 = vld [vmem:[#allocation8 + $0x80] sm:$0xff]  ;;  %v2566_v1 = vld [vmem:[#allocation8 + $0xc8] sm:$0xff] }
 0x8fe   :  { %6244 = vrcp.f32 %v1975_v31  ;;  %v2561_v31 = vld [vmem:[#allocation8 + $0xa0] sm:$0xff] }
 0x8ff   :  { %6246 = vrcp.f32 %v1982_v19  ;;  %v2569_v19 = vld [vmem:[#allocation8 + $0xe0] sm:$0xff] }
 0x907   :  { %v6243_v14 = vpop.eup %6242 }
 0x908   :  { %v6245_v37 = vpop.eup %6244  ;;  %v1989_v38 = vmul.f32 %v6243_v14, %v6241_v32  ;;  %v2570_v32 = vld [vmem:[#allocation8 + $0xe8] sm:$0xff]  ;;  %v7287_v14 = vpack.c.bf16 %v2561_v31, %v2557_v25 }
 0x909   :  { %v1988_v45 = vmul.f32 %v6245_v37, %v1986_v11  ;;  %v6247_v60 = vpop.eup %6246  ;;  %v7290_v11 = vpack.c.bf16 %v2570_v32, %v2566_v1  ;;  %v2565_v37 = vld [vmem:[#allocation8 + $0xc0] sm:$0xff]  ;;  %v2543_v32 = vld [vmem:[#allocation8 + $0x10] sm:$0xff] }
 0x90b   :  { %v1990_v46 = vadd.f32 %v1989_v38, %v1988_v45  ;;  %v2574_v38 = vld [vmem:[#allocation8 + $0x108] sm:$0xff] }
 0x90c   :  { %v2578_v45 = vld [vmem:[#allocation8 + $0x128] sm:$0xff] }
 0x90d   :  { %6248 = vtanh.f32 %v1990_v46  ;;  %v2084_v54 = vrot.slane %v1990_v46, 7  ;;  %v7293_v46 = vpack.c.bf16 %v2569_v19, %v2565_v37  ;;  %v2547_v37 = vld [vmem:[#allocation8 + $0x30] sm:$0xff]  ;;  %v2552_v19 = vld [vmem:[#allocation8 + $0x58] sm:$0xff] }
 0x90f   :  { %4905 = vmatmul.mubr.f32.vlgmr.msra.gmra.mrb[24].mxu1 %v2084_v54  ;;  %v7296_v54 = vpack.c.bf16 %v2578_v45, %v2574_v38  ;;  %v2556_v38 = vld [vmem:[#allocation8 + $0x78] sm:$0xff]  ;;  %v7356_v45 = vpack.c.bf16 %v2547_v37, %v2543_v32  ;;  %v2595_v37 = vld [vmem:[#allocation8 + $0x1b0] sm:$0xff] }
 0x910   :  { %4916 = vmatprep.mubr.msk.f32.mxu1 %vm6470_vm3, %v6468_v7  ;;  %5560 = vmatpush3.bf16.msra.mxu1 %v5559_v35 }
 0x911   :  { %5561 = vmatprep.subr.bf16.mxu1 %v6469_v8 }
 0x917   :  { %v6249_v55 = vpop.eup %6248 }
 0x918   :  { %v1992_v42 = vmul.f32 %v6249_v55, %v6247_v60  ;;  %v2573_v60 = vld [vmem:[#allocation8 + $0x100] sm:$0xff] }
 0x919   :  { %v2577_v55 = vld [vmem:[#allocation8 + $0x120] sm:$0xff] }
 0x91a   :  { %v2011_v44 = vrot.slane %v1992_v42, 7  ;;  %v2582_v42 = vld [vmem:[#allocation8 + $0x148] sm:$0xff] }
 0x91c   :  { %4870 = vmatmul.mubr.f32.vlgmr.msra.gmra.mrb[16].mxu0 %v2011_v44  ;;  %v2586_v44 = vld [vmem:[#allocation8 + $0x168] sm:$0xff] }
 0x91d   :  { %4909 = vmatprep.mubr.msk.f32.mxu0 %vm6470_vm3, %v6468_v7  ;;  %4908 = vmatpush3.msra.mxu0 %v2240_v3  ;;  %v2602_v3 = vld [vmem:[#allocation8 + $0x1e8] sm:$0xff] }
 0x91e   :  { %4919 = vmatprep.subr.mxu0 %v6468_v7 }
 0x920   :  { %4910 = vmatmul.mubr.msk.f32.vlgmr.msra.gmra.mrb[18].mxu0 %vm2241_vm4, %v2237_v29 }
 0x921   :  { %4921 = vmatprep.mubr.msk.f32.mxu0 %vm6470_vm3, %v6468_v7  ;;  %4920 = vmatpush3.msra.mxu0 %v2393_v24  ;;  %v2548_v24 = vld [vmem:[#allocation8 + $0x38] sm:$0xff] }
 0x922   :  { %5565 = vmatprep.subr.bf16.mxu0 %v7271_v43 }
 0x924   :  { %4922 = vmatmul.mubr.msk.f32.vlgmr.msra.gmra.mrb[20].mxu0 %vm2241_vm4, %v2237_v29 }
 0x925   :  { %2669 = vmatprep.mubr.f32.mxu0 %v6468_v7  ;;  %5567 = vmatpush1.bf16.msra.mxu0 %v7274_v57 }
 0x926   :  { %5569 = vmatprep.subr.bf16.mxu0 %v7277_v4 }
 0x929   :  { %5571 = vmatpush1.bf16.msra.mxu0 %v7281_v16 }
 0x92a   :  { %5573 = vmatprep.subr.bf16.mxu0 %v7284_v23 }
 0x92d   :  { %5575 = vmatpush1.bf16.msra.mxu0 %v7287_v14 }
 0x92e   :  { %5577 = vmatprep.subr.bf16.mxu0 %v7290_v11 }
 0x931   :  { %5579 = vmatpush1.bf16.msra.mxu0 %v7293_v46 }
 0x932   :  { %5581 = vmatprep.subr.bf16.mxu0 %v7296_v54 }
 0x9e2   :  { %v2152_v53 = vpop.f32.mrb[24].mxu1 }
 0x9e3   :  { %v4906_v58 = vpop.f32.mrb[25].mxu1  ;;  %v7232_v59 = vadd.f32 %v2152_v53, %v2009_v61  ;;  %v7299_v53 = vpack.c.bf16 %v2577_v55, %v2573_v60  ;;  %v7358_v60 = vpack.c.bf16 %v2556_v38, %v2552_v19  ;;  %v2551_v55 = vld [vmem:[#allocation8 + $0x50] sm:$0xff]  ;;  %v2600_v19 = vld [vmem:[#allocation8 + $0x1d8] sm:$0xff] }
 0x9e4   :  { %v7302_v58 = vpack.c.bf16 %v2586_v44, %v2582_v42  ;;  %v2555_v42 = vld [vmem:[#allocation8 + $0x70] sm:$0xff]  ;;  %v2604_v38 = vld [vmem:[#allocation8 + $0x1f8] sm:$0xff] }
 0x9e5   :  { %v2222_v52 = vmul.f32 0.5, %v7232_v59  ;;  %5583 = vmatpush1.bf16.msra.mxu0 %v7299_v53  ;;  %v2185_v62 = vmul.f32 %v7232_v59, %v7232_v59 }
 0x9e6   :  { %5585 = vmatprep.subr.bf16.mxu0 %v7302_v58 }
 0x9e7   :  { %v2223_v36 = vmul.f32 1.442695, %v2222_v52  ;;  %v2594_v52 = vld [vmem:[#allocation8 + $0x1a8] sm:$0xff] }
 0x9ef   :  { %v2079_v47 = vpop.f32.mrb[16].mxu0 }
 0x9f0   :  { %v7234_v48 = vadd.f32 %v2079_v47, %v2009_v61  ;;  %v4871_v49 = vpop.f32.mrb[17].mxu0  ;;  %v2581_v61 = vld [vmem:[#allocation8 + $0x140] sm:$0xff] }
 0x9f1   :  { %v2585_v47 = vld [vmem:[#allocation8 + $0x160] sm:$0xff]  ;;  %v2590_v49 = vld [vmem:[#allocation8 + $0x188] sm:$0xff] }
 0x9f2   :  { %v2212_v0 = vmul.f32 0.5, %v7234_v48  ;;  %v7308_v10 = vpack.c.bf16 %v2594_v52, %v2590_v49  ;;  %v2157_v56 = vmul.f32 %v7234_v48, %v7234_v48  ;;  %v7364_v49 = vpack.c.bf16 %v2555_v42, %v2551_v55 }
 0x9f3   :  { %v7404_v42 = vpack.c.bf16 %v2604_v38, %v2600_v19 }
 0x9f4   :  { %v2213_v27 = vmul.f32 1.442695, %v2212_v0  ;;  %v7305_v0 = vpack.c.bf16 %v2585_v47, %v2581_v61  ;;  %v2560_v61 = vld [vmem:[#allocation8 + $0x98] sm:$0xff] }
 0x9f5   :  { %v2564_v47 = vld [vmem:[#allocation8 + $0xb8] sm:$0xff] }
 0x9f6   :  { %6250 = vpow2.f32 %v2213_v27  ;;  %v2593_v27 = vld [vmem:[#allocation8 + $0x1a0] sm:$0xff]  ;;  %5587 = vmatpush1.bf16.msra.mxu0 %v7305_v0  ;;  %v7368_v52 = vpack.c.bf16 %v2564_v47, %v2560_v61  ;;  %v2603_v61 = vld [vmem:[#allocation8 + $0x1f0] sm:$0xff] }
 0x9f7   :  { %6252 = vpow2.f32 %v2223_v36  ;;  %v7311_v35 = vpack.c.bf16 %v2593_v27, %v2589_v12  ;;  %5589 = vmatprep.subr.bf16.mxu0 %v7308_v10  ;;  %v2598_v36 = vld [vmem:[#allocation8 + $0x1c8] sm:$0xff]  ;;  %v2559_v12 = vld [vmem:[#allocation8 + $0x90] sm:$0xff] }
 0x9f8   :  { %v7315_v29 = vpack.c.bf16 %v2602_v3, %v2598_v36  ;;  %v2563_v27 = vld [vmem:[#allocation8 + $0xb0] sm:$0xff]  ;;  %v2568_v36 = vld [vmem:[#allocation8 + $0xd8] sm:$0xff] }
 0x9f9   :  { %v2572_v3 = vld [vmem:[#allocation8 + $0xf8] sm:$0xff] }
 0x9fa   :  { %5591 = vmatpush1.bf16.msra.mxu0 %v7311_v35 }
 0x9fb   :  { %5593 = vmatprep.subr.bf16.mxu0 %v7315_v29 }
 0xa00   :  { %v6251_v30 = vpop.eup %6250 }
 0xa01   :  { %2216 = vrot.lane.b32.xlu1 %v6251_v30, %s6471_s29  ;;  %v6253_v33 = vpop.eup %6252  ;;  %v2597_v30 = vld [vmem:[#allocation8 + $0x1c0] sm:$0xff] }
 0xa05   :  { %2226 = vrot.lane.b32.xlu1 %v6253_v33, %s6472_s15  ;;  %v2601_v33 = vld [vmem:[#allocation8 + $0x1e0] sm:$0xff] }
 0xa73   :  { %v2217_v39 = vpop.permute.xlu1 %2216 }
 0xa74   :  { %v2219_v41 = vmul.f32 %v2217_v39, %v2211_v34  ;;  %v2311_v34 = vpop.f32.mrb[18].mxu0  ;;  %v7317_v39 = vpack.c.bf16 %v2601_v33, %v2597_v30  ;;  %v7373_v30 = vpack.c.bf16 %v2563_v27, %v2559_v12  ;;  %v7376_v33 = vpack.c.bf16 %v2572_v3, %v2568_v36 }
 0xa76   :  { %v2220_v13 = vadd.f32 %v2219_v41, %v7234_v48  ;;  %v4911_v41 = vpop.f32.mrb[19].mxu0  ;;  %5595 = vmatpush1.bf16.msra.mxu0 %v7317_v39 }
 0xa77   :  { %v2227_v17 = vpop.permute.xlu1 %2226  ;;  %5629 = vmatprep.subr.bf16.mxu0 %v7271_v43  ;;  %v7345_v31 = vpop.f32.mrb[20].mxu0  ;;  %v2571_v41 = vld [vmem:[#allocation8 + $0xf0] sm:$0xff] }
 0xa78   :  { %v2229_v18 = vmul.f32 %v2227_v17, %v2221_v9  ;;  %4917 = vmatmul.mubr.msk.f32.vlgmr.msra.gmra.mrb[26].mxu1 %vm2315_vm5, %v2220_v13  ;;  %v2391_v9 = vld [vmem:[%s7851_s17] sm:$0xff]  ;;  %v2392_v13 = vld [vmem:[%s7851_s17 + $0x8] sm:$0xff]  ;;  %s6474_s17 = smov 16   ;;  %v4923_v1 = vpop.f32.mrb[21].mxu0 }
 0xa79   :  { %4928 = vmatprep.mubr.msk.f32.mxu1 %vm6470_vm3, %v6468_v7  ;;  %v2544_v17 = vld [vmem:[#allocation8 + $0x18] sm:$0xff] }
 0xa7a   :  { %2231 = vrot.lane.b32.xlu0 %v2229_v18, %s6465_s26  ;;  %v5562_v18 = vpack.c.bf16 %v2392_v13, %v2391_v9  ;;  %v7328_v28 = vpack.c.bf16 %v2548_v24, %v2544_v17  ;;  %v2576_v9 = vld [vmem:[#allocation8 + $0x118] sm:$0xff]  ;;  %v2575_v24 = vld [vmem:[#allocation8 + $0x110] sm:$0xff] }
 0xa7b   :  { %v2580_v13 = vld [vmem:[#allocation8 + $0x138] sm:$0xff] }
 0xa7c   :  { %5563 = vmatpush3.bf16.msra.mxu1 %v5562_v18  ;;  %v7384_v18 = vpack.c.bf16 %v2580_v13, %v2576_v9 }
 0xa7d   :  { %5597 = vmatprep.subr.bf16.mxu1 %v7328_v28 }
 0xaec   :  { %v2232_v40 = vpop.permute.xlu0 %2231 }
 0xaed   :  { %v2234_v50 = vadd.f32 %v2232_v40, %v7232_v59  ;;  %v2579_v40 = vld [vmem:[#allocation8 + $0x130] sm:$0xff] }
 0xaef   :  { %2465 = vrot.lane.b32.xlu1 %v2234_v50, %s6473_s30  ;;  %v2584_v50 = vld [vmem:[#allocation8 + $0x158] sm:$0xff] }
 0xaf3   :  { %4671 = vperm.xlu1 %6121, %v4669_v51   ;;  %v2588_v51 = vld [vmem:[#allocation8 + $0x178] sm:$0xff] }
 0xaf7   :  { %2159 = vrot.lane.b32.xlu1 %v2157_v56, %s6474_s17  ;;  %v7389_v56 = vpack.c.bf16 %v2579_v40, %v2575_v24  ;;  %v2539_v40 = vld [vmem:[%s7852_s18] sm:$0x1] }
 0xafb   :  { %2187 = vrot.lane.b32.xlu1 %v2185_v62, %s6474_s17  ;;  %v7392_v62 = vpack.c.bf16 %v2588_v51, %v2584_v50 }
 0xb4b   :  { %v2385_v63 = vpop.f32.mrb[26].mxu1 }
 0xb4c   :  { %v2386_v6 = vadd.f32 %v2385_v63, %v2311_v34  ;;  %v4918_v15 = vpop.f32.mrb[27].mxu1  ;;  %v2567_v34 = vld [vmem:[#allocation8 + $0xd0] sm:$0xff] }
 0xb4d   :  { %v7381_v17 = vpack.c.bf16 %v2571_v41, %v2567_v34  ;;  %v2583_v63 = vld [vmem:[#allocation8 + $0x150] sm:$0xff]  ;;  %v2596_v15 = vld [vmem:[#allocation8 + $0x1b8] sm:$0xff] }
 0xb4e   :  { %v7342_v25 = vadd.f32 %v2389_v2, %v2386_v6  ;;  %v2587_v2 = vld [vmem:[#allocation8 + $0x170] sm:$0xff]  ;;  %v2592_v6 = vld [vmem:[#allocation8 + $0x198] sm:$0xff] }
 0xb4f   :  { %v7395_v1 = vpack.c.bf16 %v2587_v2, %v2583_v63  ;;  %v7398_v32 = vpack.c.bf16 %v2596_v15, %v2592_v6 }
 0xb50   :  { %2670 = vmatmul.mubr.f32.vlgmr.msra.gmra.mrb[22].mxu0 %v7342_v25 }
 0xb51   :  { %5631 = vmatpush1.bf16.msra.mxu0 %v7274_v57  ;;  %2904 = vmatprep.mubr.f32.mxu0 %v6468_v7 }
 0xb52   :  { %5633 = vmatprep.subr.bf16.mxu0 %v7277_v4 }
 0xb55   :  { %5635 = vmatpush1.bf16.msra.mxu0 %v7281_v16 }
 0xb56   :  { %5637 = vmatprep.subr.bf16.mxu0 %v7284_v23 }
 0xb59   :  { %5639 = vmatpush1.bf16.msra.mxu0 %v7287_v14 }
 0xb5a   :  { %5641 = vmatprep.subr.bf16.mxu0 %v7290_v11 }
 0xb5d   :  { %5643 = vmatpush1.bf16.msra.mxu0 %v7293_v46 }
 0xb5e   :  { %5645 = vmatprep.subr.bf16.mxu0 %v7296_v54 }
 0xb61   :  { %v2466_v44 = vpop.permute.xlu1 %2465  ;;  %5647 = vmatpush1.bf16.msra.mxu0 %v7299_v53 }
 0xb62   :  { %4929 = vmatmul.mubr.msk.f32.vlgmr.msra.gmra.mrb[28].mxu1 %vm2315_vm5, %v2466_v44  ;;  %5649 = vmatprep.subr.bf16.mxu0 %v7302_v58  ;;  %v2599_v44 = vld [vmem:[#allocation8 + $0x1d0] sm:$0xff] }
 0xb63   :  { %5599 = vmatpush1.bf16.msra.mxu1 %v7356_v45  ;;  %2740 = vmatprep.mubr.f32.mxu1 %v6468_v7  ;;  %v7407_v47 = vpack.c.bf16 %v2603_v61, %v2599_v44 }
 0xb64   :  { %5601 = vmatprep.subr.bf16.mxu1 %v7358_v60 }
 0xb65   :  { %5651 = vmatpush1.bf16.msra.mxu0 %v7305_v0 }
 0xb66   :  { %5653 = vmatprep.subr.bf16.mxu0 %v7308_v10 }
 0xb67   :  { %5603 = vmatpush1.bf16.msra.mxu1 %v7364_v49 }
 0xb68   :  { %5605 = vmatprep.subr.bf16.mxu1 %v7368_v52 }
 0xb69   :  { %5655 = vmatpush1.bf16.msra.mxu0 %v7311_v35 }
 0xb6a   :  { %5657 = vmatprep.subr.bf16.mxu0 %v7315_v29 }
 0xb6b   :  { %5607 = vmatpush1.bf16.msra.mxu1 %v7373_v30 }
 0xb6c   :  { %5609 = vmatprep.subr.bf16.mxu1 %v7376_v33 }
 0xb6d   :  { %5659 = vmatpush1.bf16.msra.mxu0 %v7317_v39 }
 0xb6e   :  { %5693 = vmatprep.subr.bf16.mxu0 %v7271_v43  ;;  %v2591_v43 = vld [vmem:[#allocation8 + $0x190] sm:$0xff] }
 0xb6f   :  { %5611 = vmatpush1.bf16.msra.mxu1 %v7381_v17  ;;  %v7401_v55 = vpack.c.bf16 %v2595_v37, %v2591_v43 }
 0xb70   :  { %5613 = vmatprep.subr.bf16.mxu1 %v7384_v18 }
 0xb73   :  { %5615 = vmatpush1.bf16.msra.mxu1 %v7389_v56 }
 0xb74   :  { %5617 = vmatprep.subr.bf16.mxu1 %v7392_v62 }
 0xb77   :  { %5619 = vmatpush1.bf16.msra.mxu1 %v7395_v1 }
 0xb78   :  { %5621 = vmatprep.subr.bf16.mxu1 %v7398_v32 }
 0xb7b   :  { %5623 = vmatpush1.bf16.msra.mxu1 %v7401_v55 }
 0xb7c   :  { %5625 = vmatprep.subr.bf16.mxu1 %v7404_v42 }
 0xb7f   :  { %5627 = vmatpush1.bf16.msra.mxu1 %v7407_v47 }
 0xb80   :  { %5661 = vmatprep.subr.bf16.mxu1 %v7328_v28 }
 0xb82   :  { %2741 = vmatmul.mubr.f32.vlgmr.msra.gmra.mrb[30].mxu1 %v7342_v25 }
 0xb83   :  { %5663 = vmatpush1.bf16.msra.mxu1 %v7356_v45  ;;  %2975 = vmatprep.mubr.f32.mxu1 %v6468_v7 }
 0xb84   :  { %5665 = vmatprep.subr.bf16.mxu1 %v7358_v60 }
 0xb87   :  { %5667 = vmatpush1.bf16.msra.mxu1 %v7364_v49 }
 0xb88   :  { %5669 = vmatprep.subr.bf16.mxu1 %v7368_v52 }
 0xb8b   :  { %5671 = vmatpush1.bf16.msra.mxu1 %v7373_v30 }
 0xb8c   :  { %5673 = vmatprep.subr.bf16.mxu1 %v7376_v33 }
 0xb8f   :  { %5675 = vmatpush1.bf16.msra.mxu1 %v7381_v17 }
 0xb90   :  { %5677 = vmatprep.subr.bf16.mxu1 %v7384_v18 }
 0xb93   :  { %5679 = vmatpush1.bf16.msra.mxu1 %v7389_v56 }
 0xb94   :  { %5681 = vmatprep.subr.bf16.mxu1 %v7392_v62 }
 0xb97   :  { %5683 = vmatpush1.bf16.msra.mxu1 %v7395_v1 }
 0xb98   :  { %5685 = vmatprep.subr.bf16.mxu1 %v7398_v32 }
 0xb9b   :  { %5687 = vmatpush1.bf16.msra.mxu1 %v7401_v55 }
 0xb9c   :  { %5689 = vmatprep.subr.bf16.mxu1 %v7404_v42 }
 0xb9f   :  { %5691 = vmatpush1.bf16.msra.mxu1 %v7407_v47 }
 0xba0   :  { %5725 = vmatprep.subr.bf16.mxu1 %v7328_v28 }
 0xc23   :  { %v2671_v25 = vpop.f32.mrb[22].mxu0 }
 0xc24   :  { %v2747_v12 = vadd.f32 %v2671_v25, %v6886_v20  ;;  %v2673_v27 = vpop.f32.mrb[23].mxu0 }
 0xc25   :  { %v2748_v36 = vadd.f32 %v2673_v27, %v6888_v21 }
 0xc26   :  { %v4751_v2 = vmul.f32 -1.442695, %v2747_v12 }
 0xc27   :  { %v4752_v3 = vmul.f32 -1.442695, %v2748_v36 }
 0xc29   :  { %6254 = vpow2.f32 %v4752_v3 }
 0xc33   :  { %v6255_v34 = vpop.eup %6254 }
 0xc34   :  { %v2760_v41 = vadd.f32 1.0, %v6255_v34 }
 0xc35   :  { %v2535_v9 = vpop.f32.mrb[28].mxu1 }
 0xc36   :  { %6256 = vrcp.f32 %v2760_v41  ;;  %v2536_v13 = vadd.f32 %v2535_v9, %v7345_v31  ;;  %v4930_v24 = vpop.f32.mrb[29].mxu1 }
 0xc37   :  { %6258 = vpow2.f32 %v4751_v2 }
 0xc38   :  { %v2540_v50 = vadd.f32 %v2539_v40, %v2536_v13 }
 0xc40   :  { %v6257_v51 = vpop.eup %6256 }
 0xc41   :  { %v2770_v63 = vmul.f32 %v6257_v51, %v2540_v50  ;;  %v6259_v6 = vpop.eup %6258 }
 0xc42   :  { %v2754_v15 = vadd.f32 1.0, %v6259_v6 }
 0xc44   :  { %6260 = vrcp.f32 %v2754_v15 }
 0xc4e   :  { %v6261_v44 = vpop.eup %6260 }
 0xc55   :  { %v2742_v43 = vpop.f32.mrb[30].mxu1 }
 0xc56   :  { %v2749_v37 = vadd.f32 %v2742_v43, %v6890_v22  ;;  %v2744_v19 = vpop.f32.mrb[31].mxu1 }
 0xc57   :  { %v2750_v38 = vadd.f32 %v2744_v19, %v6892_v26 }
 0xc58   :  { %6262 = vtanh.f32 %v2749_v37 }
 0xc59   :  { %v4753_v31 = vmul.f32 -1.442695, %v2750_v38 }
 0xc5b   :  { %6264 = vpow2.f32 %v4753_v31 }
 0xc62   :  { %v6263_v61 = vpop.eup %6262 }
 0xc63   :  { %v2771_v25 = vmul.f32 %v6263_v61, %v6261_v44  ;;  %v3295_v61 = vld [vmem:[#allocation8 + $0x80] sm:$0xff] }
 0xc65   :  { %v6265_v27 = vpop.eup %6264  ;;  %v7438_v36 = vadd.f32 %v2771_v25, %v2770_v63  ;;  %v3299_v25 = vld [vmem:[#allocation8 + $0xa0] sm:$0xff] }
 0xc66   :  { %v2767_v12 = vadd.f32 1.0, %v6265_v27  ;;  %v7513_v27 = vpack.c.bf16 %v3299_v25, %v3295_v61 }
 0xc67   :  { %6266 = vtanh.f32 %v7438_v36  ;;  %v3018_v63 = vrot.slane %v7438_v36, 7  ;;  %v3304_v36 = vld [vmem:[#allocation8 + $0xc8] sm:$0xff] }
 0xc68   :  { %6268 = vrcp.f32 %v2767_v12  ;;  %v3308_v12 = vld [vmem:[#allocation8 + $0xe8] sm:$0xff] }
 0xc71   :  { %v6267_v3 = vpop.eup %6266 }
 0xc72   :  { %v6269_v34 = vpop.eup %6268 }
 0xc73   :  { %v2774_v41 = vmul.f32 %v6269_v34, %v6267_v3  ;;  %v7517_v3 = vpack.c.bf16 %v3308_v12, %v3304_v36  ;;  %v3303_v34 = vld [vmem:[#allocation8 + $0xc0] sm:$0xff] }
 0xc75   :  { %2775 = vst [vmem:[#allocation2] sm:$0x1] %v2774_v41  ;;  %2905 = vmatmul.mubr.f32.vlgmr.msra.gmra.mrb[24].mxu0 %v2774_v41  ;;  %2976 = vmatmul.mubr.f32.vlgmr.msra.gmra.mrb[32].mxu1 %v2774_v41  ;;  %v3307_v41 = vld [vmem:[#allocation8 + $0xe0] sm:$0xff] }
 0xc76   :  { %5695 = vmatpush1.bf16.msra.mxu0 %v7274_v57  ;;  %5727 = vmatpush1.bf16.msra.mxu1 %v7356_v45 }
 0xc77   :  { %5697 = vmatprep.subr.bf16.mxu0 %v7277_v4  ;;  %5729 = vmatprep.subr.bf16.mxu1 %v7358_v60 }
 0xc78   :  { %3157 = vmatprep.mubr.f32.mxu0 %v6468_v7  ;;  %3228 = vmatprep.mubr.f32.mxu1 %v6468_v7 }
 0xc7a   :  { %5699 = vmatpush1.bf16.msra.mxu0 %v7281_v16  ;;  %5731 = vmatpush1.bf16.msra.mxu1 %v7364_v49 }
 0xc7b   :  { %5701 = vmatprep.subr.bf16.mxu0 %v7284_v23  ;;  %5733 = vmatprep.subr.bf16.mxu1 %v7368_v52 }
 0xc7e   :  { %5703 = vmatpush1.bf16.msra.mxu0 %v7287_v14  ;;  %5735 = vmatpush1.bf16.msra.mxu1 %v7373_v30 }
 0xc7f   :  { %5705 = vmatprep.subr.bf16.mxu0 %v7290_v11  ;;  %5737 = vmatprep.subr.bf16.mxu1 %v7376_v33 }
 0xc82   :  { %5707 = vmatpush1.bf16.msra.mxu0 %v7293_v46  ;;  %5739 = vmatpush1.bf16.msra.mxu1 %v7381_v17 }
 0xc83   :  { %5709 = vmatprep.subr.bf16.mxu0 %v7296_v54  ;;  %5741 = vmatprep.subr.bf16.mxu1 %v7384_v18 }
 0xc86   :  { %5711 = vmatpush1.bf16.msra.mxu0 %v7299_v53  ;;  %5743 = vmatpush1.bf16.msra.mxu1 %v7389_v56 }
 0xc87   :  { %5713 = vmatprep.subr.bf16.mxu0 %v7302_v58  ;;  %5745 = vmatprep.subr.bf16.mxu1 %v7392_v62 }
 0xc8a   :  { %5715 = vmatpush1.bf16.msra.mxu0 %v7305_v0  ;;  %5747 = vmatpush1.bf16.msra.mxu1 %v7395_v1 }
 0xc8b   :  { %5717 = vmatprep.subr.bf16.mxu0 %v7308_v10  ;;  %5749 = vmatprep.subr.bf16.mxu1 %v7398_v32 }
 0xc8e   :  { %5719 = vmatpush1.bf16.msra.mxu0 %v7311_v35  ;;  %5751 = vmatpush1.bf16.msra.mxu1 %v7401_v55 }
 0xc8f   :  { %5721 = vmatprep.subr.bf16.mxu0 %v7315_v29  ;;  %5753 = vmatprep.subr.bf16.mxu1 %v7404_v42 }
 0xc92   :  { %5723 = vmatpush1.bf16.msra.mxu0 %v7317_v39  ;;  %5755 = vmatpush1.bf16.msra.mxu1 %v7407_v47 }
 0xc93   :  { %5789 = vmatprep.subr.bf16.mxu1 %v7328_v28 }
 0xd48   :  { %v2906_v57 = vpop.f32.mrb[24].mxu0  ;;  %v2977_v4 = vpop.f32.mrb[32].mxu1 }
 0xd49   :  { %v2986_v16 = vrot.slane %v2906_v57, 7  ;;  %v2988_v23 = vrot.slane %v2977_v4, 7  ;;  %v2908_v14 = vpop.f32.mrb[25].mxu0  ;;  %v2979_v11 = vpop.f32.mrb[33].mxu1  ;;  %v7519_v57 = vpack.c.bf16 %v3307_v41, %v3303_v34  ;;  %v3312_v4 = vld [vmem:[#allocation8 + $0x108] sm:$0xff] }
 0xd4a   :  { %v2987_v46 = vrot.slane %v2908_v14, 7  ;;  %v2989_v54 = vrot.slane %v2979_v11, 7  ;;  %v3311_v14 = vld [vmem:[#allocation8 + $0x100] sm:$0xff] }
 0xd4b   :  { %v2994_v53 = vadd.f32 %v2986_v16, %v6886_v20  ;;  %v2996_v58 = vadd.f32 %v2988_v23, %v6890_v22  ;;  %v3316_v16 = vld [vmem:[#allocation8 + $0x128] sm:$0xff]  ;;  %v3315_v11 = vld [vmem:[#allocation8 + $0x120] sm:$0xff] }
 0xd4c   :  { %v2995_v0 = vadd.f32 %v2987_v46, %v6888_v21  ;;  %v2997_v10 = vadd.f32 %v2989_v54, %v6892_v26  ;;  %v7523_v23 = vpack.c.bf16 %v3316_v16, %v3312_v4  ;;  %v3320_v46 = vld [vmem:[#allocation8 + $0x148] sm:$0xff]  ;;  %v7525_v54 = vpack.c.bf16 %v3315_v11, %v3311_v14 }
 0xd4d   :  { %v4754_v35 = vmul.f32 -1.442695, %v2994_v53  ;;  %v3324_v53 = vld [vmem:[#allocation8 + $0x168] sm:$0xff] }
 0xd4e   :  { %v4755_v29 = vmul.f32 -1.442695, %v2995_v0  ;;  %v4756_v39 = vmul.f32 -1.442695, %v2997_v10  ;;  %v3323_v0 = vld [vmem:[#allocation8 + $0x160] sm:$0xff]  ;;  %v7528_v10 = vpack.c.bf16 %v3324_v53, %v3320_v46 }
 0xd4f   :  { %6270 = vpow2.f32 %v4754_v35  ;;  %v3328_v35 = vld [vmem:[#allocation8 + $0x188] sm:$0xff] }
 0xd50   :  { %6272 = vpow2.f32 %v4755_v29  ;;  %v3332_v29 = vld [vmem:[#allocation8 + $0x1a8] sm:$0xff] }
 0xd51   :  { %6274 = vpow2.f32 %v4756_v39 }
 0xd52   :  { %6276 = vtanh.f32 %v2996_v58  ;;  %v3319_v58 = vld [vmem:[#allocation8 + $0x140] sm:$0xff] }
 0xd53   :  { %v7531_v39 = vpack.c.bf16 %v3323_v0, %v3319_v58 }
 0xd59   :  { %v6271_v28 = vpop.eup %6270 }
 0xd5a   :  { %v6273_v9 = vpop.eup %6272  ;;  %v3001_v13 = vadd.f32 1.0, %v6271_v28  ;;  %v7534_v28 = vpack.c.bf16 %v3332_v29, %v3328_v35 }
 0xd5b   :  { %v3007_v24 = vadd.f32 1.0, %v6273_v9  ;;  %v6275_v40 = vpop.eup %6274  ;;  %v3327_v9 = vld [vmem:[#allocation8 + $0x180] sm:$0xff] }
 0xd5c   :  { %6278 = vrcp.f32 %v3001_v13  ;;  %v6277_v50 = vpop.eup %6276  ;;  %v3014_v15 = vadd.f32 1.0, %v6275_v40  ;;  %v3331_v13 = vld [vmem:[#allocation8 + $0x1a0] sm:$0xff]  ;;  %v3340_v40 = vld [vmem:[#allocation8 + $0x1e8] sm:$0xff] }
 0xd5d   :  { %6280 = vrcp.f32 %v3007_v24  ;;  %v3336_v24 = vld [vmem:[#allocation8 + $0x1c8] sm:$0xff] }
 0xd5e   :  { %6282 = vrcp.f32 %v3014_v15 }
 0xd66   :  { %v6279_v51 = vpop.eup %6278 }
 0xd67   :  { %v6281_v2 = vpop.eup %6280  ;;  %v3021_v6 = vmul.f32 %v6279_v51, %v6277_v50  ;;  %v7537_v50 = vpack.c.bf16 %v3331_v13, %v3327_v9  ;;  %v7540_v51 = vpack.c.bf16 %v3340_v40, %v3336_v24  ;;  %v3539_v9 = vld [vmem:[#allocation8 + $0x38] sm:$0xff]  ;;  %v3534_v24 = vld [vmem:[#allocation8 + $0x10] sm:$0xff] }
 0xd68   :  { %v3020_v43 = vmul.f32 %v6281_v2, %v3018_v63  ;;  %v6283_v19 = vpop.eup %6282  ;;  %v3335_v63 = vld [vmem:[#allocation8 + $0x1c0] sm:$0xff]  ;;  %v3538_v40 = vld [vmem:[#allocation8 + $0x30] sm:$0xff] }
 0xd69   :  { %v3339_v2 = vld [vmem:[#allocation8 + $0x1e0] sm:$0xff] }
 0xd6a   :  { %v7479_v37 = vadd.f32 %v3021_v6, %v3020_v43  ;;  %v7543_v6 = vpack.c.bf16 %v3339_v2, %v3335_v63  ;;  %v7576_v63 = vpack.c.bf16 %v3538_v40, %v3534_v24  ;;  %v3543_v2 = vld [vmem:[#allocation8 + $0x58] sm:$0xff]  ;;  %v3586_v24 = vld [vmem:[#allocation8 + $0x1b0] sm:$0xff] }
 0xd6b   :  { %v3591_v40 = vld [vmem:[#allocation8 + $0x1d8] sm:$0xff] }
 0xd6c   :  { %6284 = vtanh.f32 %v7479_v37  ;;  %v3271_v4 = vrot.slane %v7479_v37, 7  ;;  %v3535_v37 = vld [vmem:[#allocation8 + $0x18] sm:$0xff] }
 0xd6d   :  { %v7574_v13 = vpack.c.bf16 %v3539_v9, %v3535_v37  ;;  %v3582_v9 = vld [vmem:[#allocation8 + $0x190] sm:$0xff] }
 0xd76   :  { %v6285_v38 = vpop.eup %6284 }
 0xd77   :  { %v3024_v31 = vmul.f32 %v6285_v38, %v6283_v19 }
 0xd79   :  { %3025 = vst [vmem:[#allocation2] sm:$0x2] %v3024_v31  ;;  %v3091_v44 = vrot.slane %v3024_v31, 1 }
 0xd7b   :  { %3158 = vmatmul.mubr.f32.vlgmr.msra.gmra.mrb[26].mxu0 %v3091_v44  ;;  %3229 = vmatmul.mubr.f32.vlgmr.msra.gmra.mrb[34].mxu1 %v3091_v44 }
 0xd7c   :  { %5791 = vmatpush1.bf16.msra.mxu1 %v7356_v45  ;;  %3410 = vmatprep.mubr.f32.mxu0 %v6468_v7  ;;  %v3280_v45 = vld [vmem:[#allocation8 + $0x8] sm:$0xff] }
 0xd7d   :  { %5793 = vmatprep.subr.bf16.mxu1 %v7358_v60  ;;  %3481 = vmatprep.mubr.f32.mxu1 %v6468_v7  ;;  %v3284_v60 = vld [vmem:[#allocation8 + $0x28] sm:$0xff] }
 0xd80   :  { %5795 = vmatpush1.bf16.msra.mxu1 %v7364_v49  ;;  %v7499_v49 = vpack.c.bf16 %v3284_v60, %v3280_v45 }
 0xd81   :  { %5797 = vmatprep.subr.bf16.mxu1 %v7368_v52  ;;  %v3279_v52 = vld [vmem:[#allocation8] sm:$0xff] }
 0xd82   :  { %5757 = vmatprep.subr.bf16.mxu0 %v7499_v49 }
 0xd84   :  { %5799 = vmatpush1.bf16.msra.mxu1 %v7373_v30  ;;  %v3283_v30 = vld [vmem:[#allocation8 + $0x20] sm:$0xff] }
 0xd85   :  { %5801 = vmatprep.subr.bf16.mxu1 %v7376_v33  ;;  %v7501_v33 = vpack.c.bf16 %v3283_v30, %v3279_v52 }
 0xd87   :  { %5759 = vmatpush1.bf16.msra.mxu0 %v7501_v33 }
 0xd88   :  { %5803 = vmatpush1.bf16.msra.mxu1 %v7381_v17  ;;  %v3288_v17 = vld [vmem:[#allocation8 + $0x48] sm:$0xff] }
 0xd89   :  { %5805 = vmatprep.subr.bf16.mxu1 %v7384_v18  ;;  %v3292_v18 = vld [vmem:[#allocation8 + $0x68] sm:$0xff] }
 0xd8c   :  { %5807 = vmatpush1.bf16.msra.mxu1 %v7389_v56  ;;  %v7505_v56 = vpack.c.bf16 %v3292_v18, %v3288_v17 }
 0xd8d   :  { %5809 = vmatprep.subr.bf16.mxu1 %v7392_v62  ;;  %v3287_v62 = vld [vmem:[#allocation8 + $0x40] sm:$0xff] }
 0xd8e   :  { %5761 = vmatprep.subr.bf16.mxu0 %v7505_v56 }
 0xd90   :  { %5811 = vmatpush1.bf16.msra.mxu1 %v7395_v1  ;;  %v3291_v1 = vld [vmem:[#allocation8 + $0x60] sm:$0xff] }
 0xd91   :  { %5813 = vmatprep.subr.bf16.mxu1 %v7398_v32  ;;  %v7507_v32 = vpack.c.bf16 %v3291_v1, %v3287_v62 }
 0xd93   :  { %5763 = vmatpush1.bf16.msra.mxu0 %v7507_v32 }
 0xd94   :  { %5815 = vmatpush1.bf16.msra.mxu1 %v7401_v55  ;;  %v3296_v55 = vld [vmem:[#allocation8 + $0x88] sm:$0xff] }
 0xd95   :  { %5817 = vmatprep.subr.bf16.mxu1 %v7404_v42  ;;  %v3300_v42 = vld [vmem:[#allocation8 + $0xa8] sm:$0xff] }
 0xd98   :  { %5819 = vmatpush1.bf16.msra.mxu1 %v7407_v47  ;;  %v7511_v47 = vpack.c.bf16 %v3300_v42, %v3296_v55 }
 0xd99   :  { %5853 = vmatprep.subr.bf16.mxu1 %v7574_v13 }
 0xd9a   :  { %5765 = vmatprep.subr.bf16.mxu0 %v7511_v47 }
 0xd9b   :  { %5767 = vmatpush1.bf16.msra.mxu0 %v7513_v27 }
 0xd9c   :  { %5769 = vmatprep.subr.bf16.mxu0 %v7517_v3 }
 0xd9f   :  { %5771 = vmatpush1.bf16.msra.mxu0 %v7519_v57 }
 0xda0   :  { %5773 = vmatprep.subr.bf16.mxu0 %v7523_v23 }
 0xda3   :  { %5775 = vmatpush1.bf16.msra.mxu0 %v7525_v54 }
 0xda4   :  { %5777 = vmatprep.subr.bf16.mxu0 %v7528_v10 }
 0xda7   :  { %5779 = vmatpush1.bf16.msra.mxu0 %v7531_v39 }
 0xda8   :  { %5781 = vmatprep.subr.bf16.mxu0 %v7534_v28 }
 0xdab   :  { %5783 = vmatpush1.bf16.msra.mxu0 %v7537_v50 }
 0xdac   :  { %5785 = vmatprep.subr.bf16.mxu0 %v7540_v51 }
 0xdaf   :  { %5787 = vmatpush1.bf16.msra.mxu0 %v7543_v6 }
 0xdb0   :  { %5821 = vmatprep.subr.bf16.mxu0 %v7499_v49 }
 0xe4e   :  { %v3159_v15 = vpop.f32.mrb[26].mxu0  ;;  %v3230_v43 = vpop.f32.mrb[34].mxu1 }
 0xe4f   :  { %v3239_v19 = vrot.slane %v3159_v15, 6  ;;  %v3241_v38 = vrot.slane %v3230_v43, 6  ;;  %v3161_v31 = vpop.f32.mrb[27].mxu0  ;;  %v3232_v44 = vpop.f32.mrb[35].mxu1  ;;  %v3547_v15 = vld [vmem:[#allocation8 + $0x78] sm:$0xff] }
 0xe50   :  { %v3240_v45 = vrot.slane %v3161_v31, 6  ;;  %v3242_v60 = vrot.slane %v3232_v44, 6  ;;  %v7580_v43 = vpack.c.bf16 %v3547_v15, %v3543_v2  ;;  %v3551_v44 = vld [vmem:[#allocation8 + $0x98] sm:$0xff]  ;;  %v7612_v15 = vpack.c.bf16 %v3586_v24, %v3582_v9 }
 0xe51   :  { %v3247_v52 = vadd.f32 %v3239_v19, %v6886_v20  ;;  %v3249_v30 = vadd.f32 %v3241_v38, %v6890_v22  ;;  %v3542_v19 = vld [vmem:[#allocation8 + $0x50] sm:$0xff]  ;;  %v3595_v2 = vld [vmem:[#allocation8 + $0x1f8] sm:$0xff] }
 0xe52   :  { %v3248_v17 = vadd.f32 %v3240_v45, %v6888_v21  ;;  %v3250_v18 = vadd.f32 %v3242_v60, %v6892_v26  ;;  %v3546_v38 = vld [vmem:[#allocation8 + $0x70] sm:$0xff]  ;;  %v3555_v45 = vld [vmem:[#allocation8 + $0xb8] sm:$0xff] }
 0xe53   :  { %v4757_v62 = vmul.f32 -1.442695, %v3247_v52  ;;  %v7582_v31 = vpack.c.bf16 %v3546_v38, %v3542_v19  ;;  %v7586_v60 = vpack.c.bf16 %v3555_v45, %v3551_v44  ;;  %v3550_v52 = vld [vmem:[#allocation8 + $0x90] sm:$0xff]  ;;  %v7615_v19 = vpack.c.bf16 %v3595_v2, %v3591_v40 }
 0xe54   :  { %v4758_v1 = vmul.f32 -1.442695, %v3248_v17  ;;  %v4759_v55 = vmul.f32 -1.442695, %v3250_v18  ;;  %v3559_v18 = vld [vmem:[#allocation8 + $0xd8] sm:$0xff]  ;;  %v3590_v38 = vld [vmem:[#allocation8 + $0x1d0] sm:$0xff] }
 0xe55   :  { %6286 = vpow2.f32 %v4757_v62  ;;  %v3563_v62 = vld [vmem:[#allocation8 + $0xf8] sm:$0xff]  ;;  %v3594_v44 = vld [vmem:[#allocation8 + $0x1f0] sm:$0xff] }
 0xe56   :  { %6288 = vpow2.f32 %v4758_v1  ;;  %v7592_v1 = vpack.c.bf16 %v3563_v62, %v3559_v18  ;;  %v7618_v45 = vpack.c.bf16 %v3594_v44, %v3590_v38 }
 0xe57   :  { %6290 = vpow2.f32 %v4759_v55  ;;  %v3558_v55 = vld [vmem:[#allocation8 + $0xd0] sm:$0xff] }
 0xe58   :  { %6292 = vtanh.f32 %v3249_v30  ;;  %v3554_v30 = vld [vmem:[#allocation8 + $0xb0] sm:$0xff] }
 0xe59   :  { %v7588_v17 = vpack.c.bf16 %v3554_v30, %v3550_v52 }
 0xe5f   :  { %v6287_v42 = vpop.eup %6286 }
 0xe60   :  { %v6289_v61 = vpop.eup %6288  ;;  %v3254_v25 = vadd.f32 1.0, %v6287_v42  ;;  %v3562_v42 = vld [vmem:[#allocation8 + $0xf0] sm:$0xff] }
 0xe61   :  { %v3260_v36 = vadd.f32 1.0, %v6289_v61  ;;  %v6291_v12 = vpop.eup %6290  ;;  %v7594_v61 = vpack.c.bf16 %v3562_v42, %v3558_v55 }
 0xe62   :  { %6294 = vrcp.f32 %v3254_v25  ;;  %v6293_v34 = vpop.eup %6292  ;;  %v3267_v11 = vadd.f32 1.0, %v6291_v12  ;;  %v3567_v25 = vld [vmem:[#allocation8 + $0x118] sm:$0xff] }
 0xe63   :  { %6296 = vrcp.f32 %v3260_v36  ;;  %v3571_v36 = vld [vmem:[#allocation8 + $0x138] sm:$0xff] }
 0xe64   :  { %6298 = vrcp.f32 %v3267_v11  ;;  %v7598_v12 = vpack.c.bf16 %v3571_v36, %v3567_v25  ;;  %v3574_v11 = vld [vmem:[#allocation8 + $0x150] sm:$0xff] }
 0xe6c   :  { %v6295_v41 = vpop.eup %6294 }
 0xe6d   :  { %v6297_v16 = vpop.eup %6296  ;;  %v3274_v14 = vmul.f32 %v6295_v41, %v6293_v34  ;;  %v3566_v34 = vld [vmem:[#allocation8 + $0x110] sm:$0xff] }
 0xe6e   :  { %v3273_v46 = vmul.f32 %v6297_v16, %v3271_v4  ;;  %v6299_v58 = vpop.eup %6298  ;;  %v3570_v41 = vld [vmem:[#allocation8 + $0x130] sm:$0xff]  ;;  %v3575_v4 = vld [vmem:[#allocation8 + $0x158] sm:$0xff] }
 0xe6f   :  { %v7600_v16 = vpack.c.bf16 %v3570_v41, %v3566_v34 }
 0xe70   :  { %v7553_v53 = vadd.f32 %v3274_v14, %v3273_v46  ;;  %v3579_v14 = vld [vmem:[#allocation8 + $0x178] sm:$0xff]  ;;  %v3578_v46 = vld [vmem:[#allocation8 + $0x170] sm:$0xff] }
 0xe72   :  { %6300 = vtanh.f32 %v7553_v53 }
 0xe7c   :  { %v6301_v0 = vpop.eup %6300 }
 0xe7d   :  { %v3277_v35 = vmul.f32 %v6301_v0, %v6299_v58  ;;  %v7603_v58 = vpack.c.bf16 %v3579_v14, %v3575_v4  ;;  %v3583_v0 = vld [vmem:[#allocation8 + $0x198] sm:$0xff] }
 0xe7f   :  { %3278 = vst [vmem:[#allocation2] sm:$0x4] %v3277_v35  ;;  %v3344_v29 = vrot.slane %v3277_v35, 2  ;;  %v3587_v35 = vld [vmem:[#allocation8 + $0x1b8] sm:$0xff] }
 0xe80   :  { %v7609_v37 = vpack.c.bf16 %v3587_v35, %v3583_v0 }
 0xe81   :  { %3411 = vmatmul.mubr.f32.vlgmr.msra.gmra.mrb[28].mxu0 %v3344_v29  ;;  %3482 = vmatmul.mubr.f32.vlgmr.msra.gmra.mrb[36].mxu1 %v3344_v29  ;;  %v7606_v29 = vpack.c.bf16 %v3578_v46, %v3574_v11 }
 0xe82   :  { %5823 = vmatpush1.bf16.msra.mxu0 %v7501_v33  ;;  %3663 = vmatprep.mubr.f32.mxu0 %v6468_v7 }
 0xe83   :  { %5825 = vmatprep.subr.bf16.mxu0 %v7505_v56  ;;  %3734 = vmatprep.mubr.f32.mxu1 %v6468_v7 }
 0xe84   :  { %5855 = vmatpush1.bf16.msra.mxu1 %v7576_v63 }
 0xe85   :  { %5857 = vmatprep.subr.bf16.mxu1 %v7580_v43 }
 0xe86   :  { %5827 = vmatpush1.bf16.msra.mxu0 %v7507_v32 }
 0xe87   :  { %5829 = vmatprep.subr.bf16.mxu0 %v7511_v47 }
 0xe88   :  { %5859 = vmatpush1.bf16.msra.mxu1 %v7582_v31 }
 0xe89   :  { %5861 = vmatprep.subr.bf16.mxu1 %v7586_v60 }
 0xe8a   :  { %5831 = vmatpush1.bf16.msra.mxu0 %v7513_v27 }
 0xe8b   :  { %5833 = vmatprep.subr.bf16.mxu0 %v7517_v3 }
 0xe8c   :  { %5863 = vmatpush1.bf16.msra.mxu1 %v7588_v17 }
 0xe8d   :  { %5865 = vmatprep.subr.bf16.mxu1 %v7592_v1 }
 0xe8e   :  { %5835 = vmatpush1.bf16.msra.mxu0 %v7519_v57 }
 0xe8f   :  { %5837 = vmatprep.subr.bf16.mxu0 %v7523_v23 }
 0xe90   :  { %5867 = vmatpush1.bf16.msra.mxu1 %v7594_v61 }
 0xe91   :  { %5869 = vmatprep.subr.bf16.mxu1 %v7598_v12 }
 0xe92   :  { %5839 = vmatpush1.bf16.msra.mxu0 %v7525_v54 }
 0xe93   :  { %5841 = vmatprep.subr.bf16.mxu0 %v7528_v10 }
 0xe94   :  { %5871 = vmatpush1.bf16.msra.mxu1 %v7600_v16 }
 0xe95   :  { %5873 = vmatprep.subr.bf16.mxu1 %v7603_v58 }
 0xe96   :  { %5843 = vmatpush1.bf16.msra.mxu0 %v7531_v39 }
 0xe97   :  { %5845 = vmatprep.subr.bf16.mxu0 %v7534_v28 }
 0xe98   :  { %5875 = vmatpush1.bf16.msra.mxu1 %v7606_v29 }
 0xe99   :  { %5877 = vmatprep.subr.bf16.mxu1 %v7609_v37 }
 0xe9a   :  { %5847 = vmatpush1.bf16.msra.mxu0 %v7537_v50 }
 0xe9b   :  { %5849 = vmatprep.subr.bf16.mxu0 %v7540_v51 }
 0xe9c   :  { %5879 = vmatpush1.bf16.msra.mxu1 %v7612_v15 }
 0xe9d   :  { %5881 = vmatprep.subr.bf16.mxu1 %v7615_v19 }
 0xe9e   :  { %5851 = vmatpush1.bf16.msra.mxu0 %v7543_v6 }
 0xe9f   :  { %5885 = vmatprep.subr.bf16.mxu0 %v7499_v49 }
 0xea0   :  { %5883 = vmatpush1.bf16.msra.mxu1 %v7618_v45 }
 0xea1   :  { %5917 = vmatprep.subr.bf16.mxu1 %v7574_v13 }
 0xf54   :  { %v3412_v52 = vpop.f32.mrb[28].mxu0  ;;  %v3483_v30 = vpop.f32.mrb[36].mxu1 }
 0xf55   :  { %v3492_v18 = vrot.slane %v3412_v52, 5  ;;  %v3494_v62 = vrot.slane %v3483_v30, 5  ;;  %v3414_v55 = vpop.f32.mrb[29].mxu0  ;;  %v3485_v42 = vpop.f32.mrb[37].mxu1  ;;  %v3524_v52 = vrot.slane %v7553_v53, 7 }
 0xf56   :  { %v3493_v25 = vrot.slane %v3414_v55, 5  ;;  %v3495_v36 = vrot.slane %v3485_v42, 5 }
 0xf57   :  { %v3500_v34 = vadd.f32 %v3492_v18, %v6886_v20  ;;  %v3502_v41 = vadd.f32 %v3494_v62, %v6890_v22 }
 0xf58   :  { %v3501_v4 = vadd.f32 %v3493_v25, %v6888_v21  ;;  %v3503_v14 = vadd.f32 %v3495_v36, %v6892_v26 }
 0xf59   :  { %v4760_v11 = vmul.f32 -1.442695, %v3500_v34 }
 0xf5a   :  { %v4761_v46 = vmul.f32 -1.442695, %v3501_v4  ;;  %v4762_v0 = vmul.f32 -1.442695, %v3503_v14 }
 0xf5b   :  { %6302 = vpow2.f32 %v4760_v11 }
 0xf5c   :  { %6304 = vpow2.f32 %v4761_v46 }
 0xf5d   :  { %6306 = vpow2.f32 %v4762_v0 }
 0xf5e   :  { %6308 = vtanh.f32 %v3502_v41 }
 0xf65   :  { %v6303_v35 = vpop.eup %6302 }
 0xf66   :  { %v6305_v9 = vpop.eup %6304  ;;  %v3507_v24 = vadd.f32 1.0, %v6303_v35 }
 0xf67   :  { %v3513_v40 = vadd.f32 1.0, %v6305_v9  ;;  %v6307_v2 = vpop.eup %6306 }
 0xf68   :  { %6310 = vrcp.f32 %v3507_v24  ;;  %v6309_v38 = vpop.eup %6308  ;;  %v3520_v62 = vadd.f32 1.0, %v6307_v2 }
 0xf69   :  { %6312 = vrcp.f32 %v3513_v40 }
 0xf6a   :  { %6314 = vrcp.f32 %v3520_v62 }
 0xf72   :  { %v6311_v44 = vpop.eup %6310 }
 0xf73   :  { %v6313_v30 = vpop.eup %6312  ;;  %v3527_v18 = vmul.f32 %v6311_v44, %v6309_v38 }
 0xf74   :  { %v3526_v55 = vmul.f32 %v6313_v30, %v3524_v52  ;;  %v6315_v25 = vpop.eup %6314 }
 0xf76   :  { %v7628_v42 = vadd.f32 %v3527_v18, %v3526_v55 }
 0xf78   :  { %6316 = vtanh.f32 %v7628_v42 }
 0xf82   :  { %v6317_v36 = vpop.eup %6316 }
 0xf83   :  { %v3530_v34 = vmul.f32 %v6317_v36, %v6315_v25 }
 0xf85   :  { %3531 = vst [vmem:[#allocation2] sm:$0x8] %v3530_v34  ;;  %v3597_v41 = vrot.slane %v3530_v34, 3 }
 0xf87   :  { %3664 = vmatmul.mubr.f32.vlgmr.msra.gmra.mrb[30].mxu0 %v3597_v41  ;;  %3735 = vmatmul.mubr.f32.vlgmr.msra.gmra.mrb[38].mxu1 %v3597_v41  ;;  %v3777_v41 = vrot.slane %v7628_v42, 7 }
 0xf88   :  { %5887 = vmatpush1.bf16.msra.mxu0 %v7501_v33  ;;  %5919 = vmatpush1.bf16.msra.mxu1 %v7576_v63 }
 0xf89   :  { %5889 = vmatprep.subr.bf16.mxu0 %v7505_v56  ;;  %5921 = vmatprep.subr.bf16.mxu1 %v7580_v43 }
 0xf8a   :  { %3916 = vmatprep.mubr.f32.mxu0 %v6468_v7  ;;  %3987 = vmatprep.mubr.f32.mxu1 %v6468_v7 }
 0xf8c   :  { %5891 = vmatpush1.bf16.msra.mxu0 %v7507_v32  ;;  %5923 = vmatpush1.bf16.msra.mxu1 %v7582_v31 }
 0xf8d   :  { %5893 = vmatprep.subr.bf16.mxu0 %v7511_v47  ;;  %5925 = vmatprep.subr.bf16.mxu1 %v7586_v60 }
 0xf90   :  { %5895 = vmatpush1.bf16.msra.mxu0 %v7513_v27  ;;  %5927 = vmatpush1.bf16.msra.mxu1 %v7588_v17 }
 0xf91   :  { %5897 = vmatprep.subr.bf16.mxu0 %v7517_v3  ;;  %5929 = vmatprep.subr.bf16.mxu1 %v7592_v1 }
 0xf94   :  { %5899 = vmatpush1.bf16.msra.mxu0 %v7519_v57  ;;  %5931 = vmatpush1.bf16.msra.mxu1 %v7594_v61 }
 0xf95   :  { %5901 = vmatprep.subr.bf16.mxu0 %v7523_v23  ;;  %5933 = vmatprep.subr.bf16.mxu1 %v7598_v12 }
 0xf98   :  { %5903 = vmatpush1.bf16.msra.mxu0 %v7525_v54  ;;  %5935 = vmatpush1.bf16.msra.mxu1 %v7600_v16 }
 0xf99   :  { %5905 = vmatprep.subr.bf16.mxu0 %v7528_v10  ;;  %5937 = vmatprep.subr.bf16.mxu1 %v7603_v58 }
 0xf9c   :  { %5907 = vmatpush1.bf16.msra.mxu0 %v7531_v39  ;;  %5939 = vmatpush1.bf16.msra.mxu1 %v7606_v29 }
 0xf9d   :  { %5909 = vmatprep.subr.bf16.mxu0 %v7534_v28  ;;  %5941 = vmatprep.subr.bf16.mxu1 %v7609_v37 }
 0xfa0   :  { %5911 = vmatpush1.bf16.msra.mxu0 %v7537_v50  ;;  %5943 = vmatpush1.bf16.msra.mxu1 %v7612_v15 }
 0xfa1   :  { %5913 = vmatprep.subr.bf16.mxu0 %v7540_v51  ;;  %5945 = vmatprep.subr.bf16.mxu1 %v7615_v19 }
 0xfa4   :  { %5915 = vmatpush1.bf16.msra.mxu0 %v7543_v6  ;;  %5947 = vmatpush1.bf16.msra.mxu1 %v7618_v45 }
 0xfa5   :  { %5949 = vmatprep.subr.bf16.mxu0 %v7499_v49  ;;  %5981 = vmatprep.subr.bf16.mxu1 %v7574_v13 }
0x105a   :  { %v3665_v53 = vpop.f32.mrb[30].mxu0  ;;  %v3736_v4 = vpop.f32.mrb[38].mxu1 }
0x105b   :  { %v3745_v14 = vrot.slane %v3665_v53, 4  ;;  %v3747_v11 = vrot.slane %v3736_v4, 4  ;;  %v3667_v46 = vpop.f32.mrb[31].mxu0  ;;  %v3738_v0 = vpop.f32.mrb[39].mxu1 }
0x105c   :  { %v3746_v35 = vrot.slane %v3667_v46, 4  ;;  %v3748_v9 = vrot.slane %v3738_v0, 4 }
0x105d   :  { %v3753_v24 = vadd.f32 %v3745_v14, %v6886_v20  ;;  %v3755_v40 = vadd.f32 %v3747_v11, %v6890_v22 }
0x105e   :  { %v3754_v2 = vadd.f32 %v3746_v35, %v6888_v21  ;;  %v3756_v38 = vadd.f32 %v3748_v9, %v6892_v26 }
0x105f   :  { %v4763_v44 = vmul.f32 -1.442695, %v3753_v24 }
0x1060   :  { %v4764_v49 = vmul.f32 -1.442695, %v3754_v2  ;;  %v4765_v52 = vmul.f32 -1.442695, %v3756_v38 }
0x1061   :  { %6318 = vpow2.f32 %v4763_v44 }
0x1062   :  { %6320 = vpow2.f32 %v4764_v49 }
0x1063   :  { %6322 = vpow2.f32 %v4765_v52 }
0x1064   :  { %6324 = vtanh.f32 %v3755_v40 }
0x106b   :  { %v6319_v30 = vpop.eup %6318 }
0x106c   :  { %v6321_v18 = vpop.eup %6320  ;;  %v3760_v62 = vadd.f32 1.0, %v6319_v30 }
0x106d   :  { %v3766_v55 = vadd.f32 1.0, %v6321_v18  ;;  %v6323_v25 = vpop.eup %6322 }
0x106e   :  { %6326 = vrcp.f32 %v3760_v62  ;;  %v6325_v36 = vpop.eup %6324  ;;  %v3773_v14 = vadd.f32 1.0, %v6323_v25 }
0x106f   :  { %6328 = vrcp.f32 %v3766_v55 }
0x1070   :  { %6330 = vrcp.f32 %v3773_v14  ;;  %v4311_v14 = vld [vmem:[#allocation8 + $0xa0] sm:$0xff] }
0x1078   :  { %v6327_v34 = vpop.eup %6326 }
0x1079   :  { %v6329_v53 = vpop.eup %6328  ;;  %v3780_v4 = vmul.f32 %v6327_v34, %v6325_v36 }
0x107a   :  { %v3779_v11 = vmul.f32 %v6329_v53, %v3777_v41  ;;  %v6331_v0 = vpop.eup %6330 }
0x107c   :  { %v7670_v46 = vadd.f32 %v3780_v4, %v3779_v11 }
0x107e   :  { %6332 = vtanh.f32 %v7670_v46  ;;  %v4030_v52 = vrot.slane %v7670_v46, 7  ;;  %v4316_v46 = vld [vmem:[#allocation8 + $0xc8] sm:$0xff] }
0x1088   :  { %v6333_v35 = vpop.eup %6332 }
0x1089   :  { %v3783_v9 = vmul.f32 %v6333_v35, %v6331_v0  ;;  %v4320_v0 = vld [vmem:[#allocation8 + $0xe8] sm:$0xff] }
0x108a   :  { %v6024_v35 = vpack.c.bf16 %v4320_v0, %v4316_v46 }
0x108b   :  { %3784 = vst [vmem:[#allocation2] sm:$0x10] %v3783_v9  ;;  %v3850_v24 = vrot.slane %v3783_v9, 4  ;;  %v4315_v9 = vld [vmem:[#allocation8 + $0xc0] sm:$0xff] }
0x108d   :  { %3917 = vmatmul.mubr.f32.vlgmr.msra.gmra.mrb[32].mxu0 %v3850_v24  ;;  %3988 = vmatmul.mubr.f32.vlgmr.msra.gmra.mrb[40].mxu1 %v3850_v24  ;;  %v4319_v24 = vld [vmem:[#allocation8 + $0xe0] sm:$0xff] }
0x108e   :  { %5951 = vmatpush1.bf16.msra.mxu0 %v7501_v33  ;;  %5983 = vmatpush1.bf16.msra.mxu1 %v7576_v63 }
0x108f   :  { %5953 = vmatprep.subr.bf16.mxu0 %v7505_v56  ;;  %5985 = vmatprep.subr.bf16.mxu1 %v7580_v43 }
0x1090   :  { %4169 = vmatprep.mubr.f32.mxu0 %v6468_v7  ;;  %4240 = vmatprep.mubr.f32.mxu1 %v6468_v7 }
0x1092   :  { %5955 = vmatpush1.bf16.msra.mxu0 %v7507_v32  ;;  %5987 = vmatpush1.bf16.msra.mxu1 %v7582_v31 }
0x1093   :  { %5957 = vmatprep.subr.bf16.mxu0 %v7511_v47  ;;  %5989 = vmatprep.subr.bf16.mxu1 %v7586_v60 }
0x1096   :  { %5959 = vmatpush1.bf16.msra.mxu0 %v7513_v27  ;;  %5991 = vmatpush1.bf16.msra.mxu1 %v7588_v17 }
0x1097   :  { %5961 = vmatprep.subr.bf16.mxu0 %v7517_v3  ;;  %5993 = vmatprep.subr.bf16.mxu1 %v7592_v1 }
0x109a   :  { %5963 = vmatpush1.bf16.msra.mxu0 %v7519_v57  ;;  %5995 = vmatpush1.bf16.msra.mxu1 %v7594_v61 }
0x109b   :  { %5965 = vmatprep.subr.bf16.mxu0 %v7523_v23  ;;  %5997 = vmatprep.subr.bf16.mxu1 %v7598_v12 }
0x109e   :  { %5967 = vmatpush1.bf16.msra.mxu0 %v7525_v54  ;;  %5999 = vmatpush1.bf16.msra.mxu1 %v7600_v16 }
0x109f   :  { %5969 = vmatprep.subr.bf16.mxu0 %v7528_v10  ;;  %6001 = vmatprep.subr.bf16.mxu1 %v7603_v58 }
0x10a2   :  { %5971 = vmatpush1.bf16.msra.mxu0 %v7531_v39  ;;  %6003 = vmatpush1.bf16.msra.mxu1 %v7606_v29 }
0x10a3   :  { %5973 = vmatprep.subr.bf16.mxu0 %v7534_v28  ;;  %6005 = vmatprep.subr.bf16.mxu1 %v7609_v37 }
0x10a6   :  { %5975 = vmatpush1.bf16.msra.mxu0 %v7537_v50  ;;  %6007 = vmatpush1.bf16.msra.mxu1 %v7612_v15 }
0x10a7   :  { %5977 = vmatprep.subr.bf16.mxu0 %v7540_v51  ;;  %6009 = vmatprep.subr.bf16.mxu1 %v7615_v19 }
0x10aa   :  { %5979 = vmatpush1.bf16.msra.mxu0 %v7543_v6  ;;  %6011 = vmatpush1.bf16.msra.mxu1 %v7618_v45 }
0x10ab   :  { %6045 = vmatprep.subr.bf16.mxu1 %v7574_v13 }
0x1160   :  { %v3918_v33 = vpop.f32.mrb[32].mxu0  ;;  %v3989_v56 = vpop.f32.mrb[40].mxu1 }
0x1161   :  { %v3998_v32 = vrot.slane %v3918_v33, 3  ;;  %v4000_v47 = vrot.slane %v3989_v56, 3  ;;  %v3920_v27 = vpop.f32.mrb[33].mxu0  ;;  %v3991_v3 = vpop.f32.mrb[41].mxu1  ;;  %v6026_v33 = vpack.c.bf16 %v4319_v24, %v4315_v9  ;;  %v4324_v56 = vld [vmem:[#allocation8 + $0x108] sm:$0xff] }
0x1162   :  { %v3999_v57 = vrot.slane %v3920_v27, 3  ;;  %v4001_v23 = vrot.slane %v3991_v3, 3  ;;  %v4323_v27 = vld [vmem:[#allocation8 + $0x100] sm:$0xff] }
0x1163   :  { %v4006_v54 = vadd.f32 %v3998_v32, %v6886_v20  ;;  %v4008_v10 = vadd.f32 %v4000_v47, %v6890_v22  ;;  %v4328_v32 = vld [vmem:[#allocation8 + $0x128] sm:$0xff]  ;;  %v4327_v3 = vld [vmem:[#allocation8 + $0x120] sm:$0xff] }
0x1164   :  { %v4007_v39 = vadd.f32 %v3999_v57, %v6888_v21  ;;  %v4009_v28 = vadd.f32 %v4001_v23, %v6892_v26  ;;  %v6028_v47 = vpack.c.bf16 %v4328_v32, %v4324_v56  ;;  %v4332_v57 = vld [vmem:[#allocation8 + $0x148] sm:$0xff]  ;;  %v6030_v23 = vpack.c.bf16 %v4327_v3, %v4323_v27 }
0x1165   :  { %v4766_v50 = vmul.f32 -1.442695, %v4006_v54  ;;  %v4336_v54 = vld [vmem:[#allocation8 + $0x168] sm:$0xff] }
0x1166   :  { %v4767_v51 = vmul.f32 -1.442695, %v4007_v39  ;;  %v4768_v6 = vmul.f32 -1.442695, %v4009_v28  ;;  %v4335_v39 = vld [vmem:[#allocation8 + $0x160] sm:$0xff]  ;;  %v6032_v28 = vpack.c.bf16 %v4336_v54, %v4332_v57  ;;  %v4547_v3 = vld [vmem:[%s7845_s11 + $0x10] sm:$0xff] }
0x1167   :  { %6334 = vpow2.f32 %v4766_v50  ;;  %v4340_v50 = vld [vmem:[#allocation8 + $0x188] sm:$0xff]  ;;  %v4550_v54 = vld [vmem:[%s7845_s11 + $0x28] sm:$0xff] }
0x1168   :  { %6336 = vpow2.f32 %v4767_v51  ;;  %v4344_v51 = vld [vmem:[#allocation8 + $0x1a8] sm:$0xff] }
0x1169   :  { %6338 = vpow2.f32 %v4768_v6 }
0x116a   :  { %6340 = vtanh.f32 %v4008_v10  ;;  %v4331_v10 = vld [vmem:[#allocation8 + $0x140] sm:$0xff] }
0x116b   :  { %v6034_v6 = vpack.c.bf16 %v4335_v39, %v4331_v10  ;;  %v4551_v39 = vld [vmem:[%s7845_s11 + $0x30] sm:$0xff] }
0x1171   :  { %v6335_v13 = vpop.eup %6334 }
0x1172   :  { %v6337_v42 = vpop.eup %6336  ;;  %v4013_v40 = vadd.f32 1.0, %v6335_v13  ;;  %v6036_v13 = vpack.c.bf16 %v4344_v51, %v4340_v50  ;;  %v4553_v51 = vld [vmem:[%s7845_s11 + $0x40] sm:$0xff] }
0x1173   :  { %v4019_v2 = vadd.f32 1.0, %v6337_v42  ;;  %v6339_v38 = vpop.eup %6338  ;;  %v4339_v42 = vld [vmem:[#allocation8 + $0x180] sm:$0xff] }
0x1174   :  { %6342 = vrcp.f32 %v4013_v40  ;;  %v6341_v44 = vpop.eup %6340  ;;  %v4026_v62 = vadd.f32 1.0, %v6339_v38  ;;  %v4343_v40 = vld [vmem:[#allocation8 + $0x1a0] sm:$0xff]  ;;  %v4352_v38 = vld [vmem:[#allocation8 + $0x1e8] sm:$0xff] }
0x1175   :  { %6344 = vrcp.f32 %v4019_v2  ;;  %v4348_v2 = vld [vmem:[#allocation8 + $0x1c8] sm:$0xff] }
0x1176   :  { %6346 = vrcp.f32 %v4026_v62 }
0x117e   :  { %v6343_v49 = vpop.eup %6342 }
0x117f   :  { %v6345_v30 = vpop.eup %6344  ;;  %v4033_v18 = vmul.f32 %v6343_v49, %v6341_v44  ;;  %v6038_v44 = vpack.c.bf16 %v4343_v40, %v4339_v42  ;;  %v6040_v49 = vpack.c.bf16 %v4352_v38, %v4348_v2  ;;  %v4555_v42 = vld [vmem:[%s7845_s11 + $0x50] sm:$0xff]  ;;  %v4556_v40 = vld [vmem:[%s7845_s11 + $0x58] sm:$0xff]  ;;  %v4557_v38 = vld [vmem:[%s7845_s11 + $0x60] sm:$0xff] }
0x1180   :  { %v4032_v55 = vmul.f32 %v6345_v30, %v4030_v52  ;;  %v6347_v36 = vpop.eup %6346  ;;  %v4347_v52 = vld [vmem:[#allocation8 + $0x1c0] sm:$0xff]  ;;  %v6092_v2 = vpack.c.bf16 %v4556_v40, %v4555_v42 }
0x1181   :  { %v4351_v30 = vld [vmem:[#allocation8 + $0x1e0] sm:$0xff] }
0x1182   :  { %v7711_v25 = vadd.f32 %v4033_v18, %v4032_v55  ;;  %v6042_v18 = vpack.c.bf16 %v4351_v30, %v4347_v52  ;;  %v4559_v52 = vld [vmem:[%s7845_s11 + $0x70] sm:$0xff]  ;;  %v4560_v30 = vld [vmem:[%s7845_s11 + $0x78] sm:$0xff] }
0x1184   :  { %6348 = vtanh.f32 %v7711_v25 }
0x118e   :  { %v6349_v34 = vpop.eup %6348 }
0x118f   :  { %v4036_v41 = vmul.f32 %v6349_v34, %v6347_v36 }
0x1191   :  { %4037 = vst [vmem:[#allocation2] sm:$0x20] %v4036_v41  ;;  %v4103_v53 = vrot.slane %v4036_v41, 5 }
0x1193   :  { %4170 = vmatmul.mubr.f32.vlgmr.msra.gmra.mrb[34].mxu0 %v4103_v53  ;;  %4241 = vmatmul.mubr.f32.vlgmr.msra.gmra.mrb[42].mxu1 %v4103_v53 }
0x1194   :  { %6047 = vmatpush1.bf16.msra.mxu1 %v7576_v63  ;;  %4422 = vmatprep.mubr.f32.mxu0 %v6468_v7  ;;  %v4292_v63 = vld [vmem:[#allocation8 + $0x8] sm:$0xff] }
0x1195   :  { %6049 = vmatprep.subr.bf16.mxu1 %v7580_v43  ;;  %4493 = vmatprep.mubr.f32.mxu1 %v6468_v7  ;;  %v4296_v43 = vld [vmem:[#allocation8 + $0x28] sm:$0xff] }
0x1198   :  { %6051 = vmatpush1.bf16.msra.mxu1 %v7582_v31  ;;  %v6012_v31 = vpack.c.bf16 %v4296_v43, %v4292_v63 }
0x1199   :  { %6053 = vmatprep.subr.bf16.mxu1 %v7586_v60  ;;  %v4291_v60 = vld [vmem:[#allocation8] sm:$0xff] }
0x119a   :  { %6013 = vmatprep.subr.bf16.mxu0 %v6012_v31 }
0x119c   :  { %6055 = vmatpush1.bf16.msra.mxu1 %v7588_v17  ;;  %v4295_v17 = vld [vmem:[#allocation8 + $0x20] sm:$0xff] }
0x119d   :  { %6057 = vmatprep.subr.bf16.mxu1 %v7592_v1  ;;  %v6014_v1 = vpack.c.bf16 %v4295_v17, %v4291_v60 }
0x119f   :  { %6015 = vmatpush1.bf16.msra.mxu0 %v6014_v1 }
0x11a0   :  { %6059 = vmatpush1.bf16.msra.mxu1 %v7594_v61  ;;  %v4300_v61 = vld [vmem:[#allocation8 + $0x48] sm:$0xff] }
0x11a1   :  { %6061 = vmatprep.subr.bf16.mxu1 %v7598_v12  ;;  %v4304_v12 = vld [vmem:[#allocation8 + $0x68] sm:$0xff] }
0x11a4   :  { %6063 = vmatpush1.bf16.msra.mxu1 %v7600_v16  ;;  %v6016_v16 = vpack.c.bf16 %v4304_v12, %v4300_v61 }
0x11a5   :  { %6065 = vmatprep.subr.bf16.mxu1 %v7603_v58  ;;  %v4299_v58 = vld [vmem:[#allocation8 + $0x40] sm:$0xff] }
0x11a6   :  { %6017 = vmatprep.subr.bf16.mxu0 %v6016_v16 }
0x11a8   :  { %6067 = vmatpush1.bf16.msra.mxu1 %v7606_v29  ;;  %v4303_v29 = vld [vmem:[#allocation8 + $0x60] sm:$0xff] }
0x11a9   :  { %6069 = vmatprep.subr.bf16.mxu1 %v7609_v37  ;;  %v6018_v37 = vpack.c.bf16 %v4303_v29, %v4299_v58 }
0x11ab   :  { %6019 = vmatpush1.bf16.msra.mxu0 %v6018_v37 }
0x11ac   :  { %6071 = vmatpush1.bf16.msra.mxu1 %v7612_v15  ;;  %v4308_v15 = vld [vmem:[#allocation8 + $0x88] sm:$0xff] }
0x11ad   :  { %6073 = vmatprep.subr.bf16.mxu1 %v7615_v19  ;;  %v4312_v19 = vld [vmem:[#allocation8 + $0xa8] sm:$0xff] }
0x11ae   :  { %v6020_v4 = vpack.c.bf16 %v4312_v19, %v4308_v15 }
0x11b0   :  { %6075 = vmatpush1.bf16.msra.mxu1 %v7618_v45  ;;  %v4307_v45 = vld [vmem:[#allocation8 + $0x80] sm:$0xff]  ;;  %6021 = vmatprep.subr.bf16.mxu0 %v6020_v4 }
0x11b1   :  { %v6022_v11 = vpack.c.bf16 %v4311_v14, %v4307_v45  ;;  %v4283_v14 = vrot.slane %v7711_v25, 7  ;;  %v4545_v25 = vld [vmem:[%s7845_s11] sm:$0xff] }
0x11b3   :  { %6023 = vmatpush1.bf16.msra.mxu0 %v6022_v11 }
0x11b4   :  { %6025 = vmatprep.subr.bf16.mxu0 %v6024_v35 }
0x11b7   :  { %6027 = vmatpush1.bf16.msra.mxu0 %v6026_v33 }
0x11b8   :  { %6029 = vmatprep.subr.bf16.mxu0 %v6028_v47  ;;  %v4546_v47 = vld [vmem:[%s7845_s11 + $0x8] sm:$0xff] }
0x11b9   :  { %v6077_v27 = vpack.c.bf16 %v4546_v47, %v4545_v25 }
0x11bb   :  { %6031 = vmatpush1.bf16.msra.mxu0 %v6030_v23  ;;  %v4549_v23 = vld [vmem:[%s7845_s11 + $0x20] sm:$0xff] }
0x11bc   :  { %6033 = vmatprep.subr.bf16.mxu0 %v6032_v28  ;;  %v6083_v10 = vpack.c.bf16 %v4550_v54, %v4549_v23  ;;  %v4552_v28 = vld [vmem:[%s7845_s11 + $0x38] sm:$0xff] }
0x11bd   :  { %v6086_v50 = vpack.c.bf16 %v4552_v28, %v4551_v39 }
0x11bf   :  { %6035 = vmatpush1.bf16.msra.mxu0 %v6034_v6  ;;  %v4554_v6 = vld [vmem:[%s7845_s11 + $0x48] sm:$0xff] }
0x11c0   :  { %6037 = vmatprep.subr.bf16.mxu0 %v6036_v13  ;;  %v6089_v13 = vpack.c.bf16 %v4554_v6, %v4553_v51 }
0x11c3   :  { %6039 = vmatpush1.bf16.msra.mxu0 %v6038_v44  ;;  %v4558_v44 = vld [vmem:[%s7845_s11 + $0x68] sm:$0xff] }
0x11c4   :  { %6041 = vmatprep.subr.bf16.mxu0 %v6040_v49  ;;  %v6095_v49 = vpack.c.bf16 %v4558_v44, %v4557_v38  ;;  %v2184_v44 = vadd.f32 1.0, %v7232_v59 }
0x11c7   :  { %6043 = vmatpush1.bf16.msra.mxu0 %v6042_v18  ;;  %v6098_v18 = vpack.c.bf16 %v4560_v30, %v4559_v52 }
0x11c8   :  { %6076 = vmatprep.subr.bf16.mxu0 %v6469_v8 }
0x1266   :  { %v4171_v62 = vpop.f32.mrb[34].mxu0  ;;  %v4242_v55 = vpop.f32.mrb[42].mxu1 }
0x1267   :  { %v4251_v36 = vrot.slane %v4171_v62, 2  ;;  %v4253_v34 = vrot.slane %v4242_v55, 2  ;;  %v4173_v41 = vpop.f32.mrb[35].mxu0  ;;  %v4244_v53 = vpop.f32.mrb[43].mxu1 }
0x1268   :  { %v4252_v63 = vrot.slane %v4173_v41, 2  ;;  %v4254_v43 = vrot.slane %v4244_v53, 2 }
0x1269   :  { %v4259_v31 = vadd.f32 %v4251_v36, %v6886_v20  ;;  %v4261_v60 = vadd.f32 %v4253_v34, %v6890_v22 }
0x126a   :  { %v4260_v17 = vadd.f32 %v4252_v63, %v6888_v21  ;;  %v4262_v1 = vadd.f32 %v4254_v43, %v6892_v26 }
0x126b   :  { %v4769_v61 = vmul.f32 -1.442695, %v4259_v31 }
0x126c   :  { %v4770_v12 = vmul.f32 -1.442695, %v4260_v17  ;;  %v4771_v16 = vmul.f32 -1.442695, %v4262_v1 }
0x126d   :  { %6350 = vpow2.f32 %v4769_v61 }
0x126e   :  { %6352 = vpow2.f32 %v4770_v12 }
0x126f   :  { %6354 = vpow2.f32 %v4771_v16 }
0x1270   :  { %6356 = vtanh.f32 %v4261_v60 }
0x1277   :  { %v6351_v58 = vpop.eup %6350 }
0x1278   :  { %v6353_v29 = vpop.eup %6352  ;;  %v4266_v37 = vadd.f32 1.0, %v6351_v58 }
0x1279   :  { %v4272_v15 = vadd.f32 1.0, %v6353_v29  ;;  %v6355_v19 = vpop.eup %6354 }
0x127a   :  { %6358 = vrcp.f32 %v4266_v37  ;;  %v6357_v4 = vpop.eup %6356  ;;  %v4279_v0 = vadd.f32 1.0, %v6355_v19 }
0x127b   :  { %6360 = vrcp.f32 %v4272_v15 }
0x127c   :  { %6362 = vrcp.f32 %v4279_v0 }
0x1284   :  { %v6359_v45 = vpop.eup %6358 }
0x1285   :  { %v6361_v11 = vpop.eup %6360  ;;  %v4286_v46 = vmul.f32 %v6359_v45, %v6357_v4 }
0x1286   :  { %v4285_v35 = vmul.f32 %v6361_v11, %v4283_v14  ;;  %v6363_v24 = vpop.eup %6362 }
0x1288   :  { %v7737_v9 = vadd.f32 %v4286_v46, %v4285_v35 }
0x128a   :  { %6364 = vtanh.f32 %v7737_v9 }
0x1294   :  { %v6365_v33 = vpop.eup %6364 }
0x1295   :  { %v4289_v56 = vmul.f32 %v6365_v33, %v6363_v24  ;;  %v4775_v24 = vld [vmem:[%s7846_s12] ss:$0 sm:$0xff]  ;;  %v4672_v33 = vpop.permute.xlu1 %4671 }
0x1296   :  { %vm4673_vm6 = vcmp.eq.s32.totalorder %v6729_v5, %v4672_v33 }
0x1297   :  { %4290 = vst [vmem:[#allocation2] sm:$0x40] %v4289_v56  ;;  %v4356_v32 = vrot.slane %v4289_v56, 6 }
0x1299   :  { %4423 = vmatmul.mubr.f32.vlgmr.msra.gmra.mrb[36].mxu0 %v4356_v32  ;;  %4494 = vmatmul.mubr.f32.vlgmr.msra.gmra.mrb[44].mxu1 %v4356_v32 }
0x129a   :  { %4963 = vmatprep.mubr.msk.f32.mxu0 %vm6470_vm3, %v6468_v7  ;;  %6078 = vmatpush3.bf16.msra.mxu0 %v6077_v27  ;;  %v4548_v7 = vld [vmem:[%s7845_s11 + $0x18] sm:$0xff] }
0x129b   :  { %6079 = vmatprep.subr.bf16.mxu0 %v6469_v8  ;;  %v6080_v57 = vpack.c.bf16 %v4548_v7, %v4547_v3  ;;  %v2163_v3 = vmul.f32 1.442695, %v7234_v48  ;;  %v2160_v7 = vpop.permute.xlu1 %2159 }
0x129e   :  { %6081 = vmatpush3.bf16.msra.mxu0 %v6080_v57  ;;  %v2156_v57 = vadd.f32 1.0, %v7234_v48 }
0x129f   :  { %6082 = vmatprep.subr.bf16.mxu0 %v6469_v8  ;;  %v2188_v38 = vpop.permute.xlu1 %2187 }
0x12a0   :  { %v2162_v23 = vsub.f32 %v2156_v57, %v2160_v7 }
0x12a2   :  { %6084 = vmatpush3.bf16.msra.mxu0 %v6083_v10 }
0x12a3   :  { %6085 = vmatprep.subr.bf16.mxu0 %v6469_v8 }
0x12a6   :  { %6087 = vmatpush3.bf16.msra.mxu0 %v6086_v50 }
0x12a7   :  { %6088 = vmatprep.subr.bf16.mxu0 %v6469_v8 }
0x12aa   :  { %6090 = vmatpush3.bf16.msra.mxu0 %v6089_v13 }
0x12ab   :  { %6091 = vmatprep.subr.bf16.mxu0 %v6469_v8 }
0x12ae   :  { %6093 = vmatpush3.bf16.msra.mxu0 %v6092_v2  ;;  %v2191_v2 = vmul.f32 1.442695, %v7232_v59 }
0x12af   :  { %6094 = vmatprep.subr.bf16.mxu0 %v6469_v8 }
0x12b2   :  { %6096 = vmatpush3.bf16.msra.mxu0 %v6095_v49  ;;  %v2190_v49 = vsub.f32 %v2184_v44, %v2188_v38 }
0x12b3   :  { %6097 = vmatprep.subr.bf16.mxu0 %v6469_v8 }
0x12b6   :  { %6099 = vmatpush3.bf16.msra.mxu0 %v6098_v18 }
0x136c   :  { %v4424_v62 = vpop.f32.mrb[36].mxu0  ;;  %v4495_v55 = vpop.f32.mrb[44].mxu1 }
0x136d   :  { %v4504_v36 = vrot.slane %v4424_v62, 1  ;;  %v4506_v34 = vrot.slane %v4495_v55, 1  ;;  %v4426_v41 = vpop.f32.mrb[37].mxu0  ;;  %v4497_v53 = vpop.f32.mrb[45].mxu1 }
0x136e   :  { %v4505_v63 = vrot.slane %v4426_v41, 1  ;;  %v4507_v43 = vrot.slane %v4497_v53, 1 }
0x136f   :  { %v4512_v31 = vadd.f32 %v4504_v36, %v6886_v20  ;;  %v4514_v60 = vadd.f32 %v4506_v34, %v6890_v22 }
0x1370   :  { %v4513_v17 = vadd.f32 %v4505_v63, %v6888_v21  ;;  %v4515_v1 = vadd.f32 %v4507_v43, %v6892_v26  ;;  %v4536_v21 = vrot.slane %v7737_v9, 7 }
0x1371   :  { %v4772_v61 = vmul.f32 -1.442695, %v4512_v31 }
0x1372   :  { %v4773_v12 = vmul.f32 -1.442695, %v4513_v17  ;;  %v4774_v8 = vmul.f32 -1.442695, %v4515_v1 }
0x1373   :  { %6366 = vpow2.f32 %v4772_v61 }
0x1374   :  { %6368 = vpow2.f32 %v4773_v12 }
0x1375   :  { %6370 = vpow2.f32 %v4774_v8 }
0x1376   :  { %6372 = vtanh.f32 %v4514_v60 }
0x137d   :  { %v6367_v16 = vpop.eup %6366 }
0x137e   :  { %v6369_v58 = vpop.eup %6368  ;;  %v4519_v29 = vadd.f32 1.0, %v6367_v16 }
0x137f   :  { %v4525_v37 = vadd.f32 1.0, %v6369_v58  ;;  %v6371_v20 = vpop.eup %6370 }
0x1380   :  { %6374 = vrcp.f32 %v4519_v29  ;;  %v6373_v15 = vpop.eup %6372  ;;  %v4532_v4 = vadd.f32 1.0, %v6371_v20 }
0x1381   :  { %6376 = vrcp.f32 %v4525_v37 }
0x1382   :  { %6378 = vrcp.f32 %v4532_v4 }
0x138a   :  { %v6375_v22 = vpop.eup %6374 }
0x138b   :  { %v6377_v19 = vpop.eup %6376  ;;  %v4539_v26 = vmul.f32 %v6375_v22, %v6373_v15 }
0x138c   :  { %v4538_v45 = vmul.f32 %v6377_v19, %v4536_v21  ;;  %v6379_v11 = vpop.eup %6378 }
0x138e   :  { %v4540_v14 = vadd.f32 %v4539_v26, %v4538_v45 }
0x1390   :  { %6380 = vtanh.f32 %v4540_v14 }
0x1391   :  { %6382 = vpow2.f32 %v2163_v3 }
0x139a   :  { %v6381_v46 = vpop.eup %6380 }
0x139b   :  { %v4542_v0 = vmul.f32 %v6381_v46, %v6379_v11  ;;  %v6383_v54 = vpop.eup %6382 }
0x139c   :  { %v2165_v10 = vsub.f32 %v2162_v23, %v6383_v54 }
0x139d   :  { %4543 = vst [vmem:[#allocation2] sm:$0x80] %v4542_v0 }
0x13a4   :  { %v4544_v35 = vld [vmem:[#allocation2] sm:$0xff] }
0x13a5   :  { %4964 = vmatmul.mubr.f32.vlgmr.msra.gmra.mrb[38].mxu0 %v4544_v35 }
0x1478   :  { %v4634_v56 = vpop.f32.mrb[38].mxu0 }
0x1479   :  { %v4635_v9 = vadd.f32 %v4775_v24, %v4634_v56  ;;  %v4965_v32 = vpop.f32.mrb[39].mxu0 }
0x147b   :  { %v4638_v25 = vsel %vm129_vm0, %v4635_v9, -inf  ;;  %v4674_v47 = vsel %vm4673_vm6, %v4635_v9, 0.0 }
0x147c   :  { %4639 = vmax.xlane.f32.xlu0 %v4638_v25  ;;  %v4675_v27 = vsel %vm129_vm0, %v4674_v47, 0.0 }
0x1480   :  { %4676 = vadd.xlane.f32.xlu0 %v4675_v27 }
0x1496   :  { %2167 = vrot.lane.b32.xlu0 %v2165_v10, %s6471_s29 }
0x1509   :  { %v4640_v39 = vpop.xlane.xlu0 %4639 }
0x150a   :  { %vm4641_vm7 = vcmp.eq.f32.partialorder %v4635_v9, %v4640_v39  ;;  %v4660_v28 = vsub.f32 %v4635_v9, %v4640_v39 }
0x150b   :  { %v4642_v50 = vsel %vm4641_vm7, %v6729_v5, 32 }
0x150c   :  { %v4661_v51 = vmul.f32 1.442695, %v4660_v28  ;;  %v4643_v6 = vsel %vm129_vm0, %v4642_v50, 2147483647 }
0x150d   :  { %v4645_v13 = vshra.s32 %v4643_v6, 16  ;;  %v4677_v30 = vpop.xlane.xlu0 %4676  ;;  %v4644_v31 = vand.u32 65535, %v4643_v6 }
0x150e   :  { %6384 = vpow2.f32 %v4661_v51 }
0x150f   :  { %v4647_v42 = vcvt.s32.f32 %v4645_v13  ;;  %6386 = vpow2.f32 %v2191_v2  ;;  %v4646_v17 = vcvt.s32.f32 %v4644_v31 }
0x1511   :  { %4648 = vmin.xlane.f32.xlu0 %v4647_v42  ;;  %v2168_v18 = vpop.permute.xlu0 %2167 }
0x1512   :  { %v2171_v62 = vsel %vm2170_vm8, %v2168_v18, 0.0 }
0x1518   :  { %v6385_v40 = vpop.eup %6384 }
0x1519   :  { %v4663_v48 = vsel %vm129_vm0, %v6385_v40, 0.0  ;;  %v6387_v52 = vpop.eup %6386 }
0x151a   :  { %4664 = vadd.xlane.f32.xlu1 %v4663_v48  ;;  %v2193_v5 = vsub.f32 %v2190_v49, %v6387_v52 }
0x152b   :  { %2195 = vrot.lane.b32.xlu1 %v2193_v5, %s6472_s15 }
0x154f   :  { %2172 = vadd.xlane.f32.xlu1 %v2171_v62 }
0x159e   :  { %v4649_v59 = vpop.xlane.xlu0 %4648 }
0x159f   :  { %vm4650_vm10 = vcmp.eq.f32.partialorder %v4647_v42, %v4649_v59  ;;  %v4655_v14 = vcvt.f32.s32 %v4649_v59 }
0x15a0   :  { %v4651_v1 = vsel %vm4650_vm10, %v4646_v17, inf }
0x15a1   :  { %v4656_v35 = vshll.u32 %v4655_v14, 16 }
0x15a7   :  { %v4665_v55 = vpop.xlane.xlu1 %4664 }
0x15a8   :  { %6388 = vlog2.f32 %v4665_v55 }
0x15ab   :  { %v2196_v36 = vpop.permute.xlu1 %2195 }
0x15ac   :  { %v2198_v34 = vsel %vm2170_vm8, %v2196_v36, 0.0 }
0x15ad   :  { %2199 = vadd.xlane.f32.xlu0 %v2198_v34 }
0x15b2   :  { %v6389_v41 = vpop.eup %6388 }
0x15b3   :  { %v4667_v53 = vmul.f32 0.6931472, %v6389_v41 }
0x15b5   :  { %v4668_v63 = vadd.f32 %v4667_v53, %v4640_v39 }
0x15b7   :  { %v4678_v43 = vsub.f32 %v4668_v63, %v4677_v30 }
0x15b9   :  { %v4679_v60 = vsel %vm4658_vm9, %v4678_v43, 0.0 }
0x15ba   :  { %4680 = vadd.xlane.f32.xlu0 %v4679_v60 }
0x15be   :  { %4652 = vmin.xlane.f32.xlu0 %v4651_v1 }
0x15dc   :  { %v2173_v61 = vpop.xlane.xlu1 %2172 }
0x15dd   :  { %v2174_v12 = vrot.slane %v2173_v61, 4 }
0x15df   :  { %v2175_v8 = vadd.f32 %v2174_v12, %v2173_v61 }
0x15e1   :  { %v2176_v16 = vrot.slane %v2175_v8, 2 }
0x15e3   :  { %v2177_v58 = vadd.f32 %v2176_v16, %v2175_v8 }
0x15e5   :  { %v2178_v29 = vrot.slane %v2177_v58, 1 }
0x15e7   :  { %v2179_v37 = vadd.f32 %v2178_v29, %v2177_v58 }
0x15e9   :  { %6100 = vpush %v2179_v37 }
0x161a   :  { %s6101_s12 = spop %6100 }
0x161b   :  { %s2181_s29 = smul.f32 -0.5, %s6101_s12 }
0x161d   :  { %2183 = sst [smem:[#allocation10 + $0x1]] %s2181_s29 }
0x163a   :  { %v2200_v20 = vpop.xlane.xlu0 %2199 }
0x163b   :  { %v2201_v15 = vrot.slane %v2200_v20, 4 }
0x163d   :  { %v2202_v22 = vadd.f32 %v2201_v15, %v2200_v20 }
0x163f   :  { %v2203_v21 = vrot.slane %v2202_v22, 2 }
0x1641   :  { %v2204_v19 = vadd.f32 %v2203_v21, %v2202_v22 }
0x1643   :  { %v2205_v26 = vrot.slane %v2204_v19, 1 }
0x1645   :  { %v2206_v4 = vadd.f32 %v2205_v26, %v2204_v19 }
0x1647   :  { %6102 = vpush %v2206_v4  ;;  %v4681_v45 = vpop.xlane.xlu0 %4680 }
0x1648   :  { %v4682_v11 = vrot.slane %v4681_v45, 4 }
0x164a   :  { %v4683_v46 = vadd.f32 %v4682_v11, %v4681_v45 }
0x164b   :  { %v4653_v0 = vpop.xlane.xlu0 %4652 }
0x164c   :  { %v4684_v24 = vrot.slane %v4683_v46, 2  ;;  %v4654_v33 = vcvt.f32.s32 %v4653_v0 }
0x164e   :  { %v4657_v56 = vadd.s32 %v4656_v35, %v4654_v33  ;;  %v4685_v9 = vadd.f32 %v4684_v24, %v4683_v46 }
0x1650   :  { %4659 = vst.msk [vmem:[%s7853_s19] sm:$0xff] %vm4658_vm9, %v4657_v56  ;;  %v4686_v32 = vrot.slane %v4685_v9, 1 }
0x1652   :  { %v4687_v25 = vadd.f32 %v4686_v32, %v4685_v9 }
0x1654   :  { %6104 = vpush %v4687_v25 }
0x1678   :  { %s6103_s24 = spop %6102 }
0x1679   :  { %s2208_s3 = smul.f32 -0.5, %s6103_s24 }
0x167b   :  { %2210 = sst [smem:[#allocation10 + $0x2]] %s2208_s3 }
0x1685   :  { %s6105_s7 = spop %6104 }
0x1686   :  { %s4691_s26 = smul.f32 0.125, %s6105_s7 }
0x1688   :  { %4693 = sst [smem:[#allocation10]] %s4691_s26 }
0x1689   :  { %6453 = shalt.err (!%p6450_p7)
}
0x168a   :  { %s6475_s19 = smov [#allocation10]  }
0x168b   :  { %4703 = dma.smem_to_hbm %s6475_s19, 16, %s7854_s20, [#allocation6]  }
0x168c   :  { %6460 = dma.done.wait [#allocation6], 16  }
0x168d   :  { %6461 = vsyncadd [#allocation6], 4294967280 }
0x168e   :  { %4709 = sfence }
0x168f   :  { %4710 = vsyncpa [#allocation4], 1 }
0x1690   :  { %4711 = vsyncpa [#allocation9], 1 }
0x1691   :  { %4712 = vsyncpa [#allocation5], 1 }
0x1692   :  { %4713 = vsyncpa [#allocation6], 1 }

</bundles_post_ra>
